<compile_context>
chip_gen: v6e
topology: v6e:2x2x1
jax: 0.10.0
libtpu: 0.0.40
codegen_flags: <defaults>
</compile_context>

<pallas_src>
import functools

import jax
import jax.numpy as jnp
import numpy as np
from jax import lax
from jax.experimental import pallas as pl
from jax.experimental.pallas import tpu as pltpu

_STRIDES = (2, 1, 2, 1, 2)          # strides of the 5 conv layers in Encoder.net
_SQRT1_2 = 0.7071067811865476


# ----------------------------------------------------------------------------
# In-kernel helpers
# ----------------------------------------------------------------------------
def _gelu_exact(x):
    """Exact (erf-based) GELU, matching torch.nn.GELU default.

    erf via Abramowitz & Stegun 7.1.26 (max abs err ~1.5e-7).  The divide is
    routed to the EUP with pl.reciprocal(approx=True); one Newton step restores
    full f32 accuracy at the cost of 2 VALU ops.
    """
    ax = jnp.abs(x) * _SQRT1_2
    d = 1.0 + 0.3275911 * ax
    t = pl.reciprocal(d, approx=True)
    t = t * (2.0 - d * t)                       # Newton refinement
    poly = ((((1.061405429 * t - 1.453152027) * t + 1.421413741) * t
             - 0.284496736) * t + 0.254829592) * t
    erf_ax = 1.0 - poly * jnp.exp(-ax * ax)
    erf_x = jnp.where(x < 0.0, -erf_ax, erf_ax)
    return 0.5 * x * (1.0 + erf_x)


def _row_select(n_out, n_in, stride, kh):
    """(n_out, n_in) one-hot matrix: R[i, h] = 1 iff h == stride*i + kh - 1.

    Rows whose source index falls outside [0, n_in) are all-zero, which
    implements the top/bottom zero padding of the conv.
    """
    i = lax.broadcasted_iota(jnp.int32, (n_out, n_in), 0)
    h = lax.broadcasted_iota(jnp.int32, (n_out, n_in), 1)
    return (h == stride * i + (kh - 1)).astype(jnp.float32)


# ----------------------------------------------------------------------------
# The fused encoder kernel
# ----------------------------------------------------------------------------
def _encoder_kernel(cfgs, x_ref, *refs):
    # refs layout: [U0, b0, U1, b1, ..., U4, b4, wfc, fcb, out]
    out_ref = refs[-1]
    fcb_ref = refs[-2]
    wfc_ref = refs[-3]

    a = x_ref[0]                                        # (H0, W0*C0) f32

    for li, (stride, h_in, w_in, c_in, c_out, h_out, w_out) in enumerate(cfgs):
        u_ref = refs[2 * li]                            # (3, Win*Cin, Wout*Cout)
        b_ref = refs[2 * li + 1]                        # (1, Wout*Cout)
        acc = jnp.zeros((h_out, w_out * c_out), jnp.float32)
        for kh in range(3):
            if stride == 1 and kh == 1:                 # identity row selection
                rows = a
            else:
                rows = jnp.dot(_row_select(h_out, h_in, stride, kh), a,
                               preferred_element_type=jnp.float32)
            acc = acc + jnp.dot(rows, u_ref[kh],
                                preferred_element_type=jnp.float32)
        a = _gelu_exact(acc + b_ref[...])               # (h_out, w_out*c_out)

    # Final Linear (fc_w rows pre-permuted host-side to NHWC flatten order).
    h_final = cfgs[-1][5]
    z = fcb_ref[...]                                    # (1, latent)
    for h in range(h_final):
        z = z + jnp.dot(a[h:h + 1, :], wfc_ref[h],
                        preferred_element_type=jnp.float32)
    out_ref[0] = z


def _const_index_map(ndim):
    return lambda b: (0,) * ndim


def encoder_forward(x_nchw, prepped, cfgs, latent_dim):
    """x_nchw: (B, C, H, W) like the PyTorch module.  prepped/cfgs from prepare_params."""
    B = x_nchw.shape[0]
    _, h0, w0, c0, _, _, _ = cfgs[0]
    # NCHW -> NHWC -> (B, H, W*C) 2D layout used throughout the kernel.
    x2d = jnp.transpose(x_nchw, (0, 2, 3, 1)).reshape(B, h0, w0 * c0).astype(jnp.float32)

    in_specs = [pl.BlockSpec((1, h0, w0 * c0), lambda b: (b, 0, 0))]
    for arr in prepped:                                 # weights: resident across grid
        in_specs.append(pl.BlockSpec(arr.shape, _const_index_map(arr.ndim)))
    out_spec = pl.BlockSpec((1, 1, latent_dim), lambda b: (b, 0, 0))

    # Advisory cost estimate for XLA's scheduler.
    flops = 0
    gelu_elems = 0
    for (s, hi, wi, ci, co, ho, wo) in cfgs:
        flops += B * 3 * (2 * ho * hi * (wi * ci) + 2 * ho * (wi * ci) * (wo * co))
        gelu_elems += B * ho * wo * co
    s_, hi_, wi_, ci_, co_, ho_, wo_ = cfgs[-1]
    flops += B * 2 * ho_ * (wo_ * co_) * latent_dim
    bytes_accessed = 4 * (x2d.size + sum(int(a.size) for a in prepped) + B * latent_dim)

    grid_spec = pltpu.PrefetchScalarGridSpec(
        num_scalar_prefetch=0,
        grid=(B,),
        in_specs=in_specs,
        out_specs=out_spec,
    )
    out = pl.pallas_call(
        functools.partial(_encoder_kernel, cfgs),
        out_shape=jax.ShapeDtypeStruct((B, 1, latent_dim), jnp.float32),
        grid_spec=grid_spec,
        compiler_params=pltpu.CompilerParams(
            dimension_semantics=("parallel",),          # batch across cores on v7x
            vmem_limit_bytes=32 * 1024 * 1024,          # explicit, fits v5e/v6e/v7x
        ),
        cost_estimate=pl.CostEstimate(
            flops=flops,
            transcendentals=2 * gelu_elems,             # exp + reciprocal per element
            bytes_accessed=bytes_accessed),
    )(x2d, *prepped)
    return out.reshape(B, latent_dim)


# ----------------------------------------------------------------------------
# One-time host-side parameter preparation (weight reshaping is free at init)
# ----------------------------------------------------------------------------
def prepare_params(params, num_input_channels, spatial=32):
    h = w = spatial
    c_in = num_input_channels
    cfgs = []
    prepped = []
    for i, s in enumerate(_STRIDES):
        wgt = np.asarray(params[f"conv{i}_w"], dtype=np.float32)   # (3,3,Cin,Cout) HWIO
        bias = np.asarray(params[f"conv{i}_b"], dtype=np.float32)  # (Cout,)
        c_out = wgt.shape[3]
        h_out = (h + 2 - 3) // s + 1
        w_out = (w + 2 - 3) // s + 1
        # U[kh]: (W*Cin, Wout*Cout) -- folds W-stride, W zero padding and channel mixing.
        u = np.zeros((3, w * c_in, w_out * c_out), np.float32)
        for kh in range(3):
            for kw in range(3):
                for j in range(w_out):
                    src = s * j + kw - 1
                    if 0 <= src < w:
                        u[kh, src * c_in:(src + 1) * c_in,
                          j * c_out:(j + 1) * c_out] += wgt[kh, kw]
        b_row = np.tile(bias, w_out).reshape(1, w_out * c_out).astype(np.float32)
        prepped += [jnp.asarray(u), jnp.asarray(b_row)]
        cfgs.append((s, h, w, c_in, c_out, h_out, w_out))
        h, w, c_in = h_out, w_out, c_out

    # FC: permute rows so the NHWC-ordered (h, w*C+c) activation is consumed directly
    # (reproduces PyTorch's NCHW (c,h,w) Flatten order without any runtime transpose).
    fc_w = np.asarray(params["fc_w"], dtype=np.float32)            # (C*H*W, latent)
    fc_b = np.asarray(params["fc_b"], dtype=np.float32)
    latent = fc_w.shape[1]
    wfc = fc_w.reshape(c_in, h, w, latent).transpose(1, 2, 0, 3).reshape(h, w * c_in, latent)
    prepped += [jnp.asarray(np.ascontiguousarray(wfc)),
                jnp.asarray(fc_b.reshape(1, latent))]
    return tuple(prepped), tuple(cfgs)


# ----------------------------------------------------------------------------
# Pure-JAX reference (exact semantics of the PyTorch module) for the self-test
# ----------------------------------------------------------------------------
def reference_forward(x_nchw, params):
    x = jnp.transpose(x_nchw, (0, 2, 3, 1))
    B = x.shape[0]
    for i, s in enumerate(_STRIDES):
        w = params[f"conv{i}_w"]
        b = params[f"conv{i}_b"]
        x = lax.conv_general_dilated(
            x, w, window_strides=(s, s), padding=((1, 1), (1, 1)),
            dimension_numbers=("NHWC", "HWIO", "NHWC"))
        x = jax.nn.gelu(x + b, approximate=False)
    feat = jnp.transpose(x, (0, 3, 1, 2)).reshape(B, -1)           # (C,H,W) flatten
    return feat @ params["fc_w"] + params["fc_b"]


# ----------------------------------------------------------------------------
# Deterministic parameter construction (shapes from Encoder.__init__)
# ----------------------------------------------------------------------------
def init_params(key, num_input_channels, base_channel_size, latent_dim):
    c_hid = base_channel_size
    conv_io = [(num_input_channels, c_hid), (c_hid, c_hid), (c_hid, 2 * c_hid),
               (2 * c_hid, 2 * c_hid), (2 * c_hid, 2 * c_hid)]
    params = {}
    keys = jax.random.split(key, len(conv_io) + 1)
    for i, (ci, co) in enumerate(conv_io):
        kw, kb = jax.random.split(keys[i])
        params[f"conv{i}_w"] = jax.random.normal(kw, (3, 3, ci, co), jnp.float32) / np.sqrt(9 * ci)
        params[f"conv{i}_b"] = jax.random.normal(kb, (co,), jnp.float32) * 0.01
    kw, kb = jax.random.split(keys[-1])
    in_feat = 2 * 16 * c_hid                            # requires 32x32 spatial input
    params["fc_w"] = jax.random.normal(kw, (in_feat, latent_dim), jnp.float32) / np.sqrt(in_feat)
    params["fc_b"] = jax.random.normal(kb, (latent_dim,), jnp.float32) * 0.01
    return params


if __name__ == "__main__":
    B, C_IN, HW = 2, 3, 32              # Linear(2*16*c_hid, ...) implies 32x32 input
    C_HID, LATENT = 8, 16

    key = jax.random.PRNGKey(0)
    k_x, k_p = jax.random.split(key)
    x = jax.random.normal(k_x, (B, C_IN, HW, HW), jnp.float32)     # NCHW, PyTorch layout
    params = init_params(k_p, C_IN, C_HID, LATENT)

    prepped, cfgs = prepare_params(params, C_IN, spatial=HW)

    fwd = jax.jit(encoder_forward, static_argnums=(2, 3))
    z = jax.block_until_ready(fwd(x, prepped, cfgs, LATENT))
    assert z.shape == (B, LATENT), z.shape

    z_ref = jax.block_until_ready(reference_forward(x, params))
    # Kernel keeps f32 matmuls + f32 GELU (observed error ~1e-6); tolerance left
    # with headroom for the EUP approximate-reciprocal + Newton path.
    np.testing.assert_allclose(np.asarray(z), np.asarray(z_ref), rtol=1e-3, atol=1e-3)

    print("KERNEL_OK")
</pallas_src>

<mosaic_0001>
module attributes {stable_mosaic.version = 11 : i64} {
  func.func @_encoder_kernel(%arg0: i32, %arg1: memref<1x32x96xf32, #tpu.memory_space<vmem>>, %arg2: memref<3x96x128xf32, #tpu.memory_space<vmem>>, %arg3: memref<1x128xf32, #tpu.memory_space<vmem>>, %arg4: memref<3x128x128xf32, #tpu.memory_space<vmem>>, %arg5: memref<1x128xf32, #tpu.memory_space<vmem>>, %arg6: memref<3x128x128xf32, #tpu.memory_space<vmem>>, %arg7: memref<1x128xf32, #tpu.memory_space<vmem>>, %arg8: memref<3x128x128xf32, #tpu.memory_space<vmem>>, %arg9: memref<1x128xf32, #tpu.memory_space<vmem>>, %arg10: memref<3x128x64xf32, #tpu.memory_space<vmem>>, %arg11: memref<1x64xf32, #tpu.memory_space<vmem>>, %arg12: memref<4x64x16xf32, #tpu.memory_space<vmem>>, %arg13: memref<1x16xf32, #tpu.memory_space<vmem>>, %arg14: memref<1x1x16xf32, #tpu.memory_space<vmem>>) attributes {dimension_semantics = [#tpu.dimension_semantics<parallel>], iteration_bounds = array<i64: 2>, scalar_prefetch = 0 : i64, scratch_operands = 0 : i64, tpu.core_type = #tpu.core_type<tc>, window_params = [{transform_indices = @transform_0, window_bounds = array<i64: 1, 32, 96>}, {pipeline_mode = #tpu.pipeline_mode<synchronous>, transform_indices = @transform_1, window_bounds = array<i64: 3, 96, 128>}, {pipeline_mode = #tpu.pipeline_mode<synchronous>, transform_indices = @transform_2, window_bounds = array<i64: 1, 128>}, {pipeline_mode = #tpu.pipeline_mode<synchronous>, transform_indices = @transform_3, window_bounds = array<i64: 3, 128, 128>}, {pipeline_mode = #tpu.pipeline_mode<synchronous>, transform_indices = @transform_4, window_bounds = array<i64: 1, 128>}, {pipeline_mode = #tpu.pipeline_mode<synchronous>, transform_indices = @transform_5, window_bounds = array<i64: 3, 128, 128>}, {pipeline_mode = #tpu.pipeline_mode<synchronous>, transform_indices = @transform_6, window_bounds = array<i64: 1, 128>}, {pipeline_mode = #tpu.pipeline_mode<synchronous>, transform_indices = @transform_7, window_bounds = array<i64: 3, 128, 128>}, {pipeline_mode = #tpu.pipeline_mode<synchronous>, transform_indices = @transform_8, window_bounds = array<i64: 1, 128>}, {pipeline_mode = #tpu.pipeline_mode<synchronous>, transform_indices = @transform_9, window_bounds = array<i64: 3, 128, 64>}, {pipeline_mode = #tpu.pipeline_mode<synchronous>, transform_indices = @transform_10, window_bounds = array<i64: 1, 64>}, {pipeline_mode = #tpu.pipeline_mode<synchronous>, transform_indices = @transform_11, window_bounds = array<i64: 4, 64, 16>}, {pipeline_mode = #tpu.pipeline_mode<synchronous>, transform_indices = @transform_12, window_bounds = array<i64: 1, 16>}, {transform_indices = @transform_13, window_bounds = array<i64: 1, 1, 16>}]} {
    %c0 = arith.constant 0 : index
    %c0_0 = arith.constant 0 : index
    %c0_1 = arith.constant 0 : index
    %0 = vector.load %arg1[%c0, %c0_0, %c0_1] : memref<1x32x96xf32, #tpu.memory_space<vmem>>, vector<1x32x96xf32>
    %1 = vector.shape_cast %0 : vector<1x32x96xf32> to vector<32x96xf32>
    %cst = arith.constant 0.000000e+00 : f32
    %2 = vector.broadcast %cst : f32 to vector<16x128xf32>
    %3 = tpu.iota {dimensions = array<i32: 0>} : vector<16x32xi32>
    %4 = tpu.iota {dimensions = array<i32: 1>} : vector<16x32xi32>
    %c2_i32 = arith.constant 2 : i32
    %5 = vector.broadcast %c2_i32 : i32 to vector<16x32xi32>
    %6 = arith.muli %5, %3 : vector<16x32xi32>
    %c-1_i32 = arith.constant -1 : i32
    %7 = vector.broadcast %c-1_i32 : i32 to vector<16x32xi32>
    %8 = arith.addi %6, %7 : vector<16x32xi32>
    %9 = arith.cmpi eq, %4, %8 : vector<16x32xi32>
    %10 = arith.extui %9 : vector<16x32xi1> to vector<16x32xi32>
    %11 = arith.sitofp %10 : vector<16x32xi32> to vector<16x32xf32>
    %cst_2 = arith.constant dense<0.000000e+00> : vector<16x96xf32>
    %12 = tpu.matmul %11, %1, %cst_2 {dimension_numbers = #tpu.dot_dimension_numbers<[1], [0], [0], [1], [0, 0, 1, 1], [], []>} : vector<16x32xf32>, vector<32x96xf32>, vector<16x96xf32> -> vector<16x96xf32>
    %c0_3 = arith.constant 0 : index
    %c0_4 = arith.constant 0 : index
    %c0_5 = arith.constant 0 : index
    %13 = vector.load %arg2[%c0_3, %c0_4, %c0_5] : memref<3x96x128xf32, #tpu.memory_space<vmem>>, vector<1x96x128xf32>
    %14 = vector.shape_cast %13 : vector<1x96x128xf32> to vector<96x128xf32>
    %cst_6 = arith.constant dense<0.000000e+00> : vector<16x128xf32>
    %15 = tpu.matmul %12, %14, %cst_6 {dimension_numbers = #tpu.dot_dimension_numbers<[1], [0], [0], [1], [0, 0, 1, 1], [], []>} : vector<16x96xf32>, vector<96x128xf32>, vector<16x128xf32> -> vector<16x128xf32>
    %16 = arith.addf %2, %15 : vector<16x128xf32>
    %17 = tpu.iota {dimensions = array<i32: 0>} : vector<16x32xi32>
    %18 = tpu.iota {dimensions = array<i32: 1>} : vector<16x32xi32>
    %c2_i32_7 = arith.constant 2 : i32
    %19 = vector.broadcast %c2_i32_7 : i32 to vector<16x32xi32>
    %20 = arith.muli %19, %17 : vector<16x32xi32>
    %c0_i32 = arith.constant 0 : i32
    %21 = vector.broadcast %c0_i32 : i32 to vector<16x32xi32>
    %22 = arith.addi %20, %21 : vector<16x32xi32>
    %23 = arith.cmpi eq, %18, %22 : vector<16x32xi32>
    %24 = arith.extui %23 : vector<16x32xi1> to vector<16x32xi32>
    %25 = arith.sitofp %24 : vector<16x32xi32> to vector<16x32xf32>
    %cst_8 = arith.constant dense<0.000000e+00> : vector<16x96xf32>
    %26 = tpu.matmul %25, %1, %cst_8 {dimension_numbers = #tpu.dot_dimension_numbers<[1], [0], [0], [1], [0, 0, 1, 1], [], []>} : vector<16x32xf32>, vector<32x96xf32>, vector<16x96xf32> -> vector<16x96xf32>
    %c1 = arith.constant 1 : index
    %c0_9 = arith.constant 0 : index
    %c0_10 = arith.constant 0 : index
    %27 = vector.load %arg2[%c1, %c0_9, %c0_10] : memref<3x96x128xf32, #tpu.memory_space<vmem>>, vector<1x96x128xf32>
    %28 = vector.shape_cast %27 : vector<1x96x128xf32> to vector<96x128xf32>
    %cst_11 = arith.constant dense<0.000000e+00> : vector<16x128xf32>
    %29 = tpu.matmul %26, %28, %cst_11 {dimension_numbers = #tpu.dot_dimension_numbers<[1], [0], [0], [1], [0, 0, 1, 1], [], []>} : vector<16x96xf32>, vector<96x128xf32>, vector<16x128xf32> -> vector<16x128xf32>
    %30 = arith.addf %16, %29 : vector<16x128xf32>
    %31 = tpu.iota {dimensions = array<i32: 0>} : vector<16x32xi32>
    %32 = tpu.iota {dimensions = array<i32: 1>} : vector<16x32xi32>
    %c2_i32_12 = arith.constant 2 : i32
    %33 = vector.broadcast %c2_i32_12 : i32 to vector<16x32xi32>
    %34 = arith.muli %33, %31 : vector<16x32xi32>
    %c1_i32 = arith.constant 1 : i32
    %35 = vector.broadcast %c1_i32 : i32 to vector<16x32xi32>
    %36 = arith.addi %34, %35 : vector<16x32xi32>
    %37 = arith.cmpi eq, %32, %36 : vector<16x32xi32>
    %38 = arith.extui %37 : vector<16x32xi1> to vector<16x32xi32>
    %39 = arith.sitofp %38 : vector<16x32xi32> to vector<16x32xf32>
    %cst_13 = arith.constant dense<0.000000e+00> : vector<16x96xf32>
    %40 = tpu.matmul %39, %1, %cst_13 {dimension_numbers = #tpu.dot_dimension_numbers<[1], [0], [0], [1], [0, 0, 1, 1], [], []>} : vector<16x32xf32>, vector<32x96xf32>, vector<16x96xf32> -> vector<16x96xf32>
    %c2 = arith.constant 2 : index
    %c0_14 = arith.constant 0 : index
    %c0_15 = arith.constant 0 : index
    %41 = vector.load %arg2[%c2, %c0_14, %c0_15] : memref<3x96x128xf32, #tpu.memory_space<vmem>>, vector<1x96x128xf32>
    %42 = vector.shape_cast %41 : vector<1x96x128xf32> to vector<96x128xf32>
    %cst_16 = arith.constant dense<0.000000e+00> : vector<16x128xf32>
    %43 = tpu.matmul %40, %42, %cst_16 {dimension_numbers = #tpu.dot_dimension_numbers<[1], [0], [0], [1], [0, 0, 1, 1], [], []>} : vector<16x96xf32>, vector<96x128xf32>, vector<16x128xf32> -> vector<16x128xf32>
    %44 = arith.addf %30, %43 : vector<16x128xf32>
    %c0_17 = arith.constant 0 : index
    %c0_18 = arith.constant 0 : index
    %45 = vector.load %arg3[%c0_17, %c0_18] : memref<1x128xf32, #tpu.memory_space<vmem>>, vector<1x128xf32>
    %46 = vector.broadcast %45 : vector<1x128xf32> to vector<16x128xf32>
    %47 = arith.addf %44, %46 : vector<16x128xf32>
    %48 = math.absf %47 : vector<16x128xf32>
    %cst_19 = arith.constant 0.707106769 : f32
    %49 = vector.broadcast %cst_19 : f32 to vector<16x128xf32>
    %50 = arith.mulf %48, %49 : vector<16x128xf32>
    %cst_20 = arith.constant 0.327591091 : f32
    %51 = vector.broadcast %cst_20 : f32 to vector<16x128xf32>
    %52 = arith.mulf %51, %50 : vector<16x128xf32>
    %cst_21 = arith.constant 1.000000e+00 : f32
    %53 = vector.broadcast %cst_21 : f32 to vector<16x128xf32>
    %54 = arith.addf %53, %52 : vector<16x128xf32>
    %55 = tpu.reciprocal %54 {approx = true} : vector<16x128xf32> -> vector<16x128xf32>
    %56 = arith.mulf %54, %55 : vector<16x128xf32>
    %cst_22 = arith.constant 2.000000e+00 : f32
    %57 = vector.broadcast %cst_22 : f32 to vector<16x128xf32>
    %58 = arith.subf %57, %56 : vector<16x128xf32>
    %59 = arith.mulf %55, %58 : vector<16x128xf32>
    %cst_23 = arith.constant 1.06140542 : f32
    %60 = vector.broadcast %cst_23 : f32 to vector<16x128xf32>
    %61 = arith.mulf %60, %59 : vector<16x128xf32>
    %cst_24 = arith.constant 1.45315206 : f32
    %62 = vector.broadcast %cst_24 : f32 to vector<16x128xf32>
    %63 = arith.subf %61, %62 : vector<16x128xf32>
    %64 = arith.mulf %63, %59 : vector<16x128xf32>
    %cst_25 = arith.constant 1.42141378 : f32
    %65 = vector.broadcast %cst_25 : f32 to vector<16x128xf32>
    %66 = arith.addf %64, %65 : vector<16x128xf32>
    %67 = arith.mulf %66, %59 : vector<16x128xf32>
    %cst_26 = arith.constant 0.284496725 : f32
    %68 = vector.broadcast %cst_26 : f32 to vector<16x128xf32>
    %69 = arith.subf %67, %68 : vector<16x128xf32>
    %70 = arith.mulf %69, %59 : vector<16x128xf32>
    %cst_27 = arith.constant 0.254829586 : f32
    %71 = vector.broadcast %cst_27 : f32 to vector<16x128xf32>
    %72 = arith.addf %70, %71 : vector<16x128xf32>
    %73 = arith.mulf %72, %59 : vector<16x128xf32>
    %cst_28 = arith.constant 0.000000e+00 : f32
    %74 = vector.broadcast %cst_28 : f32 to vector<16x128xf32>
    %75 = arith.subf %74, %50 : vector<16x128xf32>
    %76 = arith.mulf %75, %50 : vector<16x128xf32>
    %77 = math.exp %76 : vector<16x128xf32>
    %78 = arith.mulf %73, %77 : vector<16x128xf32>
    %cst_29 = arith.constant 1.000000e+00 : f32
    %79 = vector.broadcast %cst_29 : f32 to vector<16x128xf32>
    %80 = arith.subf %79, %78 : vector<16x128xf32>
    %cst_30 = arith.constant 0.000000e+00 : f32
    %81 = vector.broadcast %cst_30 : f32 to vector<16x128xf32>
    %82 = arith.cmpf olt, %47, %81 : vector<16x128xf32>
    %cst_31 = arith.constant 0.000000e+00 : f32
    %83 = vector.broadcast %cst_31 : f32 to vector<16x128xf32>
    %84 = arith.subf %83, %80 : vector<16x128xf32>
    %85 = arith.select %82, %84, %80 : vector<16x128xi1>, vector<16x128xf32>
    %cst_32 = arith.constant 5.000000e-01 : f32
    %86 = vector.broadcast %cst_32 : f32 to vector<16x128xf32>
    %87 = arith.mulf %86, %47 : vector<16x128xf32>
    %cst_33 = arith.constant 1.000000e+00 : f32
    %88 = vector.broadcast %cst_33 : f32 to vector<16x128xf32>
    %89 = arith.addf %88, %85 : vector<16x128xf32>
    %90 = arith.mulf %87, %89 : vector<16x128xf32>
    %cst_34 = arith.constant 0.000000e+00 : f32
    %91 = vector.broadcast %cst_34 : f32 to vector<16x128xf32>
    %92 = tpu.iota {dimensions = array<i32: 0>} : vector<16x16xi32>
    %93 = tpu.iota {dimensions = array<i32: 1>} : vector<16x16xi32>
    %c1_i32_35 = arith.constant 1 : i32
    %94 = vector.broadcast %c1_i32_35 : i32 to vector<16x16xi32>
    %95 = arith.muli %94, %92 : vector<16x16xi32>
    %c-1_i32_36 = arith.constant -1 : i32
    %96 = vector.broadcast %c-1_i32_36 : i32 to vector<16x16xi32>
    %97 = arith.addi %95, %96 : vector<16x16xi32>
    %98 = arith.cmpi eq, %93, %97 : vector<16x16xi32>
    %99 = arith.extui %98 : vector<16x16xi1> to vector<16x16xi32>
    %100 = arith.sitofp %99 : vector<16x16xi32> to vector<16x16xf32>
    %cst_37 = arith.constant dense<0.000000e+00> : vector<16x128xf32>
    %101 = tpu.matmul %100, %90, %cst_37 {dimension_numbers = #tpu.dot_dimension_numbers<[1], [0], [0], [1], [0, 0, 1, 1], [], []>} : vector<16x16xf32>, vector<16x128xf32>, vector<16x128xf32> -> vector<16x128xf32>
    %c0_38 = arith.constant 0 : index
    %c0_39 = arith.constant 0 : index
    %c0_40 = arith.constant 0 : index
    %102 = vector.load %arg4[%c0_38, %c0_39, %c0_40] : memref<3x128x128xf32, #tpu.memory_space<vmem>>, vector<1x128x128xf32>
    %103 = vector.shape_cast %102 : vector<1x128x128xf32> to vector<128x128xf32>
    %cst_41 = arith.constant dense<0.000000e+00> : vector<16x128xf32>
    %104 = tpu.matmul %101, %103, %cst_41 {dimension_numbers = #tpu.dot_dimension_numbers<[1], [0], [0], [1], [0, 0, 1, 1], [], []>} : vector<16x128xf32>, vector<128x128xf32>, vector<16x128xf32> -> vector<16x128xf32>
    %105 = arith.addf %91, %104 : vector<16x128xf32>
    %c1_42 = arith.constant 1 : index
    %c0_43 = arith.constant 0 : index
    %c0_44 = arith.constant 0 : index
    %106 = vector.load %arg4[%c1_42, %c0_43, %c0_44] : memref<3x128x128xf32, #tpu.memory_space<vmem>>, vector<1x128x128xf32>
    %107 = vector.shape_cast %106 : vector<1x128x128xf32> to vector<128x128xf32>
    %cst_45 = arith.constant dense<0.000000e+00> : vector<16x128xf32>
    %108 = tpu.matmul %90, %107, %cst_45 {dimension_numbers = #tpu.dot_dimension_numbers<[1], [0], [0], [1], [0, 0, 1, 1], [], []>} : vector<16x128xf32>, vector<128x128xf32>, vector<16x128xf32> -> vector<16x128xf32>
    %109 = arith.addf %105, %108 : vector<16x128xf32>
    %110 = tpu.iota {dimensions = array<i32: 0>} : vector<16x16xi32>
    %111 = tpu.iota {dimensions = array<i32: 1>} : vector<16x16xi32>
    %c1_i32_46 = arith.constant 1 : i32
    %112 = vector.broadcast %c1_i32_46 : i32 to vector<16x16xi32>
    %113 = arith.muli %112, %110 : vector<16x16xi32>
    %c1_i32_47 = arith.constant 1 : i32
    %114 = vector.broadcast %c1_i32_47 : i32 to vector<16x16xi32>
    %115 = arith.addi %113, %114 : vector<16x16xi32>
    %116 = arith.cmpi eq, %111, %115 : vector<16x16xi32>
    %117 = arith.extui %116 : vector<16x16xi1> to vector<16x16xi32>
    %118 = arith.sitofp %117 : vector<16x16xi32> to vector<16x16xf32>
    %cst_48 = arith.constant dense<0.000000e+00> : vector<16x128xf32>
    %119 = tpu.matmul %118, %90, %cst_48 {dimension_numbers = #tpu.dot_dimension_numbers<[1], [0], [0], [1], [0, 0, 1, 1], [], []>} : vector<16x16xf32>, vector<16x128xf32>, vector<16x128xf32> -> vector<16x128xf32>
    %c2_49 = arith.constant 2 : index
    %c0_50 = arith.constant 0 : index
    %c0_51 = arith.constant 0 : index
    %120 = vector.load %arg4[%c2_49, %c0_50, %c0_51] : memref<3x128x128xf32, #tpu.memory_space<vmem>>, vector<1x128x128xf32>
    %121 = vector.shape_cast %120 : vector<1x128x128xf32> to vector<128x128xf32>
    %cst_52 = arith.constant dense<0.000000e+00> : vector<16x128xf32>
    %122 = tpu.matmul %119, %121, %cst_52 {dimension_numbers = #tpu.dot_dimension_numbers<[1], [0], [0], [1], [0, 0, 1, 1], [], []>} : vector<16x128xf32>, vector<128x128xf32>, vector<16x128xf32> -> vector<16x128xf32>
    %123 = arith.addf %109, %122 : vector<16x128xf32>
    %c0_53 = arith.constant 0 : index
    %c0_54 = arith.constant 0 : index
    %124 = vector.load %arg5[%c0_53, %c0_54] : memref<1x128xf32, #tpu.memory_space<vmem>>, vector<1x128xf32>
    %125 = vector.broadcast %124 : vector<1x128xf32> to vector<16x128xf32>
    %126 = arith.addf %123, %125 : vector<16x128xf32>
    %127 = math.absf %126 : vector<16x128xf32>
    %cst_55 = arith.constant 0.707106769 : f32
    %128 = vector.broadcast %cst_55 : f32 to vector<16x128xf32>
    %129 = arith.mulf %127, %128 : vector<16x128xf32>
    %cst_56 = arith.constant 0.327591091 : f32
    %130 = vector.broadcast %cst_56 : f32 to vector<16x128xf32>
    %131 = arith.mulf %130, %129 : vector<16x128xf32>
    %cst_57 = arith.constant 1.000000e+00 : f32
    %132 = vector.broadcast %cst_57 : f32 to vector<16x128xf32>
    %133 = arith.addf %132, %131 : vector<16x128xf32>
    %134 = tpu.reciprocal %133 {approx = true} : vector<16x128xf32> -> vector<16x128xf32>
    %135 = arith.mulf %133, %134 : vector<16x128xf32>
    %cst_58 = arith.constant 2.000000e+00 : f32
    %136 = vector.broadcast %cst_58 : f32 to vector<16x128xf32>
    %137 = arith.subf %136, %135 : vector<16x128xf32>
    %138 = arith.mulf %134, %137 : vector<16x128xf32>
    %cst_59 = arith.constant 1.06140542 : f32
    %139 = vector.broadcast %cst_59 : f32 to vector<16x128xf32>
    %140 = arith.mulf %139, %138 : vector<16x128xf32>
    %cst_60 = arith.constant 1.45315206 : f32
    %141 = vector.broadcast %cst_60 : f32 to vector<16x128xf32>
    %142 = arith.subf %140, %141 : vector<16x128xf32>
    %143 = arith.mulf %142, %138 : vector<16x128xf32>
    %cst_61 = arith.constant 1.42141378 : f32
    %144 = vector.broadcast %cst_61 : f32 to vector<16x128xf32>
    %145 = arith.addf %143, %144 : vector<16x128xf32>
    %146 = arith.mulf %145, %138 : vector<16x128xf32>
    %cst_62 = arith.constant 0.284496725 : f32
    %147 = vector.broadcast %cst_62 : f32 to vector<16x128xf32>
    %148 = arith.subf %146, %147 : vector<16x128xf32>
    %149 = arith.mulf %148, %138 : vector<16x128xf32>
    %cst_63 = arith.constant 0.254829586 : f32
    %150 = vector.broadcast %cst_63 : f32 to vector<16x128xf32>
    %151 = arith.addf %149, %150 : vector<16x128xf32>
    %152 = arith.mulf %151, %138 : vector<16x128xf32>
    %cst_64 = arith.constant 0.000000e+00 : f32
    %153 = vector.broadcast %cst_64 : f32 to vector<16x128xf32>
    %154 = arith.subf %153, %129 : vector<16x128xf32>
    %155 = arith.mulf %154, %129 : vector<16x128xf32>
    %156 = math.exp %155 : vector<16x128xf32>
    %157 = arith.mulf %152, %156 : vector<16x128xf32>
    %cst_65 = arith.constant 1.000000e+00 : f32
    %158 = vector.broadcast %cst_65 : f32 to vector<16x128xf32>
    %159 = arith.subf %158, %157 : vector<16x128xf32>
    %cst_66 = arith.constant 0.000000e+00 : f32
    %160 = vector.broadcast %cst_66 : f32 to vector<16x128xf32>
    %161 = arith.cmpf olt, %126, %160 : vector<16x128xf32>
    %cst_67 = arith.constant 0.000000e+00 : f32
    %162 = vector.broadcast %cst_67 : f32 to vector<16x128xf32>
    %163 = arith.subf %162, %159 : vector<16x128xf32>
    %164 = arith.select %161, %163, %159 : vector<16x128xi1>, vector<16x128xf32>
    %cst_68 = arith.constant 5.000000e-01 : f32
    %165 = vector.broadcast %cst_68 : f32 to vector<16x128xf32>
    %166 = arith.mulf %165, %126 : vector<16x128xf32>
    %cst_69 = arith.constant 1.000000e+00 : f32
    %167 = vector.broadcast %cst_69 : f32 to vector<16x128xf32>
    %168 = arith.addf %167, %164 : vector<16x128xf32>
    %169 = arith.mulf %166, %168 : vector<16x128xf32>
    %cst_70 = arith.constant 0.000000e+00 : f32
    %170 = vector.broadcast %cst_70 : f32 to vector<8x128xf32>
    %171 = tpu.iota {dimensions = array<i32: 0>} : vector<8x16xi32>
    %172 = tpu.iota {dimensions = array<i32: 1>} : vector<8x16xi32>
    %c2_i32_71 = arith.constant 2 : i32
    %173 = vector.broadcast %c2_i32_71 : i32 to vector<8x16xi32>
    %174 = arith.muli %173, %171 : vector<8x16xi32>
    %c-1_i32_72 = arith.constant -1 : i32
    %175 = vector.broadcast %c-1_i32_72 : i32 to vector<8x16xi32>
    %176 = arith.addi %174, %175 : vector<8x16xi32>
    %177 = arith.cmpi eq, %172, %176 : vector<8x16xi32>
    %178 = arith.extui %177 : vector<8x16xi1> to vector<8x16xi32>
    %179 = arith.sitofp %178 : vector<8x16xi32> to vector<8x16xf32>
    %cst_73 = arith.constant dense<0.000000e+00> : vector<8x128xf32>
    %180 = tpu.matmul %179, %169, %cst_73 {dimension_numbers = #tpu.dot_dimension_numbers<[1], [0], [0], [1], [0, 0, 1, 1], [], []>} : vector<8x16xf32>, vector<16x128xf32>, vector<8x128xf32> -> vector<8x128xf32>
    %c0_74 = arith.constant 0 : index
    %c0_75 = arith.constant 0 : index
    %c0_76 = arith.constant 0 : index
    %181 = vector.load %arg6[%c0_74, %c0_75, %c0_76] : memref<3x128x128xf32, #tpu.memory_space<vmem>>, vector<1x128x128xf32>
    %182 = vector.shape_cast %181 : vector<1x128x128xf32> to vector<128x128xf32>
    %cst_77 = arith.constant dense<0.000000e+00> : vector<8x128xf32>
    %183 = tpu.matmul %180, %182, %cst_77 {dimension_numbers = #tpu.dot_dimension_numbers<[1], [0], [0], [1], [0, 0, 1, 1], [], []>} : vector<8x128xf32>, vector<128x128xf32>, vector<8x128xf32> -> vector<8x128xf32>
    %184 = arith.addf %170, %183 : vector<8x128xf32>
    %185 = tpu.iota {dimensions = array<i32: 0>} : vector<8x16xi32>
    %186 = tpu.iota {dimensions = array<i32: 1>} : vector<8x16xi32>
    %c2_i32_78 = arith.constant 2 : i32
    %187 = vector.broadcast %c2_i32_78 : i32 to vector<8x16xi32>
    %188 = arith.muli %187, %185 : vector<8x16xi32>
    %c0_i32_79 = arith.constant 0 : i32
    %189 = vector.broadcast %c0_i32_79 : i32 to vector<8x16xi32>
    %190 = arith.addi %188, %189 : vector<8x16xi32>
    %191 = arith.cmpi eq, %186, %190 : vector<8x16xi32>
    %192 = arith.extui %191 : vector<8x16xi1> to vector<8x16xi32>
    %193 = arith.sitofp %192 : vector<8x16xi32> to vector<8x16xf32>
    %cst_80 = arith.constant dense<0.000000e+00> : vector<8x128xf32>
    %194 = tpu.matmul %193, %169, %cst_80 {dimension_numbers = #tpu.dot_dimension_numbers<[1], [0], [0], [1], [0, 0, 1, 1], [], []>} : vector<8x16xf32>, vector<16x128xf32>, vector<8x128xf32> -> vector<8x128xf32>
    %c1_81 = arith.constant 1 : index
    %c0_82 = arith.constant 0 : index
    %c0_83 = arith.constant 0 : index
    %195 = vector.load %arg6[%c1_81, %c0_82, %c0_83] : memref<3x128x128xf32, #tpu.memory_space<vmem>>, vector<1x128x128xf32>
    %196 = vector.shape_cast %195 : vector<1x128x128xf32> to vector<128x128xf32>
    %cst_84 = arith.constant dense<0.000000e+00> : vector<8x128xf32>
    %197 = tpu.matmul %194, %196, %cst_84 {dimension_numbers = #tpu.dot_dimension_numbers<[1], [0], [0], [1], [0, 0, 1, 1], [], []>} : vector<8x128xf32>, vector<128x128xf32>, vector<8x128xf32> -> vector<8x128xf32>
    %198 = arith.addf %184, %197 : vector<8x128xf32>
    %199 = tpu.iota {dimensions = array<i32: 0>} : vector<8x16xi32>
    %200 = tpu.iota {dimensions = array<i32: 1>} : vector<8x16xi32>
    %c2_i32_85 = arith.constant 2 : i32
    %201 = vector.broadcast %c2_i32_85 : i32 to vector<8x16xi32>
    %202 = arith.muli %201, %199 : vector<8x16xi32>
    %c1_i32_86 = arith.constant 1 : i32
    %203 = vector.broadcast %c1_i32_86 : i32 to vector<8x16xi32>
    %204 = arith.addi %202, %203 : vector<8x16xi32>
    %205 = arith.cmpi eq, %200, %204 : vector<8x16xi32>
    %206 = arith.extui %205 : vector<8x16xi1> to vector<8x16xi32>
    %207 = arith.sitofp %206 : vector<8x16xi32> to vector<8x16xf32>
    %cst_87 = arith.constant dense<0.000000e+00> : vector<8x128xf32>
    %208 = tpu.matmul %207, %169, %cst_87 {dimension_numbers = #tpu.dot_dimension_numbers<[1], [0], [0], [1], [0, 0, 1, 1], [], []>} : vector<8x16xf32>, vector<16x128xf32>, vector<8x128xf32> -> vector<8x128xf32>
    %c2_88 = arith.constant 2 : index
    %c0_89 = arith.constant 0 : index
    %c0_90 = arith.constant 0 : index
    %209 = vector.load %arg6[%c2_88, %c0_89, %c0_90] : memref<3x128x128xf32, #tpu.memory_space<vmem>>, vector<1x128x128xf32>
    %210 = vector.shape_cast %209 : vector<1x128x128xf32> to vector<128x128xf32>
    %cst_91 = arith.constant dense<0.000000e+00> : vector<8x128xf32>
    %211 = tpu.matmul %208, %210, %cst_91 {dimension_numbers = #tpu.dot_dimension_numbers<[1], [0], [0], [1], [0, 0, 1, 1], [], []>} : vector<8x128xf32>, vector<128x128xf32>, vector<8x128xf32> -> vector<8x128xf32>
    %212 = arith.addf %198, %211 : vector<8x128xf32>
    %c0_92 = arith.constant 0 : index
    %c0_93 = arith.constant 0 : index
    %213 = vector.load %arg7[%c0_92, %c0_93] : memref<1x128xf32, #tpu.memory_space<vmem>>, vector<1x128xf32>
    %214 = vector.broadcast %213 : vector<1x128xf32> to vector<8x128xf32>
    %215 = arith.addf %212, %214 : vector<8x128xf32>
    %216 = math.absf %215 : vector<8x128xf32>
    %cst_94 = arith.constant 0.707106769 : f32
    %217 = vector.broadcast %cst_94 : f32 to vector<8x128xf32>
    %218 = arith.mulf %216, %217 : vector<8x128xf32>
    %cst_95 = arith.constant 0.327591091 : f32
    %219 = vector.broadcast %cst_95 : f32 to vector<8x128xf32>
    %220 = arith.mulf %219, %218 : vector<8x128xf32>
    %cst_96 = arith.constant 1.000000e+00 : f32
    %221 = vector.broadcast %cst_96 : f32 to vector<8x128xf32>
    %222 = arith.addf %221, %220 : vector<8x128xf32>
    %223 = tpu.reciprocal %222 {approx = true} : vector<8x128xf32> -> vector<8x128xf32>
    %224 = arith.mulf %222, %223 : vector<8x128xf32>
    %cst_97 = arith.constant 2.000000e+00 : f32
    %225 = vector.broadcast %cst_97 : f32 to vector<8x128xf32>
    %226 = arith.subf %225, %224 : vector<8x128xf32>
    %227 = arith.mulf %223, %226 : vector<8x128xf32>
    %cst_98 = arith.constant 1.06140542 : f32
    %228 = vector.broadcast %cst_98 : f32 to vector<8x128xf32>
    %229 = arith.mulf %228, %227 : vector<8x128xf32>
    %cst_99 = arith.constant 1.45315206 : f32
    %230 = vector.broadcast %cst_99 : f32 to vector<8x128xf32>
    %231 = arith.subf %229, %230 : vector<8x128xf32>
    %232 = arith.mulf %231, %227 : vector<8x128xf32>
    %cst_100 = arith.constant 1.42141378 : f32
    %233 = vector.broadcast %cst_100 : f32 to vector<8x128xf32>
    %234 = arith.addf %232, %233 : vector<8x128xf32>
    %235 = arith.mulf %234, %227 : vector<8x128xf32>
    %cst_101 = arith.constant 0.284496725 : f32
    %236 = vector.broadcast %cst_101 : f32 to vector<8x128xf32>
    %237 = arith.subf %235, %236 : vector<8x128xf32>
    %238 = arith.mulf %237, %227 : vector<8x128xf32>
    %cst_102 = arith.constant 0.254829586 : f32
    %239 = vector.broadcast %cst_102 : f32 to vector<8x128xf32>
    %240 = arith.addf %238, %239 : vector<8x128xf32>
    %241 = arith.mulf %240, %227 : vector<8x128xf32>
    %cst_103 = arith.constant 0.000000e+00 : f32
    %242 = vector.broadcast %cst_103 : f32 to vector<8x128xf32>
    %243 = arith.subf %242, %218 : vector<8x128xf32>
    %244 = arith.mulf %243, %218 : vector<8x128xf32>
    %245 = math.exp %244 : vector<8x128xf32>
    %246 = arith.mulf %241, %245 : vector<8x128xf32>
    %cst_104 = arith.constant 1.000000e+00 : f32
    %247 = vector.broadcast %cst_104 : f32 to vector<8x128xf32>
    %248 = arith.subf %247, %246 : vector<8x128xf32>
    %cst_105 = arith.constant 0.000000e+00 : f32
    %249 = vector.broadcast %cst_105 : f32 to vector<8x128xf32>
    %250 = arith.cmpf olt, %215, %249 : vector<8x128xf32>
    %cst_106 = arith.constant 0.000000e+00 : f32
    %251 = vector.broadcast %cst_106 : f32 to vector<8x128xf32>
    %252 = arith.subf %251, %248 : vector<8x128xf32>
    %253 = arith.select %250, %252, %248 : vector<8x128xi1>, vector<8x128xf32>
    %cst_107 = arith.constant 5.000000e-01 : f32
    %254 = vector.broadcast %cst_107 : f32 to vector<8x128xf32>
    %255 = arith.mulf %254, %215 : vector<8x128xf32>
    %cst_108 = arith.constant 1.000000e+00 : f32
    %256 = vector.broadcast %cst_108 : f32 to vector<8x128xf32>
    %257 = arith.addf %256, %253 : vector<8x128xf32>
    %258 = arith.mulf %255, %257 : vector<8x128xf32>
    %cst_109 = arith.constant 0.000000e+00 : f32
    %259 = vector.broadcast %cst_109 : f32 to vector<8x128xf32>
    %260 = tpu.iota {dimensions = array<i32: 0>} : vector<8x8xi32>
    %261 = tpu.iota {dimensions = array<i32: 1>} : vector<8x8xi32>
    %c1_i32_110 = arith.constant 1 : i32
    %262 = vector.broadcast %c1_i32_110 : i32 to vector<8x8xi32>
    %263 = arith.muli %262, %260 : vector<8x8xi32>
    %c-1_i32_111 = arith.constant -1 : i32
    %264 = vector.broadcast %c-1_i32_111 : i32 to vector<8x8xi32>
    %265 = arith.addi %263, %264 : vector<8x8xi32>
    %266 = arith.cmpi eq, %261, %265 : vector<8x8xi32>
    %267 = arith.extui %266 : vector<8x8xi1> to vector<8x8xi32>
    %268 = arith.sitofp %267 : vector<8x8xi32> to vector<8x8xf32>
    %cst_112 = arith.constant dense<0.000000e+00> : vector<8x128xf32>
    %269 = tpu.matmul %268, %258, %cst_112 {dimension_numbers = #tpu.dot_dimension_numbers<[1], [0], [0], [1], [0, 0, 1, 1], [], []>} : vector<8x8xf32>, vector<8x128xf32>, vector<8x128xf32> -> vector<8x128xf32>
    %c0_113 = arith.constant 0 : index
    %c0_114 = arith.constant 0 : index
    %c0_115 = arith.constant 0 : index
    %270 = vector.load %arg8[%c0_113, %c0_114, %c0_115] : memref<3x128x128xf32, #tpu.memory_space<vmem>>, vector<1x128x128xf32>
    %271 = vector.shape_cast %270 : vector<1x128x128xf32> to vector<128x128xf32>
    %cst_116 = arith.constant dense<0.000000e+00> : vector<8x128xf32>
    %272 = tpu.matmul %269, %271, %cst_116 {dimension_numbers = #tpu.dot_dimension_numbers<[1], [0], [0], [1], [0, 0, 1, 1], [], []>} : vector<8x128xf32>, vector<128x128xf32>, vector<8x128xf32> -> vector<8x128xf32>
    %273 = arith.addf %259, %272 : vector<8x128xf32>
    %c1_117 = arith.constant 1 : index
    %c0_118 = arith.constant 0 : index
    %c0_119 = arith.constant 0 : index
    %274 = vector.load %arg8[%c1_117, %c0_118, %c0_119] : memref<3x128x128xf32, #tpu.memory_space<vmem>>, vector<1x128x128xf32>
    %275 = vector.shape_cast %274 : vector<1x128x128xf32> to vector<128x128xf32>
    %cst_120 = arith.constant dense<0.000000e+00> : vector<8x128xf32>
    %276 = tpu.matmul %258, %275, %cst_120 {dimension_numbers = #tpu.dot_dimension_numbers<[1], [0], [0], [1], [0, 0, 1, 1], [], []>} : vector<8x128xf32>, vector<128x128xf32>, vector<8x128xf32> -> vector<8x128xf32>
    %277 = arith.addf %273, %276 : vector<8x128xf32>
    %278 = tpu.iota {dimensions = array<i32: 0>} : vector<8x8xi32>
    %279 = tpu.iota {dimensions = array<i32: 1>} : vector<8x8xi32>
    %c1_i32_121 = arith.constant 1 : i32
    %280 = vector.broadcast %c1_i32_121 : i32 to vector<8x8xi32>
    %281 = arith.muli %280, %278 : vector<8x8xi32>
    %c1_i32_122 = arith.constant 1 : i32
    %282 = vector.broadcast %c1_i32_122 : i32 to vector<8x8xi32>
    %283 = arith.addi %281, %282 : vector<8x8xi32>
    %284 = arith.cmpi eq, %279, %283 : vector<8x8xi32>
    %285 = arith.extui %284 : vector<8x8xi1> to vector<8x8xi32>
    %286 = arith.sitofp %285 : vector<8x8xi32> to vector<8x8xf32>
    %cst_123 = arith.constant dense<0.000000e+00> : vector<8x128xf32>
    %287 = tpu.matmul %286, %258, %cst_123 {dimension_numbers = #tpu.dot_dimension_numbers<[1], [0], [0], [1], [0, 0, 1, 1], [], []>} : vector<8x8xf32>, vector<8x128xf32>, vector<8x128xf32> -> vector<8x128xf32>
    %c2_124 = arith.constant 2 : index
    %c0_125 = arith.constant 0 : index
    %c0_126 = arith.constant 0 : index
    %288 = vector.load %arg8[%c2_124, %c0_125, %c0_126] : memref<3x128x128xf32, #tpu.memory_space<vmem>>, vector<1x128x128xf32>
    %289 = vector.shape_cast %288 : vector<1x128x128xf32> to vector<128x128xf32>
    %cst_127 = arith.constant dense<0.000000e+00> : vector<8x128xf32>
    %290 = tpu.matmul %287, %289, %cst_127 {dimension_numbers = #tpu.dot_dimension_numbers<[1], [0], [0], [1], [0, 0, 1, 1], [], []>} : vector<8x128xf32>, vector<128x128xf32>, vector<8x128xf32> -> vector<8x128xf32>
    %291 = arith.addf %277, %290 : vector<8x128xf32>
    %c0_128 = arith.constant 0 : index
    %c0_129 = arith.constant 0 : index
    %292 = vector.load %arg9[%c0_128, %c0_129] : memref<1x128xf32, #tpu.memory_space<vmem>>, vector<1x128xf32>
    %293 = vector.broadcast %292 : vector<1x128xf32> to vector<8x128xf32>
    %294 = arith.addf %291, %293 : vector<8x128xf32>
    %295 = math.absf %294 : vector<8x128xf32>
    %cst_130 = arith.constant 0.707106769 : f32
    %296 = vector.broadcast %cst_130 : f32 to vector<8x128xf32>
    %297 = arith.mulf %295, %296 : vector<8x128xf32>
    %cst_131 = arith.constant 0.327591091 : f32
    %298 = vector.broadcast %cst_131 : f32 to vector<8x128xf32>
    %299 = arith.mulf %298, %297 : vector<8x128xf32>
    %cst_132 = arith.constant 1.000000e+00 : f32
    %300 = vector.broadcast %cst_132 : f32 to vector<8x128xf32>
    %301 = arith.addf %300, %299 : vector<8x128xf32>
    %302 = tpu.reciprocal %301 {approx = true} : vector<8x128xf32> -> vector<8x128xf32>
    %303 = arith.mulf %301, %302 : vector<8x128xf32>
    %cst_133 = arith.constant 2.000000e+00 : f32
    %304 = vector.broadcast %cst_133 : f32 to vector<8x128xf32>
    %305 = arith.subf %304, %303 : vector<8x128xf32>
    %306 = arith.mulf %302, %305 : vector<8x128xf32>
    %cst_134 = arith.constant 1.06140542 : f32
    %307 = vector.broadcast %cst_134 : f32 to vector<8x128xf32>
    %308 = arith.mulf %307, %306 : vector<8x128xf32>
    %cst_135 = arith.constant 1.45315206 : f32
    %309 = vector.broadcast %cst_135 : f32 to vector<8x128xf32>
    %310 = arith.subf %308, %309 : vector<8x128xf32>
    %311 = arith.mulf %310, %306 : vector<8x128xf32>
    %cst_136 = arith.constant 1.42141378 : f32
    %312 = vector.broadcast %cst_136 : f32 to vector<8x128xf32>
    %313 = arith.addf %311, %312 : vector<8x128xf32>
    %314 = arith.mulf %313, %306 : vector<8x128xf32>
    %cst_137 = arith.constant 0.284496725 : f32
    %315 = vector.broadcast %cst_137 : f32 to vector<8x128xf32>
    %316 = arith.subf %314, %315 : vector<8x128xf32>
    %317 = arith.mulf %316, %306 : vector<8x128xf32>
    %cst_138 = arith.constant 0.254829586 : f32
    %318 = vector.broadcast %cst_138 : f32 to vector<8x128xf32>
    %319 = arith.addf %317, %318 : vector<8x128xf32>
    %320 = arith.mulf %319, %306 : vector<8x128xf32>
    %cst_139 = arith.constant 0.000000e+00 : f32
    %321 = vector.broadcast %cst_139 : f32 to vector<8x128xf32>
    %322 = arith.subf %321, %297 : vector<8x128xf32>
    %323 = arith.mulf %322, %297 : vector<8x128xf32>
    %324 = math.exp %323 : vector<8x128xf32>
    %325 = arith.mulf %320, %324 : vector<8x128xf32>
    %cst_140 = arith.constant 1.000000e+00 : f32
    %326 = vector.broadcast %cst_140 : f32 to vector<8x128xf32>
    %327 = arith.subf %326, %325 : vector<8x128xf32>
    %cst_141 = arith.constant 0.000000e+00 : f32
    %328 = vector.broadcast %cst_141 : f32 to vector<8x128xf32>
    %329 = arith.cmpf olt, %294, %328 : vector<8x128xf32>
    %cst_142 = arith.constant 0.000000e+00 : f32
    %330 = vector.broadcast %cst_142 : f32 to vector<8x128xf32>
    %331 = arith.subf %330, %327 : vector<8x128xf32>
    %332 = arith.select %329, %331, %327 : vector<8x128xi1>, vector<8x128xf32>
    %cst_143 = arith.constant 5.000000e-01 : f32
    %333 = vector.broadcast %cst_143 : f32 to vector<8x128xf32>
    %334 = arith.mulf %333, %294 : vector<8x128xf32>
    %cst_144 = arith.constant 1.000000e+00 : f32
    %335 = vector.broadcast %cst_144 : f32 to vector<8x128xf32>
    %336 = arith.addf %335, %332 : vector<8x128xf32>
    %337 = arith.mulf %334, %336 : vector<8x128xf32>
    %cst_145 = arith.constant 0.000000e+00 : f32
    %338 = vector.broadcast %cst_145 : f32 to vector<4x64xf32>
    %339 = tpu.iota {dimensions = array<i32: 0>} : vector<4x8xi32>
    %340 = tpu.iota {dimensions = array<i32: 1>} : vector<4x8xi32>
    %c2_i32_146 = arith.constant 2 : i32
    %341 = vector.broadcast %c2_i32_146 : i32 to vector<4x8xi32>
    %342 = arith.muli %341, %339 : vector<4x8xi32>
    %c-1_i32_147 = arith.constant -1 : i32
    %343 = vector.broadcast %c-1_i32_147 : i32 to vector<4x8xi32>
    %344 = arith.addi %342, %343 : vector<4x8xi32>
    %345 = arith.cmpi eq, %340, %344 : vector<4x8xi32>
    %346 = arith.extui %345 : vector<4x8xi1> to vector<4x8xi32>
    %347 = arith.sitofp %346 : vector<4x8xi32> to vector<4x8xf32>
    %cst_148 = arith.constant dense<0.000000e+00> : vector<4x128xf32>
    %348 = tpu.matmul %347, %337, %cst_148 {dimension_numbers = #tpu.dot_dimension_numbers<[1], [0], [0], [1], [0, 0, 1, 1], [], []>} : vector<4x8xf32>, vector<8x128xf32>, vector<4x128xf32> -> vector<4x128xf32>
    %c0_149 = arith.constant 0 : index
    %c0_150 = arith.constant 0 : index
    %c0_151 = arith.constant 0 : index
    %349 = vector.load %arg10[%c0_149, %c0_150, %c0_151] : memref<3x128x64xf32, #tpu.memory_space<vmem>>, vector<1x128x64xf32>
    %350 = vector.shape_cast %349 : vector<1x128x64xf32> to vector<128x64xf32>
    %cst_152 = arith.constant dense<0.000000e+00> : vector<4x64xf32>
    %351 = tpu.matmul %348, %350, %cst_152 {dimension_numbers = #tpu.dot_dimension_numbers<[1], [0], [0], [1], [0, 0, 1, 1], [], []>} : vector<4x128xf32>, vector<128x64xf32>, vector<4x64xf32> -> vector<4x64xf32>
    %352 = arith.addf %338, %351 : vector<4x64xf32>
    %353 = tpu.iota {dimensions = array<i32: 0>} : vector<4x8xi32>
    %354 = tpu.iota {dimensions = array<i32: 1>} : vector<4x8xi32>
    %c2_i32_153 = arith.constant 2 : i32
    %355 = vector.broadcast %c2_i32_153 : i32 to vector<4x8xi32>
    %356 = arith.muli %355, %353 : vector<4x8xi32>
    %c0_i32_154 = arith.constant 0 : i32
    %357 = vector.broadcast %c0_i32_154 : i32 to vector<4x8xi32>
    %358 = arith.addi %356, %357 : vector<4x8xi32>
    %359 = arith.cmpi eq, %354, %358 : vector<4x8xi32>
    %360 = arith.extui %359 : vector<4x8xi1> to vector<4x8xi32>
    %361 = arith.sitofp %360 : vector<4x8xi32> to vector<4x8xf32>
    %cst_155 = arith.constant dense<0.000000e+00> : vector<4x128xf32>
    %362 = tpu.matmul %361, %337, %cst_155 {dimension_numbers = #tpu.dot_dimension_numbers<[1], [0], [0], [1], [0, 0, 1, 1], [], []>} : vector<4x8xf32>, vector<8x128xf32>, vector<4x128xf32> -> vector<4x128xf32>
    %c1_156 = arith.constant 1 : index
    %c0_157 = arith.constant 0 : index
    %c0_158 = arith.constant 0 : index
    %363 = vector.load %arg10[%c1_156, %c0_157, %c0_158] : memref<3x128x64xf32, #tpu.memory_space<vmem>>, vector<1x128x64xf32>
    %364 = vector.shape_cast %363 : vector<1x128x64xf32> to vector<128x64xf32>
    %cst_159 = arith.constant dense<0.000000e+00> : vector<4x64xf32>
    %365 = tpu.matmul %362, %364, %cst_159 {dimension_numbers = #tpu.dot_dimension_numbers<[1], [0], [0], [1], [0, 0, 1, 1], [], []>} : vector<4x128xf32>, vector<128x64xf32>, vector<4x64xf32> -> vector<4x64xf32>
    %366 = arith.addf %352, %365 : vector<4x64xf32>
    %367 = tpu.iota {dimensions = array<i32: 0>} : vector<4x8xi32>
    %368 = tpu.iota {dimensions = array<i32: 1>} : vector<4x8xi32>
    %c2_i32_160 = arith.constant 2 : i32
    %369 = vector.broadcast %c2_i32_160 : i32 to vector<4x8xi32>
    %370 = arith.muli %369, %367 : vector<4x8xi32>
    %c1_i32_161 = arith.constant 1 : i32
    %371 = vector.broadcast %c1_i32_161 : i32 to vector<4x8xi32>
    %372 = arith.addi %370, %371 : vector<4x8xi32>
    %373 = arith.cmpi eq, %368, %372 : vector<4x8xi32>
    %374 = arith.extui %373 : vector<4x8xi1> to vector<4x8xi32>
    %375 = arith.sitofp %374 : vector<4x8xi32> to vector<4x8xf32>
    %cst_162 = arith.constant dense<0.000000e+00> : vector<4x128xf32>
    %376 = tpu.matmul %375, %337, %cst_162 {dimension_numbers = #tpu.dot_dimension_numbers<[1], [0], [0], [1], [0, 0, 1, 1], [], []>} : vector<4x8xf32>, vector<8x128xf32>, vector<4x128xf32> -> vector<4x128xf32>
    %c2_163 = arith.constant 2 : index
    %c0_164 = arith.constant 0 : index
    %c0_165 = arith.constant 0 : index
    %377 = vector.load %arg10[%c2_163, %c0_164, %c0_165] : memref<3x128x64xf32, #tpu.memory_space<vmem>>, vector<1x128x64xf32>
    %378 = vector.shape_cast %377 : vector<1x128x64xf32> to vector<128x64xf32>
    %cst_166 = arith.constant dense<0.000000e+00> : vector<4x64xf32>
    %379 = tpu.matmul %376, %378, %cst_166 {dimension_numbers = #tpu.dot_dimension_numbers<[1], [0], [0], [1], [0, 0, 1, 1], [], []>} : vector<4x128xf32>, vector<128x64xf32>, vector<4x64xf32> -> vector<4x64xf32>
    %380 = arith.addf %366, %379 : vector<4x64xf32>
    %c0_167 = arith.constant 0 : index
    %c0_168 = arith.constant 0 : index
    %381 = vector.load %arg11[%c0_167, %c0_168] : memref<1x64xf32, #tpu.memory_space<vmem>>, vector<1x64xf32>
    %382 = vector.broadcast %381 : vector<1x64xf32> to vector<4x64xf32>
    %383 = arith.addf %380, %382 : vector<4x64xf32>
    %384 = math.absf %383 : vector<4x64xf32>
    %cst_169 = arith.constant 0.707106769 : f32
    %385 = vector.broadcast %cst_169 : f32 to vector<4x64xf32>
    %386 = arith.mulf %384, %385 : vector<4x64xf32>
    %cst_170 = arith.constant 0.327591091 : f32
    %387 = vector.broadcast %cst_170 : f32 to vector<4x64xf32>
    %388 = arith.mulf %387, %386 : vector<4x64xf32>
    %cst_171 = arith.constant 1.000000e+00 : f32
    %389 = vector.broadcast %cst_171 : f32 to vector<4x64xf32>
    %390 = arith.addf %389, %388 : vector<4x64xf32>
    %391 = tpu.reciprocal %390 {approx = true} : vector<4x64xf32> -> vector<4x64xf32>
    %392 = arith.mulf %390, %391 : vector<4x64xf32>
    %cst_172 = arith.constant 2.000000e+00 : f32
    %393 = vector.broadcast %cst_172 : f32 to vector<4x64xf32>
    %394 = arith.subf %393, %392 : vector<4x64xf32>
    %395 = arith.mulf %391, %394 : vector<4x64xf32>
    %cst_173 = arith.constant 1.06140542 : f32
    %396 = vector.broadcast %cst_173 : f32 to vector<4x64xf32>
    %397 = arith.mulf %396, %395 : vector<4x64xf32>
    %cst_174 = arith.constant 1.45315206 : f32
    %398 = vector.broadcast %cst_174 : f32 to vector<4x64xf32>
    %399 = arith.subf %397, %398 : vector<4x64xf32>
    %400 = arith.mulf %399, %395 : vector<4x64xf32>
    %cst_175 = arith.constant 1.42141378 : f32
    %401 = vector.broadcast %cst_175 : f32 to vector<4x64xf32>
    %402 = arith.addf %400, %401 : vector<4x64xf32>
    %403 = arith.mulf %402, %395 : vector<4x64xf32>
    %cst_176 = arith.constant 0.284496725 : f32
    %404 = vector.broadcast %cst_176 : f32 to vector<4x64xf32>
    %405 = arith.subf %403, %404 : vector<4x64xf32>
    %406 = arith.mulf %405, %395 : vector<4x64xf32>
    %cst_177 = arith.constant 0.254829586 : f32
    %407 = vector.broadcast %cst_177 : f32 to vector<4x64xf32>
    %408 = arith.addf %406, %407 : vector<4x64xf32>
    %409 = arith.mulf %408, %395 : vector<4x64xf32>
    %cst_178 = arith.constant 0.000000e+00 : f32
    %410 = vector.broadcast %cst_178 : f32 to vector<4x64xf32>
    %411 = arith.subf %410, %386 : vector<4x64xf32>
    %412 = arith.mulf %411, %386 : vector<4x64xf32>
    %413 = math.exp %412 : vector<4x64xf32>
    %414 = arith.mulf %409, %413 : vector<4x64xf32>
    %cst_179 = arith.constant 1.000000e+00 : f32
    %415 = vector.broadcast %cst_179 : f32 to vector<4x64xf32>
    %416 = arith.subf %415, %414 : vector<4x64xf32>
    %cst_180 = arith.constant 0.000000e+00 : f32
    %417 = vector.broadcast %cst_180 : f32 to vector<4x64xf32>
    %418 = arith.cmpf olt, %383, %417 : vector<4x64xf32>
    %cst_181 = arith.constant 0.000000e+00 : f32
    %419 = vector.broadcast %cst_181 : f32 to vector<4x64xf32>
    %420 = arith.subf %419, %416 : vector<4x64xf32>
    %421 = arith.select %418, %420, %416 : vector<4x64xi1>, vector<4x64xf32>
    %cst_182 = arith.constant 5.000000e-01 : f32
    %422 = vector.broadcast %cst_182 : f32 to vector<4x64xf32>
    %423 = arith.mulf %422, %383 : vector<4x64xf32>
    %cst_183 = arith.constant 1.000000e+00 : f32
    %424 = vector.broadcast %cst_183 : f32 to vector<4x64xf32>
    %425 = arith.addf %424, %421 : vector<4x64xf32>
    %426 = arith.mulf %423, %425 : vector<4x64xf32>
    %c0_184 = arith.constant 0 : index
    %c0_185 = arith.constant 0 : index
    %427 = vector.load %arg13[%c0_184, %c0_185] : memref<1x16xf32, #tpu.memory_space<vmem>>, vector<1x16xf32>
    %428 = vector.extract_strided_slice %426 {offsets = [0, 0], sizes = [1, 64], strides = [1, 1]} : vector<4x64xf32> to vector<1x64xf32>
    %c0_186 = arith.constant 0 : index
    %c0_187 = arith.constant 0 : index
    %c0_188 = arith.constant 0 : index
    %429 = vector.load %arg12[%c0_186, %c0_187, %c0_188] : memref<4x64x16xf32, #tpu.memory_space<vmem>>, vector<1x64x16xf32>
    %430 = vector.shape_cast %429 : vector<1x64x16xf32> to vector<64x16xf32>
    %cst_189 = arith.constant dense<0.000000e+00> : vector<1x16xf32>
    %431 = tpu.matmul %428, %430, %cst_189 {dimension_numbers = #tpu.dot_dimension_numbers<[1], [0], [0], [1], [0, 0, 1, 1], [], []>} : vector<1x64xf32>, vector<64x16xf32>, vector<1x16xf32> -> vector<1x16xf32>
    %432 = arith.addf %427, %431 : vector<1x16xf32>
    %433 = vector.extract_strided_slice %426 {offsets = [1, 0], sizes = [1, 64], strides = [1, 1]} : vector<4x64xf32> to vector<1x64xf32>
    %c1_190 = arith.constant 1 : index
    %c0_191 = arith.constant 0 : index
    %c0_192 = arith.constant 0 : index
    %434 = vector.load %arg12[%c1_190, %c0_191, %c0_192] : memref<4x64x16xf32, #tpu.memory_space<vmem>>, vector<1x64x16xf32>
    %435 = vector.shape_cast %434 : vector<1x64x16xf32> to vector<64x16xf32>
    %cst_193 = arith.constant dense<0.000000e+00> : vector<1x16xf32>
    %436 = tpu.matmul %433, %435, %cst_193 {dimension_numbers = #tpu.dot_dimension_numbers<[1], [0], [0], [1], [0, 0, 1, 1], [], []>} : vector<1x64xf32>, vector<64x16xf32>, vector<1x16xf32> -> vector<1x16xf32>
    %437 = arith.addf %432, %436 : vector<1x16xf32>
    %438 = vector.extract_strided_slice %426 {offsets = [2, 0], sizes = [1, 64], strides = [1, 1]} : vector<4x64xf32> to vector<1x64xf32>
    %c2_194 = arith.constant 2 : index
    %c0_195 = arith.constant 0 : index
    %c0_196 = arith.constant 0 : index
    %439 = vector.load %arg12[%c2_194, %c0_195, %c0_196] : memref<4x64x16xf32, #tpu.memory_space<vmem>>, vector<1x64x16xf32>
    %440 = vector.shape_cast %439 : vector<1x64x16xf32> to vector<64x16xf32>
    %cst_197 = arith.constant dense<0.000000e+00> : vector<1x16xf32>
    %441 = tpu.matmul %438, %440, %cst_197 {dimension_numbers = #tpu.dot_dimension_numbers<[1], [0], [0], [1], [0, 0, 1, 1], [], []>} : vector<1x64xf32>, vector<64x16xf32>, vector<1x16xf32> -> vector<1x16xf32>
    %442 = arith.addf %437, %441 : vector<1x16xf32>
    %443 = vector.extract_strided_slice %426 {offsets = [3, 0], sizes = [1, 64], strides = [1, 1]} : vector<4x64xf32> to vector<1x64xf32>
    %c3 = arith.constant 3 : index
    %c0_198 = arith.constant 0 : index
    %c0_199 = arith.constant 0 : index
    %444 = vector.load %arg12[%c3, %c0_198, %c0_199] : memref<4x64x16xf32, #tpu.memory_space<vmem>>, vector<1x64x16xf32>
    %445 = vector.shape_cast %444 : vector<1x64x16xf32> to vector<64x16xf32>
    %cst_200 = arith.constant dense<0.000000e+00> : vector<1x16xf32>
    %446 = tpu.matmul %443, %445, %cst_200 {dimension_numbers = #tpu.dot_dimension_numbers<[1], [0], [0], [1], [0, 0, 1, 1], [], []>} : vector<1x64xf32>, vector<64x16xf32>, vector<1x16xf32> -> vector<1x16xf32>
    %447 = arith.addf %442, %446 : vector<1x16xf32>
    %c0_201 = arith.constant 0 : index
    %c0_202 = arith.constant 0 : index
    %c0_203 = arith.constant 0 : index
    %448 = vector.load %arg14[%c0_201, %c0_202, %c0_203] : memref<1x1x16xf32, #tpu.memory_space<vmem>>, vector<1x1x16xf32>
    %449 = vector.shape_cast %448 : vector<1x1x16xf32> to vector<1x16xf32>
    %450 = vector.shape_cast %447 : vector<1x16xf32> to vector<1x1x16xf32>
    tpu.vector_store %arg14[%c0_201, %c0_202, %c0_203], %450 {strides = array<i32>} : memref<1x1x16xf32, #tpu.memory_space<vmem>>, vector<1x1x16xf32>,
    return
  }
  func.func @transform_0(%arg0: i32) -> (i32, i32, i32) {
    %c0_i32 = arith.constant 0 : i32
    %c0_i32_0 = arith.constant 0 : i32
    %c0_i32_1 = arith.constant 0 : i32
    return %arg0, %c0_i32, %c0_i32_0 : i32, i32, i32
  }
  func.func @transform_1(%arg0: i32) -> (i32, i32, i32) {
    %c0_i32 = arith.constant 0 : i32
    %c0_i32_0 = arith.constant 0 : i32
    %c0_i32_1 = arith.constant 0 : i32
    %c0_i32_2 = arith.constant 0 : i32
    return %c0_i32, %c0_i32_0, %c0_i32_1 : i32, i32, i32
  }
  func.func @transform_2(%arg0: i32) -> (i32, i32) {
    %c0_i32 = arith.constant 0 : i32
    %c0_i32_0 = arith.constant 0 : i32
    %c0_i32_1 = arith.constant 0 : i32
    return %c0_i32, %c0_i32_0 : i32, i32
  }
  func.func @transform_3(%arg0: i32) -> (i32, i32, i32) {
    %c0_i32 = arith.constant 0 : i32
    %c0_i32_0 = arith.constant 0 : i32
    %c0_i32_1 = arith.constant 0 : i32
    %c0_i32_2 = arith.constant 0 : i32
    return %c0_i32, %c0_i32_0, %c0_i32_1 : i32, i32, i32
  }
  func.func @transform_4(%arg0: i32) -> (i32, i32) {
    %c0_i32 = arith.constant 0 : i32
    %c0_i32_0 = arith.constant 0 : i32
    %c0_i32_1 = arith.constant 0 : i32
    return %c0_i32, %c0_i32_0 : i32, i32
  }
  func.func @transform_5(%arg0: i32) -> (i32, i32, i32) {
    %c0_i32 = arith.constant 0 : i32
    %c0_i32_0 = arith.constant 0 : i32
    %c0_i32_1 = arith.constant 0 : i32
    %c0_i32_2 = arith.constant 0 : i32
    return %c0_i32, %c0_i32_0, %c0_i32_1 : i32, i32, i32
  }
  func.func @transform_6(%arg0: i32) -> (i32, i32) {
    %c0_i32 = arith.constant 0 : i32
    %c0_i32_0 = arith.constant 0 : i32
    %c0_i32_1 = arith.constant 0 : i32
    return %c0_i32, %c0_i32_0 : i32, i32
  }
  func.func @transform_7(%arg0: i32) -> (i32, i32, i32) {
    %c0_i32 = arith.constant 0 : i32
    %c0_i32_0 = arith.constant 0 : i32
    %c0_i32_1 = arith.constant 0 : i32
    %c0_i32_2 = arith.constant 0 : i32
    return %c0_i32, %c0_i32_0, %c0_i32_1 : i32, i32, i32
  }
  func.func @transform_8(%arg0: i32) -> (i32, i32) {
    %c0_i32 = arith.constant 0 : i32
    %c0_i32_0 = arith.constant 0 : i32
    %c0_i32_1 = arith.constant 0 : i32
    return %c0_i32, %c0_i32_0 : i32, i32
  }
  func.func @transform_9(%arg0: i32) -> (i32, i32, i32) {
    %c0_i32 = arith.constant 0 : i32
    %c0_i32_0 = arith.constant 0 : i32
    %c0_i32_1 = arith.constant 0 : i32
    %c0_i32_2 = arith.constant 0 : i32
    return %c0_i32, %c0_i32_0, %c0_i32_1 : i32, i32, i32
  }
  func.func @transform_10(%arg0: i32) -> (i32, i32) {
    %c0_i32 = arith.constant 0 : i32
    %c0_i32_0 = arith.constant 0 : i32
    %c0_i32_1 = arith.constant 0 : i32
    return %c0_i32, %c0_i32_0 : i32, i32
  }
  func.func @transform_11(%arg0: i32) -> (i32, i32, i32) {
    %c0_i32 = arith.constant 0 : i32
    %c0_i32_0 = arith.constant 0 : i32
    %c0_i32_1 = arith.constant 0 : i32
    %c0_i32_2 = arith.constant 0 : i32
    return %c0_i32, %c0_i32_0, %c0_i32_1 : i32, i32, i32
  }
  func.func @transform_12(%arg0: i32) -> (i32, i32) {
    %c0_i32 = arith.constant 0 : i32
    %c0_i32_0 = arith.constant 0 : i32
    %c0_i32_1 = arith.constant 0 : i32
    return %c0_i32, %c0_i32_0 : i32, i32
  }
  func.func @transform_13(%arg0: i32) -> (i32, i32, i32) {
    %c0_i32 = arith.constant 0 : i32
    %c0_i32_0 = arith.constant 0 : i32
    %c0_i32_1 = arith.constant 0 : i32
    return %arg0, %c0_i32, %c0_i32_0 : i32, i32, i32
  }
}

</mosaic_0001>

<bundles_post_ra>
// kernel: encoder_forward.1
= control target key start
LH: loop header
LB: loop body
LE: loop exit
PB: predicated region body
PF: predicated region fallthrough
CT: control target
= control target key end

     0   :  { %s6174_s0 = inlined_call_operand.vmem [shape: f32[2,32,96], index: 0, kind: input, shape index: {}]   ;;  %s6175_s1 = inlined_call_operand.vmem [shape: f32[3,96,128], index: 1, kind: input, shape index: {}]   ;;  %s6176_s2 = inlined_call_operand.vmem [shape: f32[1,128], index: 2, kind: input, shape index: {}]   ;;  %s6177_s3 = inlined_call_operand.vmem [shape: f32[3,128,128], index: 3, kind: input, shape index: {}]   ;;  %s6178_s4 = inlined_call_operand.vmem [shape: f32[1,128], index: 4, kind: input, shape index: {}]   ;;  %s6179_s5 = inlined_call_operand.vmem [shape: f32[3,128,128], index: 5, kind: input, shape index: {}]   ;;  %s6180_s6 = inlined_call_operand.vmem [shape: f32[1,128], index: 6, kind: input, shape index: {}]   ;;  %s6181_s7 = inlined_call_operand.vmem [shape: f32[3,128,128], index: 7, kind: input, shape index: {}]   ;;  %s6182_s8 = inlined_call_operand.vmem [shape: f32[1,128], index: 8, kind: input, shape index: {}]   ;;  %s6183_s9 = inlined_call_operand.vmem [shape: f32[3,128,64], index: 9, kind: input, shape index: {}]   ;;  %s6184_s10 = inlined_call_operand.vmem [shape: f32[1,64], index: 10, kind: input, shape index: {}]   ;;  %s6185_s11 = inlined_call_operand.vmem [shape: f32[4,64,16], index: 11, kind: input, shape index: {}]   ;;  %s6186_s12 = inlined_call_operand.vmem [shape: f32[1,16], index: 12, kind: input, shape index: {}]   ;;  %s6187_s13 = inlined_call_operand.hbm [shape: f32[2,1,16], index: 13, kind: output, shape index: {}]  }
   0x1   :  { %6188 = sst [smem:[#allocation5_spill]] %s6174_s0 }
   0x2   :  { %6189 = sst [smem:[#allocation6_spill]] %s6175_s1 }
   0x3   :  { %6190 = sst [smem:[#allocation7_spill]] %s6176_s2 }
   0x4   :  { %18 = vsyncpa [#allocation3], 0 }
   0x5   :  { %20 = vsyncpa [#allocation3 + $0x1], 0  ;;  %s4910_s25 = smov 0   ;;  %s4912_s26 = smov 0  }
   0x6   :  { %s4914_s27 = smov 0   ;;  %s4916_s28 = smov 0  }
   0x7 LB: > { %s4931_s29 = sadd.s32 4294967295, %s4835_s28   ;;  %s3463_s30 = sadd.s32 4294967294, %s4835_s28   ;;  %s4835_s28 = sphi %s4916_s28, %s6199_s28   ;;  %s4831_s27 = sphi %s4914_s27, %s6198_s27   ;;  %s4827_s26 = sphi %s4912_s26, %s6197_s26   ;;  %s4823_s25 = sphi %s4910_s25, %s6196_s25  }
   0x8   : > { %s4935_s14 = sadd.s32 1, %s4835_s28   ;;  %s311_s15 = sadd.s32 1, %s4831_s27 }
   0x9   : > { %s308_s16 = ssub.s32 %s4835_s28, %s4935_s14  ;;  %p321_p0 = scmp.ne.s32.totalorder %s4831_s27, %s4827_s26 }
   0xa   : > { %p309_p1 = scmp.eq.s32.totalorder %s308_s16, 0  ;;  %p322_p2 = scmp.eq.s32.totalorder %s4931_s29, 1 }
   0xb   : > { %p327_p3 = scmp.ne.s32.totalorder %s4827_s26, %s4823_s25  ;;  %p328_p4 = scmp.eq.s32.totalorder %s3463_s30, 1 }
   0xc   : > { %s4946_s17 = scalar_select %p309_p1, %s4831_s27, %s311_s15  }
   0xd   : > { %p4948_p5 = por %p322_p2, %p321_p0  ;;  %p4952_p6 = por %p328_p4, %p327_p3 }
   0xe   : > { %p3466_p7 = scmp.ge.s32.totalorder %s4835_s28, 1  ;;  %p390_p8 = scmp.lt.s32.totalorder %s4835_s28, 3 }
  0x10   : > { %p391_p9 = pnand %p3466_p7, %p390_p8 }
  0x11   : > { %p433_p10 = scmp.lt.s32.totalorder (!%p391_p9), %s4931_s29, 1  ;;  %s6193_s0 = sld [smem:[#allocation5_spill]] (!%p391_p9) }
  0x12   : > { %394 = sbr.rel (%p391_p9) target bundleno = 3172 (0xc64), region = 72  ;;  %s6194_s1 = sld [smem:[#allocation6_spill]] (!%p391_p9) }
  0x13   : > { %s6195_s2 = sld [smem:[#allocation7_spill]] (!%p391_p9)  ;;  %s3702_s22 = sshll.u32 (!%p391_p9), %s4931_s29, 4 }
  0x17   : > { %v442_v0 = vlaneseq  ;;  %s434_s20 = scalar_select %p433_p10, %s4931_s29, 1  ;;  %v4837_v12 = vmov 0.0   ;;  %vm457_vm4 = vcmask 261120   ;;  %vm651_vm6 = vcmask 785408  }
  0x18   : > { %v3488_v17 = vld [vmem:[%s6194_s1 + $0xb8] sm:$0xff]  ;;  %v3487_v19 = vld [vmem:[%s6194_s1 + $0xb0] sm:$0xff]  ;;  %v3486_v21 = vld [vmem:[%s6194_s1 + $0xa8] sm:$0xff]  ;;  %vm1074_vm9 = vcmask 130048   ;;  %vm4838_vm15 = vmmov 0   ;;  %s4839_s29 = smov [#allocation2]  }
  0x19   : > { %v4960_v1 = vshrl.u32 %v442_v0, 7  ;;  %s3705_s21 = sshll.u32 %s434_s20, 5  ;;  %v4962_v2 = vand.u32 127, %v442_v0  ;;  %v550_v18 = vld [vmem:[%s6194_s1 + $0x58] sm:$0xff]  ;;  %v549_v20 = vld [vmem:[%s6194_s1 + $0x50] sm:$0xff]  ;;  %v548_v22 = vld [vmem:[%s6194_s1 + $0x48] sm:$0xff] }
  0x1a   : > { %s437_s24 = scalar_lea.vmem %s6193_s0, %s3705_s21  ;;  %v3485_v23 = vld [vmem:[%s6194_s1 + $0xa0] sm:$0xff]  ;;  %v3484_v25 = vld [vmem:[%s6194_s1 + $0x98] sm:$0xff]  ;;  %v3483_v27 = vld [vmem:[%s6194_s1 + $0x90] sm:$0xff]  ;;  %s431_s21 = sand.u32 1, %s4827_s26  }
  0x1b   : > { %v4965_v3 = vmul.u32 2, %v4960_v1  ;;  %v4968_v4 = vadd.s32 8, %v4960_v1  ;;  %v4973_v5 = vld [vmem:[%s437_s24 + $0x18] sm:$0xff]  ;;  %v4975_v6 = vld [vmem:[%s437_s24 + $0x10] sm:$0xff]  ;;  %v4985_v9 = vld [vmem:[%s437_s24 + $0x8] sm:$0xff]  ;;  %s432_s23 = scalar_lea.vmem [#allocation2], %s431_s21  ;;  %s6139_s0 = scalar_lea.hbm %s6187_s13, %s3702_s22 }
  0x1c   : > { %4036 = vmatprep.subr.mxu0 %v4973_v5  ;;  %4047 = vmatprep.subr.mxu1 %v4973_v5  ;;  %v4995_v11 = vld [vmem:[%s437_s24] sm:$0xff]  ;;  %v546_v26 = vld [vmem:[%s6194_s1 + $0x38] sm:$0xff]  ;;  %v545_v28 = vld [vmem:[%s6194_s1 + $0x30] sm:$0xff]  ;;  %s3408_s24 = sshll.u32 %s432_s23, 4  ;;  %s3396_s16 = scalar_lea.sflag [#allocation3], %s431_s21  ;;  %s3409_s24 = int_to_ptr.vmem [resolvable:$true] %s3408_s24 }
  0x1d   : > { %v449_v7 = vadd.s32 4294967295, %v4965_v3  ;;  %v4979_v8 = vmul.u32 2, %v4968_v4  ;;  %4037 = vmatpush3.msra.mxu0 %v4973_v5  ;;  %4048 = vmatpush3.msra.mxu1 %v4973_v5  ;;  %vm551_vm1 = vcmp.eq.s32.totalorder %v4962_v2, %v4965_v3  ;;  %v547_v24 = vld [vmem:[%s6194_s1 + $0x40] sm:$0xff]  ;;  %v3482_v29 = vld [vmem:[%s6194_s1 + $0x88] sm:$0xff]  ;;  %v3480_v33 = vld [vmem:[%s6194_s1 + $0x78] sm:$0xff]  ;;  %v814_v42 = vadd.s32 1, %v4965_v3 }
  0x1e   : > { %4038 = vmatprep.subr.mxu0 %v4975_v6  ;;  %4049 = vmatprep.subr.mxu1 %v4975_v6  ;;  %v5008_v14 = vsel %vm551_vm1, 1.0, %v4837_v12  ;;  %v544_v30 = vld [vmem:[%s6194_s1 + $0x28] sm:$0xff]  ;;  %v3481_v31 = vld [vmem:[%s6194_s1 + $0x80] sm:$0xff]  ;;  %v542_v34 = vld [vmem:[%s6194_s1 + $0x18] sm:$0xff]  ;;  %s4775_s20 = scalar_lea.vmem %s3409_s24, 16 }
  0x1f   : > { %vm451_vm0 = vcmp.eq.s32.totalorder %v4962_v2, %v449_v7  ;;  %v450_v10 = vadd.s32 4294967295, %v4979_v8  ;;  %4039 = vmatpush3.msra.mxu0 %v4975_v6  ;;  %4050 = vmatpush3.msra.mxu1 %v4975_v6  ;;  %vm552_vm3 = vcmp.eq.s32.totalorder %v4962_v2, %v4979_v8  ;;  %v543_v32 = vld [vmem:[%s6194_s1 + $0x20] sm:$0xff]  ;;  %v3479_v35 = vld [vmem:[%s6194_s1 + $0x70] sm:$0xff]  ;;  %v3478_v37 = vld [vmem:[%s6194_s1 + $0x68] sm:$0xff]  ;;  %vm816_vm5 = vcmp.eq.s32.totalorder %v4962_v2, %v814_v42  ;;  %p4776_p11 = scmp.ne.s32.totalorder %s3409_s24, %s4775_s20 }
  0x20   : > { %4040 = vmatprep.subr.mxu0 %v4985_v9  ;;  %4051 = vmatprep.subr.mxu1 %v4985_v9  ;;  %v5003_v13 = vsel %vm451_vm0, 1.0, %v4837_v12  ;;  %v3474_v16 = vsel %vm552_vm3, 1.0, %v4837_v12  ;;  %v541_v36 = vld [vmem:[%s6194_s1 + $0x10] sm:$0xff]  ;;  %v540_v38 = vld [vmem:[%s6194_s1 + $0x8] sm:$0xff]  ;;  %v3477_v39 = vld [vmem:[%s6194_s1 + $0x60] sm:$0xff]  ;;  %v5101_v47 = vsel %vm816_vm5, 1.0, %v4837_v12 }
  0x21   : > { %vm452_vm2 = vcmp.eq.s32.totalorder %v4962_v2, %v450_v10  ;;  %4041 = vmatpush3.msra.mxu0 %v4985_v9  ;;  %4052 = vmatpush3.msra.mxu1 %v4985_v9  ;;  %v539_v40 = vld [vmem:[%s6194_s1] sm:$0xff]  ;;  %v3508_v41 = vld [vmem:[%s6194_s1 + $0x118] sm:$0xff]  ;;  %v815_v48 = vadd.s32 1, %v4979_v8  ;;  %v3507_v49 = vld [vmem:[%s6194_s1 + $0x110] sm:$0xff]  ;;  %vm2103_vm3 = vcmask 64512   ;;  %p4777_p12 = pnand %p4776_p11, %p4948_p5 }
  0x22   : > { %4042 = vmatprep.subr.mxu0 %v4995_v11  ;;  %4053 = vmatprep.subr.mxu1 %v4995_v11  ;;  %v3470_v15 = vsel %vm452_vm2, 1.0, %v4837_v12  ;;  %v3506_v50 = vld [vmem:[%s6194_s1 + $0x108] sm:$0xff]  ;;  %v3505_v51 = vld [vmem:[%s6194_s1 + $0x100] sm:$0xff]  ;;  %v3504_v53 = vld [vmem:[%s6194_s1 + $0xf8] sm:$0xff] }
  0x23   : > { %4043 = vmatpush3.msra.mxu0 %v4995_v11  ;;  %4044 = vmatprep.mubr.msk.f32.mxu0 %vm457_vm4, %v5003_v13  ;;  %vm817_vm7 = vcmp.eq.s32.totalorder %v4962_v2, %v815_v48  ;;  %v3503_v54 = vld [vmem:[%s6194_s1 + $0xf0] sm:$0xff]  ;;  %v3502_v55 = vld [vmem:[%s6194_s1 + $0xe8] sm:$0xff]  ;;  %v3501_v56 = vld [vmem:[%s6194_s1 + $0xe0] sm:$0xff]  ;;  %p4778_p13 = pneg %p4777_p12 }
  0x24   : > { %4054 = vmatpush3.msra.mxu1 %v4995_v11  ;;  %4055 = vmatprep.mubr.msk.f32.mxu1 %vm457_vm4, %v5008_v14  ;;  %v3494_v52 = vsel %vm817_vm7, 1.0, %v4837_v12  ;;  %v3500_v57 = vld [vmem:[%s6194_s1 + $0xd8] sm:$0xff]  ;;  %v3499_v58 = vld [vmem:[%s6194_s1 + $0xd0] sm:$0xff]  ;;  %v3498_v59 = vld [vmem:[%s6194_s1 + $0xc8] sm:$0xff]  ;;  %vm3393_vm7 = vcmask 122880  }
  0x25   : > { %4045 = vmatmul.mubr.msk.f32.vlgmr.msra.gmra.mxu0 %vm457_vm4, %v3470_v15  ;;  %4056 = vmatmul.mubr.msk.f32.vlgmr.msra.gmra.mxu1 %vm457_vm4, %v3474_v16  ;;  %v3497_v60 = vld [vmem:[%s6194_s1 + $0xc0] sm:$0xff]  ;;  %v3535_v3 = vld [vmem:[%s6177_s3 + $0xf8] sm:$0xff]  ;;  %v3529_v10 = vld [vmem:[%s6177_s3 + $0xc8] sm:$0xff]  ;;  %s4779_s1 = sshll.u32 %s4839_s29, 4  ;;  %s4780_s1 = int_to_ptr.vmem [resolvable:$false] %s4779_s1 }
  0x26   : > { %4058 = vmatprep.subr.mxu0 %v3488_v17  ;;  %4085 = vmatprep.subr.mxu1 %v550_v18  ;;  %v3532_v7 = vld [vmem:[%s6177_s3 + $0xe0] sm:$0xff]  ;;  %v3531_v8 = vld [vmem:[%s6177_s3 + $0xd8] sm:$0xff]  ;;  %v3526_v16 = vld [vmem:[%s6177_s3 + $0xb0] sm:$0xff]  ;;  %p4782_p0 = scmp.lt.s32.totalorder %s3409_s24, %s4780_s1 }
  0x27   : > { %4059 = vmatpush3.msra.mxu0 %v3488_v17  ;;  %4086 = vmatpush3.msra.mxu1 %v550_v18  ;;  %v3527_v15 = vld [vmem:[%s6177_s3 + $0xb8] sm:$0xff]  ;;  %v3525_v17 = vld [vmem:[%s6177_s3 + $0xa8] sm:$0xff]  ;;  %v3524_v18 = vld [vmem:[%s6177_s3 + $0xa0] sm:$0xff] }
  0x28   : > { %4060 = vmatprep.subr.mxu0 %v3487_v19  ;;  %4087 = vmatprep.subr.mxu1 %v549_v20 }
  0x29   : > { %4061 = vmatpush3.msra.mxu0 %v3487_v19  ;;  %4088 = vmatpush3.msra.mxu1 %v549_v20  ;;  %v3523_v19 = vld [vmem:[%s6177_s3 + $0x98] sm:$0xff]  ;;  %v3522_v20 = vld [vmem:[%s6177_s3 + $0x90] sm:$0xff] }
  0x2a   : > { %4062 = vmatprep.subr.mxu0 %v3486_v21  ;;  %4089 = vmatprep.subr.mxu1 %v548_v22 }
  0x2b   : > { %4063 = vmatpush3.msra.mxu0 %v3486_v21  ;;  %4090 = vmatpush3.msra.mxu1 %v548_v22  ;;  %v3521_v21 = vld [vmem:[%s6177_s3 + $0x88] sm:$0xff]  ;;  %v3520_v22 = vld [vmem:[%s6177_s3 + $0x80] sm:$0xff] }
  0x2c   : > { %4064 = vmatprep.subr.mxu0 %v3485_v23  ;;  %4091 = vmatprep.subr.mxu1 %v547_v24 }
  0x2d   : > { %4065 = vmatpush3.msra.mxu0 %v3485_v23  ;;  %4092 = vmatpush3.msra.mxu1 %v547_v24  ;;  %v1066_v23 = vadd.s32 4294967295, %v4960_v1 }
  0x2e   : > { %4066 = vmatprep.subr.mxu0 %v3484_v25  ;;  %4093 = vmatprep.subr.mxu1 %v546_v26 }
  0x2f   : > { %4067 = vmatpush3.msra.mxu0 %v3484_v25  ;;  %4094 = vmatpush3.msra.mxu1 %v546_v26  ;;  %vm1068_vm8 = vcmp.eq.s32.totalorder %v4962_v2, %v1066_v23 }
  0x30   : > { %4068 = vmatprep.subr.mxu0 %v3483_v27  ;;  %4095 = vmatprep.subr.mxu1 %v545_v28  ;;  %v5208_v24 = vsel %vm1068_vm8, 1.0, %v4837_v12 }
  0x31   : > { %4069 = vmatpush3.msra.mxu0 %v3483_v27  ;;  %4096 = vmatpush3.msra.mxu1 %v545_v28 }
  0x32   : > { %4070 = vmatprep.subr.mxu0 %v3482_v29  ;;  %4097 = vmatprep.subr.mxu1 %v544_v30 }
  0x33   : > { %4071 = vmatpush3.msra.mxu0 %v3482_v29  ;;  %4098 = vmatpush3.msra.mxu1 %v544_v30  ;;  %v3511_v29 = vld [vmem:[%s6195_s2] ss:$0 sm:$0xff]  ;;  %s4781_s2 = scalar_lea.vmem %s4780_s1, 32 }
  0x34   : > { %4072 = vmatprep.subr.mxu0 %v3481_v31  ;;  %4099 = vmatprep.subr.mxu1 %v543_v32  ;;  %p4783_p1 = scmp.lt.s32.totalorder %s4781_s2, %s4775_s20 }
  0x35   : > { %4073 = vmatpush3.msra.mxu0 %v3481_v31  ;;  %4100 = vmatpush3.msra.mxu1 %v543_v32 }
  0x36   : > { %4074 = vmatprep.subr.mxu0 %v3480_v33  ;;  %4101 = vmatprep.subr.mxu1 %v542_v34  ;;  %p4784_p2 = por %p4783_p1, %p4782_p0 }
  0x37   : > { %4075 = vmatpush3.msra.mxu0 %v3480_v33  ;;  %4102 = vmatpush3.msra.mxu1 %v542_v34 }
  0x38   : > { %4076 = vmatprep.subr.mxu0 %v3479_v35  ;;  %4103 = vmatprep.subr.mxu1 %v541_v36  ;;  %p4785_p3 = pnand %p4784_p2, %p4778_p13 }
  0x39   : > { %4077 = vmatpush3.msra.mxu0 %v3479_v35  ;;  %4104 = vmatpush3.msra.mxu1 %v541_v36 }
  0x3a   : > { %4078 = vmatprep.subr.mxu0 %v3478_v37  ;;  %4105 = vmatprep.subr.mxu1 %v540_v38 }
  0x3b   : > { %4079 = vmatpush3.msra.mxu0 %v3478_v37  ;;  %4106 = vmatpush3.msra.mxu1 %v540_v38 }
  0x3c   : > { %4080 = vmatprep.subr.mxu0 %v3477_v39  ;;  %4107 = vmatprep.subr.mxu1 %v539_v40 }
  0x3d   : > { %4081 = vmatpush3.msra.mxu0 %v3477_v39  ;;  %4108 = vmatpush3.msra.mxu1 %v539_v40 }
  0x3e   : > { %4112 = vmatprep.subr.mxu0 %v4973_v5  ;;  %4123 = vmatprep.subr.mxu1 %v3508_v41 }
  0xe5   : > { %v4046_v43 = vpop.f32.mrf.mxu0  ;;  %v4057_v44 = vpop.f32.mrf.mxu1 }
  0xe7   : > { %v530_v45 = vpop.f32.mrf.mxu0  ;;  %v629_v46 = vpop.f32.mrf.mxu1 }
  0xe8   : > { %4082 = vmatprep.mubr.msk.f32.mxu0 %vm651_vm6, %v629_v46  ;;  %4109 = vmatprep.mubr.msk.f32.mxu1 %vm651_vm6, %v530_v45 }
  0xe9   : > { %4083 = vmatmul.mubr.msk.f32.vlgmr.msra.gmra.mxu0 %vm651_vm6, %v4057_v44  ;;  %4110 = vmatmul.mubr.msk.f32.vlgmr.msra.gmra.mxu1 %vm651_vm6, %v4046_v43 }
  0xea   : > { %4113 = vmatpush3.msra.mxu0 %v4973_v5  ;;  %4120 = vmatprep.mubr.msk.f32.mxu0 %vm457_vm4, %v5101_v47  ;;  %v3534_v5 = vld [vmem:[%s6177_s3 + $0xf0] sm:$0xff] }
  0xeb   : > { %4114 = vmatprep.subr.mxu0 %v4975_v6  ;;  %4124 = vmatpush3.msra.mxu1 %v3508_v41 }
  0xec   : > { %4115 = vmatpush3.msra.mxu0 %v4975_v6  ;;  %4125 = vmatprep.subr.mxu1 %v3507_v49  ;;  %v3533_v6 = vld [vmem:[%s6177_s3 + $0xe8] sm:$0xff] }
  0xed   : > { %4116 = vmatprep.subr.mxu0 %v4985_v9  ;;  %4126 = vmatpush3.msra.mxu1 %v3507_v49 }
  0xee   : > { %4117 = vmatpush3.msra.mxu0 %v4985_v9  ;;  %4127 = vmatprep.subr.mxu1 %v3506_v50  ;;  %v3530_v9 = vld [vmem:[%s6177_s3 + $0xd0] sm:$0xff] }
  0xef   : > { %4118 = vmatprep.subr.mxu0 %v4995_v11  ;;  %4128 = vmatpush3.msra.mxu1 %v3506_v50 }
  0xf0   : > { %4119 = vmatpush3.msra.mxu0 %v4995_v11  ;;  %4129 = vmatprep.subr.mxu1 %v3505_v51  ;;  %v3528_v11 = vld [vmem:[%s6177_s3 + $0xc0] sm:$0xff] }
  0xf1   : > { %4121 = vmatmul.mubr.msk.f32.vlgmr.msra.gmra.mxu0 %vm457_vm4, %v3494_v52  ;;  %4130 = vmatpush3.msra.mxu1 %v3505_v51 }
  0xf2   : > { %4131 = vmatprep.subr.mxu1 %v3504_v53  ;;  %4157 = vmatprep.subr.mxu0 %v3535_v3 }
  0xf3   : > { %4132 = vmatpush3.msra.mxu1 %v3504_v53  ;;  %4158 = vmatpush3.msra.mxu0 %v3535_v3 }
  0xf4   : > { %4133 = vmatprep.subr.mxu1 %v3503_v54  ;;  %4159 = vmatprep.subr.mxu0 %v3534_v5 }
  0xf5   : > { %4134 = vmatpush3.msra.mxu1 %v3503_v54  ;;  %4160 = vmatpush3.msra.mxu0 %v3534_v5 }
  0xf6   : > { %4135 = vmatprep.subr.mxu1 %v3502_v55  ;;  %4161 = vmatprep.subr.mxu0 %v3533_v6 }
  0xf7   : > { %4136 = vmatpush3.msra.mxu1 %v3502_v55  ;;  %4162 = vmatpush3.msra.mxu0 %v3533_v6 }
  0xf8   : > { %4137 = vmatprep.subr.mxu1 %v3501_v56  ;;  %4163 = vmatprep.subr.mxu0 %v3532_v7 }
  0xf9   : > { %4138 = vmatpush3.msra.mxu1 %v3501_v56  ;;  %4164 = vmatpush3.msra.mxu0 %v3532_v7 }
  0xfa   : > { %4139 = vmatprep.subr.mxu1 %v3500_v57  ;;  %4165 = vmatprep.subr.mxu0 %v3531_v8 }
  0xfb   : > { %4140 = vmatpush3.msra.mxu1 %v3500_v57  ;;  %4166 = vmatpush3.msra.mxu0 %v3531_v8 }
  0xfc   : > { %4141 = vmatprep.subr.mxu1 %v3499_v58  ;;  %4167 = vmatprep.subr.mxu0 %v3530_v9 }
  0xfd   : > { %4142 = vmatpush3.msra.mxu1 %v3499_v58  ;;  %4168 = vmatpush3.msra.mxu0 %v3530_v9 }
  0xfe   : > { %4143 = vmatprep.subr.mxu1 %v3498_v59  ;;  %4169 = vmatprep.subr.mxu0 %v3529_v10 }
  0xff   : > { %4144 = vmatpush3.msra.mxu1 %v3498_v59  ;;  %4170 = vmatpush3.msra.mxu0 %v3529_v10 }
 0x100   : > { %4145 = vmatprep.subr.mxu1 %v3497_v60  ;;  %4171 = vmatprep.subr.mxu0 %v3528_v11 }
 0x101   : > { %4146 = vmatpush3.msra.mxu1 %v3497_v60  ;;  %4172 = vmatpush3.msra.mxu0 %v3528_v11 }
 0x102   : > { %4173 = vmatprep.subr.mxu0 %v3527_v15 }
 0x103   : > { %4174 = vmatpush3.msra.mxu0 %v3527_v15 }
 0x104   : > { %4175 = vmatprep.subr.mxu0 %v3526_v16 }
 0x105   : > { %4176 = vmatpush3.msra.mxu0 %v3526_v16 }
 0x106   : > { %4177 = vmatprep.subr.mxu0 %v3525_v17 }
 0x107   : > { %4178 = vmatpush3.msra.mxu0 %v3525_v17 }
 0x108   : > { %4179 = vmatprep.subr.mxu0 %v3524_v18 }
 0x109   : > { %4180 = vmatpush3.msra.mxu0 %v3524_v18 }
 0x10a   : > { %4181 = vmatprep.subr.mxu0 %v3523_v19 }
 0x10b   : > { %4182 = vmatpush3.msra.mxu0 %v3523_v19 }
 0x10c   : > { %4183 = vmatprep.subr.mxu0 %v3522_v20 }
 0x10d   : > { %4184 = vmatpush3.msra.mxu0 %v3522_v20 }
 0x10e   : > { %4185 = vmatprep.subr.mxu0 %v3521_v21 }
 0x10f   : > { %4186 = vmatpush3.msra.mxu0 %v3521_v21 }
 0x110   : > { %4187 = vmatprep.subr.mxu0 %v3520_v22 }
 0x111   : > { %4188 = vmatpush3.msra.mxu0 %v3520_v22 }
 0x1a9   : > { %v4084_v61 = vpop.f32.mrf.mxu0  ;;  %v4111_v25 = vpop.f32.mrf.mxu1 }
 0x1aa   : > { %v811_v27 = vadd.f32 %v4111_v25, %v4084_v61 }
 0x1ab   : > { %v5153_v62 = vpop.f32.mrf.mxu0  ;;  %v805_v26 = vpop.f32.mrf.mxu1 }
 0x1ac   : > { %v806_v30 = vadd.f32 %v805_v26, %v5153_v62 }
 0x1b1   : > { %v4122_v63 = vpop.f32.mrf.mxu0 }
 0x1b3   : > { %v894_v0 = vpop.f32.mrf.mxu0 }
 0x1b4   : > { %4147 = vmatprep.mubr.msk.f32.mxu1 %vm651_vm6, %v894_v0 }
 0x1b5   : > { %4148 = vmatmul.mubr.msk.f32.vlgmr.msra.gmra.mxu1 %vm651_vm6, %v4122_v63  ;;  %vm3069_vm6 = vcmask 523264  }
 0x1b6   : > { %4154 = vmatprep.mubr.msk.f32.mxu1 %vm1074_vm9, %v5208_v24 }
 0x275   : > { %v4149_v28 = vpop.f32.mrf.mxu1 }
 0x276   : > { %v998_v31 = vadd.f32 %v4149_v28, %v811_v27  ;;  %v1067_v28 = vadd.s32 4294967295, %v4968_v4 }
 0x277   : > { %v988_v32 = vpop.f32.mrf.mxu1 }
 0x278   : > { %v1007_v33 = vadd.f32 %v3511_v29, %v998_v31  ;;  %v997_v34 = vadd.f32 %v988_v32, %v806_v30  ;;  %v1339_v32 = vadd.s32 1, %v4960_v1  ;;  %vm1069_vm12 = vcmp.eq.s32.totalorder %v4962_v2, %v1067_v28  ;;  %v1669_v28 = vld [vmem:[%s6179_s5 + $0x40] sm:$0xff] }
 0x27a   : > { %v1009_v35 = vand.u32 2147483647, %v1007_v33  ;;  %v1006_v36 = vadd.f32 %v3511_v29, %v997_v34  ;;  %vm1055_vm10 = vcmp.lt.f32.partialorder %v1007_v33, 0.0  ;;  %v1061_v29 = vmul.f32 0.5, %v1007_v33 }
 0x27b   : > { %vm1341_vm13 = vcmp.eq.s32.totalorder %v4962_v2, %v1339_v32  ;;  %v3517_v33 = vsel %vm1069_vm12, 1.0, %v4837_v12  ;;  %v1665_v32 = vld [vmem:[%s6179_s5 + $0x20] sm:$0xff] }
 0x27c   : > { %v1011_v37 = vmul.f32 0.70710677, %v1009_v35  ;;  %v1008_v38 = vand.u32 2147483647, %v1006_v36  ;;  %vm1054_vm11 = vcmp.lt.f32.partialorder %v1006_v36, 0.0  ;;  %v5224_v1 = vsel %vm1341_vm13, 1.0, %v4837_v12 }
 0x27e   : > { %v1013_v39 = vmul.f32 0.3275911, %v1011_v37  ;;  %v1010_v40 = vmul.f32 0.70710677, %v1008_v38  ;;  %v1043_v44 = vsub.f32 0.0, %v1011_v37  ;;  %v1060_v38 = vmul.f32 0.5, %v1006_v36 }
 0x280   : > { %v1015_v41 = vadd.f32 1.0, %v1013_v39  ;;  %v1012_v42 = vmul.f32 0.3275911, %v1010_v40  ;;  %v1042_v48 = vsub.f32 0.0, %v1010_v40  ;;  %v1045_v51 = vmul.f32 %v1043_v44, %v1011_v37  ;;  %v1168_v44 = vld [vmem:[%s6177_s3 + $0x60] sm:$0xff] }
 0x281   : > { %v1340_v37 = vadd.s32 1, %v4968_v4  ;;  %v1171_v4 = vld [vmem:[%s6177_s3 + $0x78] sm:$0xff] }
 0x282   : > { %4747 = vrcp.f32 %v1015_v41  ;;  %v1014_v43 = vadd.f32 1.0, %v1012_v42  ;;  %v1044_v55 = vmul.f32 %v1042_v48, %v1010_v40  ;;  %v1048_v57 = vmul.f32 1.442695, %v1045_v51  ;;  %v1169_v42 = vld [vmem:[%s6177_s3 + $0x68] sm:$0xff]  ;;  %v3552_v48 = vld [vmem:[%s6177_s3 + $0x160] sm:$0xff] }
 0x283   : > { %vm1342_vm14 = vcmp.eq.s32.totalorder %v4962_v2, %v1340_v37  ;;  %v1170_v2 = vld [vmem:[%s6177_s3 + $0x70] sm:$0xff]  ;;  %v1165_v51 = vld [vmem:[%s6177_s3 + $0x48] sm:$0xff] }
 0x284   : > { %4749 = vrcp.f32 %v1014_v43  ;;  %v1046_v61 = vmul.f32 1.442695, %v1044_v55  ;;  %v3537_v36 = vsel %vm1342_vm14, 1.0, %v4837_v12  ;;  %v1163_v55 = vld [vmem:[%s6177_s3 + $0x38] sm:$0xff]  ;;  %v1662_v37 = vld [vmem:[%s6179_s5 + $0x8] sm:$0xff] }
 0x285   : > { %4751 = vpow2.f32 %v1048_v57  ;;  %v1162_v57 = vld [vmem:[%s6177_s3 + $0x30] sm:$0xff] }
 0x286   : > { %4753 = vpow2.f32 %v1046_v61  ;;  %v1160_v61 = vld [vmem:[%s6177_s3 + $0x20] sm:$0xff] }
 0x28f   : > { %v4748_v45 = vpop.eup %4747 }
 0x290   : > { %v1019_v46 = vmul.f32 %v4748_v45, %v1015_v41  ;;  %v3555_v41 = vld [vmem:[%s6177_s3 + $0x178] sm:$0xff] }
 0x291   : > { %v4750_v49 = vpop.eup %4749 }
 0x292   : > { %v1021_v50 = vsub.f32 2.0, %v1019_v46  ;;  %v1018_v52 = vmul.f32 %v4750_v49, %v1014_v43  ;;  %v4752_v17 = vpop.eup %4751  ;;  %v3554_v43 = vld [vmem:[%s6177_s3 + $0x170] sm:$0xff]  ;;  %v1167_v46 = vld [vmem:[%s6177_s3 + $0x58] sm:$0xff] }
 0x293   : > { %v4754_v21 = vpop.eup %4753 }
 0x294   : > { %v1023_v53 = vmul.f32 %v4748_v45, %v1021_v50  ;;  %v1020_v54 = vsub.f32 2.0, %v1018_v52  ;;  %v3553_v45 = vld [vmem:[%s6177_s3 + $0x168] sm:$0xff]  ;;  %v3551_v50 = vld [vmem:[%s6177_s3 + $0x158] sm:$0xff]  ;;  %v3550_v52 = vld [vmem:[%s6177_s3 + $0x150] sm:$0xff] }
 0x296   : > { %v1025_v56 = vmul.f32 1.0614054, %v1023_v53  ;;  %v1022_v58 = vmul.f32 %v4750_v49, %v1020_v54  ;;  %v1166_v49 = vld [vmem:[%s6177_s3 + $0x50] sm:$0xff]  ;;  %v3549_v54 = vld [vmem:[%s6177_s3 + $0x148] sm:$0xff] }
 0x298   : > { %v3513_v59 = vadd.f32 -1.4531521, %v1025_v56  ;;  %v1024_v60 = vmul.f32 1.0614054, %v1022_v58  ;;  %v3548_v56 = vld [vmem:[%s6177_s3 + $0x140] sm:$0xff] }
 0x29a   : > { %v1029_v62 = vmul.f32 %v3513_v59, %v1023_v53  ;;  %v3512_v63 = vadd.f32 -1.4531521, %v1024_v60  ;;  %v1161_v59 = vld [vmem:[%s6177_s3 + $0x28] sm:$0xff]  ;;  %v3546_v60 = vld [vmem:[%s6177_s3 + $0x130] sm:$0xff] }
 0x29c   : > { %v1031_v0 = vadd.f32 1.4214138, %v1029_v62  ;;  %v1028_v3 = vmul.f32 %v3512_v63, %v1022_v58  ;;  %v3545_v62 = vld [vmem:[%s6177_s3 + $0x128] sm:$0xff]  ;;  %v1159_v63 = vld [vmem:[%s6177_s3 + $0x18] sm:$0xff] }
 0x29e   : > { %v1033_v5 = vmul.f32 %v1031_v0, %v1023_v53  ;;  %v1030_v6 = vadd.f32 1.4214138, %v1028_v3  ;;  %v3544_v0 = vld [vmem:[%s6177_s3 + $0x120] sm:$0xff]  ;;  %v1158_v3 = vld [vmem:[%s6177_s3 + $0x10] sm:$0xff] }
 0x2a0   : > { %v3515_v7 = vadd.f32 -0.28449672, %v1033_v5  ;;  %v1032_v8 = vmul.f32 %v1030_v6, %v1022_v58  ;;  %v3543_v5 = vld [vmem:[%s6177_s3 + $0x118] sm:$0xff]  ;;  %v1157_v6 = vld [vmem:[%s6177_s3 + $0x8] sm:$0xff] }
 0x2a2   : > { %v1037_v9 = vmul.f32 %v3515_v7, %v1023_v53  ;;  %v3514_v10 = vadd.f32 -0.28449672, %v1032_v8  ;;  %v3542_v7 = vld [vmem:[%s6177_s3 + $0x110] sm:$0xff]  ;;  %v1156_v8 = vld [vmem:[%s6177_s3] sm:$0xff] }
 0x2a4   : > { %v1039_v11 = vadd.f32 0.2548296, %v1037_v9  ;;  %v1036_v15 = vmul.f32 %v3514_v10, %v1022_v58  ;;  %v3541_v9 = vld [vmem:[%s6177_s3 + $0x108] sm:$0xff]  ;;  %v3540_v10 = vld [vmem:[%s6177_s3 + $0x100] sm:$0xff] }
 0x2a6   : > { %v1041_v16 = vmul.f32 %v1039_v11, %v1023_v53  ;;  %v1038_v18 = vadd.f32 0.2548296, %v1036_v15  ;;  %v1164_v53 = vld [vmem:[%s6177_s3 + $0x40] sm:$0xff] }
 0x2a8   : > { %v1051_v19 = vmul.f32 %v4752_v17, %v1041_v16  ;;  %v1040_v20 = vmul.f32 %v1038_v18, %v1022_v58  ;;  %v3547_v58 = vld [vmem:[%s6177_s3 + $0x138] sm:$0xff] }
 0x2aa   : > { %v1053_v22 = vsub.f32 1.0, %v1051_v19  ;;  %v1050_v23 = vmul.f32 %v4754_v21, %v1040_v20  ;;  %v1676_v20 = vld [vmem:[%s6179_s5 + $0x78] sm:$0xff]  ;;  %v1675_v21 = vld [vmem:[%s6179_s5 + $0x70] sm:$0xff] }
 0x2ac   : > { %v1057_v25 = vsub.f32 0.0, %v1053_v22  ;;  %v1052_v26 = vsub.f32 1.0, %v1050_v23  ;;  %v1673_v23 = vld [vmem:[%s6179_s5 + $0x60] sm:$0xff] }
 0x2ae   : > { %v1059_v27 = vsel %vm1055_vm10, %v1057_v25, %v1053_v22  ;;  %v1056_v31 = vsub.f32 0.0, %v1052_v26  ;;  %v1674_v22 = vld [vmem:[%s6179_s5 + $0x68] sm:$0xff]  ;;  %v1672_v25 = vld [vmem:[%s6179_s5 + $0x58] sm:$0xff] }
 0x2af   : > { %v1063_v30 = vadd.f32 1.0, %v1059_v27  ;;  %v1670_v27 = vld [vmem:[%s6179_s5 + $0x48] sm:$0xff] }
 0x2b0   : > { %v1058_v35 = vsel %vm1054_vm11, %v1056_v31, %v1052_v26  ;;  %v1671_v26 = vld [vmem:[%s6179_s5 + $0x50] sm:$0xff]  ;;  %v1666_v31 = vld [vmem:[%s6179_s5 + $0x28] sm:$0xff] }
 0x2b1   : > { %v1065_v34 = vmul.f32 %v1063_v30, %v1061_v29  ;;  %v1062_v39 = vadd.f32 1.0, %v1058_v35  ;;  %v1668_v29 = vld [vmem:[%s6179_s5 + $0x38] sm:$0xff]  ;;  %v1667_v30 = vld [vmem:[%s6179_s5 + $0x30] sm:$0xff] }
 0x2b2   : > { %v1663_v35 = vld [vmem:[%s6179_s5 + $0x10] sm:$0xff] }
 0x2b3   : > { %4150 = vmatprep.subr.mxu1 %v1065_v34  ;;  %4227 = vmatprep.subr.mxu0 %v1065_v34  ;;  %v1064_v40 = vmul.f32 %v1062_v39, %v1060_v38 }
 0x2b4   : > { %4151 = vmatpush3.msra.mxu1 %v1065_v34 }
 0x2b5   : > { %4152 = vmatprep.subr.mxu1 %v1064_v40  ;;  %4189 = vmatprep.mubr.f32.mxu0 %v1064_v40 }
 0x2b6   : > { %4153 = vmatpush3.msra.mxu1 %v1064_v40  ;;  %4190 = vmatmul.mubr.f32.vlgmr.msra.gmra.mxu0 %v1065_v34 }
 0x2b7   : > { %4228 = vmatpush3.msra.mxu0 %v1065_v34  ;;  %4155 = vmatmul.mubr.msk.f32.vlgmr.msra.gmra.mxu1 %vm1074_vm9, %v3517_v33  ;;  %v1664_v34 = vld [vmem:[%s6179_s5 + $0x18] sm:$0xff] }
 0x2b8   : > { %4229 = vmatprep.subr.mxu0 %v1064_v40  ;;  %4231 = vmatprep.mubr.msk.f32.mxu0 %vm1074_vm9, %v5224_v1 }
 0x2b9   : > { %4230 = vmatpush3.msra.mxu0 %v1064_v40  ;;  %4192 = vmatprep.subr.mxu1 %v1171_v4 }
 0x2ba   : > { %4232 = vmatmul.mubr.msk.f32.vlgmr.msra.gmra.mxu0 %vm1074_vm9, %v3537_v36  ;;  %4193 = vmatpush3.msra.mxu1 %v1171_v4  ;;  %v3556_v36 = vld [vmem:[%s6178_s4] ss:$0 sm:$0xff] }
 0x2bb   : > { %4194 = vmatprep.subr.mxu1 %v1170_v2  ;;  %4234 = vmatprep.subr.mxu0 %v3555_v41 }
 0x2bc   : > { %4195 = vmatpush3.msra.mxu1 %v1170_v2  ;;  %4235 = vmatpush3.msra.mxu0 %v3555_v41 }
 0x2bd   : > { %4196 = vmatprep.subr.mxu1 %v1169_v42  ;;  %4236 = vmatprep.subr.mxu0 %v3554_v43 }
 0x2be   : > { %4197 = vmatpush3.msra.mxu1 %v1169_v42  ;;  %4237 = vmatpush3.msra.mxu0 %v3554_v43 }
 0x2bf   : > { %4198 = vmatprep.subr.mxu1 %v1168_v44  ;;  %4238 = vmatprep.subr.mxu0 %v3553_v45 }
 0x2c0   : > { %4199 = vmatpush3.msra.mxu1 %v1168_v44  ;;  %4239 = vmatpush3.msra.mxu0 %v3553_v45 }
 0x2c1   : > { %4200 = vmatprep.subr.mxu1 %v1167_v46  ;;  %4240 = vmatprep.subr.mxu0 %v3552_v48 }
 0x2c2   : > { %4201 = vmatpush3.msra.mxu1 %v1167_v46  ;;  %4241 = vmatpush3.msra.mxu0 %v3552_v48 }
 0x2c3   : > { %4202 = vmatprep.subr.mxu1 %v1166_v49  ;;  %4242 = vmatprep.subr.mxu0 %v3551_v50 }
 0x2c4   : > { %4203 = vmatpush3.msra.mxu1 %v1166_v49  ;;  %4243 = vmatpush3.msra.mxu0 %v3551_v50 }
 0x2c5   : > { %4204 = vmatprep.subr.mxu1 %v1165_v51  ;;  %4244 = vmatprep.subr.mxu0 %v3550_v52 }
 0x2c6   : > { %4205 = vmatpush3.msra.mxu1 %v1165_v51  ;;  %4245 = vmatpush3.msra.mxu0 %v3550_v52 }
 0x2c7   : > { %4206 = vmatprep.subr.mxu1 %v1164_v53  ;;  %4246 = vmatprep.subr.mxu0 %v3549_v54 }
 0x2c8   : > { %4207 = vmatpush3.msra.mxu1 %v1164_v53  ;;  %4247 = vmatpush3.msra.mxu0 %v3549_v54 }
 0x2c9   : > { %4208 = vmatprep.subr.mxu1 %v1163_v55  ;;  %4248 = vmatprep.subr.mxu0 %v3548_v56 }
 0x2ca   : > { %4209 = vmatpush3.msra.mxu1 %v1163_v55  ;;  %4249 = vmatpush3.msra.mxu0 %v3548_v56 }
 0x2cb   : > { %4210 = vmatprep.subr.mxu1 %v1162_v57  ;;  %4250 = vmatprep.subr.mxu0 %v3547_v58 }
 0x2cc   : > { %4211 = vmatpush3.msra.mxu1 %v1162_v57  ;;  %4251 = vmatpush3.msra.mxu0 %v3547_v58 }
 0x2cd   : > { %4212 = vmatprep.subr.mxu1 %v1161_v59  ;;  %4252 = vmatprep.subr.mxu0 %v3546_v60 }
 0x2ce   : > { %4213 = vmatpush3.msra.mxu1 %v1161_v59  ;;  %4253 = vmatpush3.msra.mxu0 %v3546_v60 }
 0x2cf   : > { %4214 = vmatprep.subr.mxu1 %v1160_v61  ;;  %4254 = vmatprep.subr.mxu0 %v3545_v62 }
 0x2d0   : > { %4215 = vmatpush3.msra.mxu1 %v1160_v61  ;;  %4255 = vmatpush3.msra.mxu0 %v3545_v62 }
 0x2d1   : > { %4216 = vmatprep.subr.mxu1 %v1159_v63  ;;  %4256 = vmatprep.subr.mxu0 %v3544_v0 }
 0x2d2   : > { %4217 = vmatpush3.msra.mxu1 %v1159_v63  ;;  %4257 = vmatpush3.msra.mxu0 %v3544_v0 }
 0x2d3   : > { %4218 = vmatprep.subr.mxu1 %v1158_v3  ;;  %4258 = vmatprep.subr.mxu0 %v3543_v5 }
 0x2d4   : > { %4219 = vmatpush3.msra.mxu1 %v1158_v3  ;;  %4259 = vmatpush3.msra.mxu0 %v3543_v5 }
 0x2d5   : > { %4220 = vmatprep.subr.mxu1 %v1157_v6  ;;  %4260 = vmatprep.subr.mxu0 %v3542_v7 }
 0x2d6   : > { %4221 = vmatpush3.msra.mxu1 %v1157_v6  ;;  %4261 = vmatpush3.msra.mxu0 %v3542_v7 }
 0x2d7   : > { %4222 = vmatprep.subr.mxu1 %v1156_v8  ;;  %4262 = vmatprep.subr.mxu0 %v3541_v9 }
 0x2d8   : > { %4223 = vmatpush3.msra.mxu1 %v1156_v8  ;;  %4263 = vmatpush3.msra.mxu0 %v3541_v9 }
 0x2d9   : > { %4269 = vmatprep.subr.mxu1 %v4837_v12  ;;  %4264 = vmatprep.subr.mxu0 %v3540_v10 }
 0x2da   : > { %4265 = vmatpush3.msra.mxu0 %v3540_v10 }
 0x2db   : > { %4318 = vmatprep.subr.mxu0 %v4837_v12 }
 0x376   : > { %v4191_v11 = vpop.f32.mrf.mxu0 }
 0x377   : > { %v4156_v15 = vpop.f32.mrf.mxu1 }
 0x378   : > { %v1255_v16 = vpop.f32.mrf.mxu0 }
 0x379   : > { %v1147_v17 = vpop.f32.mrf.mxu1 }
 0x37a   : > { %4224 = vmatprep.mubr.f32.mxu1 %v1147_v17  ;;  %v4233_v18 = vpop.f32.mrf.mxu0 }
 0x37b   : > { %4225 = vmatmul.mubr.f32.vlgmr.msra.gmra.mxu1 %v4156_v15 }
 0x37c   : > { %v1419_v19 = vpop.f32.mrf.mxu0  ;;  %4273 = vmatprep.mubr.msk.f32.mxu1 %vm4838_vm15, %v4837_v12 }
 0x37d   : > { %4266 = vmatprep.mubr.f32.mxu0 %v1419_v19 }
 0x37e   : > { %4267 = vmatmul.mubr.f32.vlgmr.msra.gmra.mxu0 %v4233_v18 }
 0x37f   : > { %4350 = vmatprep.mubr.msk.f32.mxu0 %vm4838_vm15, %v4837_v12  ;;  %4319 = vmatpush3.msra.mxu0 %v1676_v20 }
 0x380   : > { %4320 = vmatprep.subr.mxu0 %v4837_v12 }
 0x381   : > { %4321 = vmatpush3.msra.mxu0 %v1675_v21 }
 0x382   : > { %4322 = vmatprep.subr.mxu0 %v4837_v12 }
 0x383   : > { %4323 = vmatpush3.msra.mxu0 %v1674_v22 }
 0x384   : > { %4324 = vmatprep.subr.mxu0 %v4837_v12 }
 0x385   : > { %4325 = vmatpush3.msra.mxu0 %v1673_v23 }
 0x386   : > { %4326 = vmatprep.subr.mxu0 %v4837_v12 }
 0x387   : > { %4327 = vmatpush3.msra.mxu0 %v1672_v25 }
 0x388   : > { %4328 = vmatprep.subr.mxu0 %v4837_v12 }
 0x389   : > { %4329 = vmatpush3.msra.mxu0 %v1671_v26 }
 0x38a   : > { %4330 = vmatprep.subr.mxu0 %v4837_v12 }
 0x38b   : > { %4331 = vmatpush3.msra.mxu0 %v1670_v27 }
 0x38c   : > { %4332 = vmatprep.subr.mxu0 %v4837_v12 }
 0x38d   : > { %4333 = vmatpush3.msra.mxu0 %v1669_v28 }
 0x38e   : > { %4334 = vmatprep.subr.mxu0 %v4837_v12 }
 0x38f   : > { %4335 = vmatpush3.msra.mxu0 %v1668_v29 }
 0x390   : > { %4336 = vmatprep.subr.mxu0 %v4837_v12 }
 0x391   : > { %4337 = vmatpush3.msra.mxu0 %v1667_v30 }
 0x392   : > { %4338 = vmatprep.subr.mxu0 %v4837_v12 }
 0x393   : > { %4339 = vmatpush3.msra.mxu0 %v1666_v31 }
 0x394   : > { %4340 = vmatprep.subr.mxu0 %v4837_v12 }
 0x395   : > { %4341 = vmatpush3.msra.mxu0 %v1665_v32 }
 0x396   : > { %4342 = vmatprep.subr.mxu0 %v4837_v12 }
 0x397   : > { %4343 = vmatpush3.msra.mxu0 %v1664_v34 }
 0x398   : > { %4344 = vmatprep.subr.mxu0 %v4837_v12 }
 0x399   : > { %4345 = vmatpush3.msra.mxu0 %v1663_v35 }
 0x39a   : > { %4346 = vmatprep.subr.mxu0 %v4837_v12 }
 0x39b   : > { %4347 = vmatpush3.msra.mxu0 %v1662_v37 }
 0x39c   : > { %4348 = vmatprep.subr.mxu0 %v4837_v12 }
 0x43b   : > { %v4226_v38 = vpop.f32.mrf.mxu1 }
 0x43c   : > { %v1336_v39 = vadd.f32 %v4226_v38, %v4191_v11 }
 0x43d   : > { %v1330_v40 = vpop.f32.mrf.mxu1 }
 0x43e   : > { %v1331_v33 = vadd.f32 %v1330_v40, %v1255_v16  ;;  %v4268_v4 = vpop.f32.mrf.mxu0 }
 0x43f   : > { %v1521_v2 = vadd.f32 %v4268_v4, %v1336_v39 }
 0x440   : > { %v1511_v41 = vpop.f32.mrf.mxu0 }
 0x441   : > { %v1530_v42 = vadd.f32 %v3556_v36, %v1521_v2  ;;  %v1520_v43 = vadd.f32 %v1511_v41, %v1331_v33 }
 0x443   : > { %v1532_v44 = vand.u32 2147483647, %v1530_v42  ;;  %v1529_v45 = vadd.f32 %v3556_v36, %v1520_v43  ;;  %vm1578_vm0 = vcmp.lt.f32.partialorder %v1530_v42, 0.0  ;;  %v1584_v39 = vmul.f32 0.5, %v1530_v42  ;;  %v3578_v42 = vld [vmem:[%s6179_s5 + $0xf8] sm:$0xff] }
 0x445   : > { %v1534_v46 = vmul.f32 0.70710677, %v1532_v44  ;;  %v1531_v48 = vand.u32 2147483647, %v1529_v45  ;;  %vm1577_vm1 = vcmp.lt.f32.partialorder %v1529_v45, 0.0  ;;  %v1583_v2 = vmul.f32 0.5, %v1529_v45 }
 0x446   : > { %v3577_v44 = vld [vmem:[%s6179_s5 + $0xf0] sm:$0xff]  ;;  %v3576_v45 = vld [vmem:[%s6179_s5 + $0xe8] sm:$0xff] }
 0x447   : > { %v1536_v49 = vmul.f32 0.3275911, %v1534_v46  ;;  %v1533_v50 = vmul.f32 0.70710677, %v1531_v48  ;;  %v1566_v54 = vsub.f32 0.0, %v1534_v46  ;;  %v3574_v48 = vld [vmem:[%s6179_s5 + $0xd8] sm:$0xff] }
 0x449   : > { %v1538_v51 = vadd.f32 1.0, %v1536_v49  ;;  %v1535_v52 = vmul.f32 0.3275911, %v1533_v50  ;;  %v1565_v57 = vsub.f32 0.0, %v1533_v50  ;;  %v1568_v60 = vmul.f32 %v1566_v54, %v1534_v46  ;;  %v3575_v46 = vld [vmem:[%s6179_s5 + $0xe0] sm:$0xff]  ;;  %v3573_v49 = vld [vmem:[%s6179_s5 + $0xd0] sm:$0xff] }
 0x44a   : > { %v3568_v54 = vld [vmem:[%s6179_s5 + $0xa8] sm:$0xff] }
 0x44b   : > { %4755 = vrcp.f32 %v1538_v51  ;;  %v1537_v53 = vadd.f32 1.0, %v1535_v52  ;;  %v1567_v0 = vmul.f32 %v1565_v57, %v1533_v50  ;;  %v1571_v5 = vmul.f32 1.442695, %v1568_v60  ;;  %v3572_v50 = vld [vmem:[%s6179_s5 + $0xc8] sm:$0xff]  ;;  %v3570_v52 = vld [vmem:[%s6179_s5 + $0xb8] sm:$0xff]  ;;  %v3565_v57 = vld [vmem:[%s6179_s5 + $0x90] sm:$0xff] }
 0x44c   : > { %v3563_v60 = vld [vmem:[%s6179_s5 + $0x80] sm:$0xff] }
 0x44d   : > { %4757 = vrcp.f32 %v1537_v53  ;;  %v1569_v9 = vmul.f32 1.442695, %v1567_v0 }
 0x44e   : > { %4759 = vpow2.f32 %v1571_v5  ;;  %v3594_v5 = vld [vmem:[%s6179_s5 + $0x170] sm:$0xff] }
 0x44f   : > { %4761 = vpow2.f32 %v1569_v9  ;;  %v3590_v9 = vld [vmem:[%s6179_s5 + $0x150] sm:$0xff] }
 0x458   : > { %v4756_v55 = vpop.eup %4755 }
 0x459   : > { %v1542_v56 = vmul.f32 %v4756_v55, %v1538_v51  ;;  %v3571_v51 = vld [vmem:[%s6179_s5 + $0xc0] sm:$0xff] }
 0x45a   : > { %v4758_v58 = vpop.eup %4757 }
 0x45b   : > { %v1544_v59 = vsub.f32 2.0, %v1542_v56  ;;  %v1541_v61 = vmul.f32 %v4758_v58, %v1537_v53  ;;  %v4760_v27 = vpop.eup %4759  ;;  %v3569_v53 = vld [vmem:[%s6179_s5 + $0xb0] sm:$0xff]  ;;  %v3566_v56 = vld [vmem:[%s6179_s5 + $0x98] sm:$0xff] }
 0x45c   : > { %v4762_v31 = vpop.eup %4761 }
 0x45d   : > { %v1546_v62 = vmul.f32 %v4756_v55, %v1544_v59  ;;  %v1543_v63 = vsub.f32 2.0, %v1541_v61  ;;  %v3567_v55 = vld [vmem:[%s6179_s5 + $0xa0] sm:$0xff]  ;;  %v3564_v59 = vld [vmem:[%s6179_s5 + $0x88] sm:$0xff] }
 0x45f   : > { %v1548_v3 = vmul.f32 1.0614054, %v1546_v62  ;;  %v1545_v6 = vmul.f32 %v4758_v58, %v1543_v63  ;;  %v1661_v58 = vld [vmem:[%s6179_s5] sm:$0xff] }
 0x460   : > { %4349 = vmatpush3.msra.mxu0 %v1661_v58 }
 0x461   : > { %v3558_v7 = vadd.f32 -1.4531521, %v1548_v3  ;;  %v1547_v8 = vmul.f32 1.0614054, %v1545_v6  ;;  %4395 = vmatprep.subr.mxu0 %v4837_v12  ;;  %v3595_v3 = vld [vmem:[%s6179_s5 + $0x178] sm:$0xff] }
 0x463   : > { %v1552_v10 = vmul.f32 %v3558_v7, %v1546_v62  ;;  %v3557_v11 = vadd.f32 -1.4531521, %v1547_v8  ;;  %v3592_v7 = vld [vmem:[%s6179_s5 + $0x160] sm:$0xff]  ;;  %v3591_v8 = vld [vmem:[%s6179_s5 + $0x158] sm:$0xff] }
 0x465   : > { %v1554_v15 = vadd.f32 1.4214138, %v1552_v10  ;;  %v1551_v16 = vmul.f32 %v3557_v11, %v1545_v6  ;;  %v3589_v10 = vld [vmem:[%s6179_s5 + $0x148] sm:$0xff]  ;;  %v3588_v11 = vld [vmem:[%s6179_s5 + $0x140] sm:$0xff] }
 0x467   : > { %v1556_v17 = vmul.f32 %v1554_v15, %v1546_v62  ;;  %v1553_v18 = vadd.f32 1.4214138, %v1551_v16  ;;  %v3587_v15 = vld [vmem:[%s6179_s5 + $0x138] sm:$0xff]  ;;  %v3586_v16 = vld [vmem:[%s6179_s5 + $0x130] sm:$0xff] }
 0x469   : > { %v3560_v19 = vadd.f32 -0.28449672, %v1556_v17  ;;  %v1555_v20 = vmul.f32 %v1553_v18, %v1545_v6  ;;  %v3585_v17 = vld [vmem:[%s6179_s5 + $0x128] sm:$0xff]  ;;  %v3584_v18 = vld [vmem:[%s6179_s5 + $0x120] sm:$0xff] }
 0x46b   : > { %v1560_v21 = vmul.f32 %v3560_v19, %v1546_v62  ;;  %v3559_v22 = vadd.f32 -0.28449672, %v1555_v20  ;;  %v3583_v19 = vld [vmem:[%s6179_s5 + $0x118] sm:$0xff]  ;;  %v3582_v20 = vld [vmem:[%s6179_s5 + $0x110] sm:$0xff] }
 0x46d   : > { %v1562_v23 = vadd.f32 0.2548296, %v1560_v21  ;;  %v1559_v25 = vmul.f32 %v3559_v22, %v1545_v6  ;;  %v3581_v21 = vld [vmem:[%s6179_s5 + $0x108] sm:$0xff]  ;;  %v3580_v22 = vld [vmem:[%s6179_s5 + $0x100] sm:$0xff] }
 0x46f   : > { %v1564_v26 = vmul.f32 %v1562_v23, %v1546_v62  ;;  %v1561_v28 = vadd.f32 0.2548296, %v1559_v25 }
 0x471   : > { %v1574_v29 = vmul.f32 %v4760_v27, %v1564_v26  ;;  %v1563_v30 = vmul.f32 %v1561_v28, %v1545_v6  ;;  %v3593_v6 = vld [vmem:[%s6179_s5 + $0x168] sm:$0xff] }
 0x473   : > { %v1576_v32 = vsub.f32 1.0, %v1574_v29  ;;  %v1573_v34 = vmul.f32 %v4762_v31, %v1563_v30  ;;  %v2191_v31 = vld [vmem:[%s6181_s7 + $0x78] sm:$0xff] }
 0x475   : > { %v1580_v35 = vsub.f32 0.0, %v1576_v32  ;;  %v1575_v37 = vsub.f32 1.0, %v1573_v34  ;;  %v2189_v34 = vld [vmem:[%s6181_s7 + $0x68] sm:$0xff] }
 0x477   : > { %v1582_v38 = vsel %vm1578_vm0, %v1580_v35, %v1576_v32  ;;  %v1579_v40 = vsub.f32 0.0, %v1575_v37  ;;  %v2190_v32 = vld [vmem:[%s6181_s7 + $0x70] sm:$0xff]  ;;  %v2188_v35 = vld [vmem:[%s6181_s7 + $0x60] sm:$0xff] }
 0x478   : > { %v1586_v33 = vadd.f32 1.0, %v1582_v38  ;;  %v2186_v38 = vld [vmem:[%s6181_s7 + $0x50] sm:$0xff] }
 0x479   : > { %v1581_v4 = vsel %vm1577_vm1, %v1579_v40, %v1575_v37  ;;  %v2187_v37 = vld [vmem:[%s6181_s7 + $0x58] sm:$0xff]  ;;  %v2184_v40 = vld [vmem:[%s6181_s7 + $0x40] sm:$0xff] }
 0x47a   : > { %v5396_v36 = vmul.f32 %v1586_v33, %v1584_v39  ;;  %v1585_v41 = vadd.f32 1.0, %v1581_v4  ;;  %v2185_v39 = vld [vmem:[%s6181_s7 + $0x48] sm:$0xff]  ;;  %v2183_v33 = vld [vmem:[%s6181_s7 + $0x38] sm:$0xff]  ;;  %v2182_v4 = vld [vmem:[%s6181_s7 + $0x30] sm:$0xff] }
 0x47c   : > { %4270 = vmatpush3.msra.mxu1 %v5396_v36  ;;  %v5400_v43 = vmul.f32 %v1585_v41, %v1583_v2  ;;  %v2180_v2 = vld [vmem:[%s6181_s7 + $0x20] sm:$0xff]  ;;  %v2179_v41 = vld [vmem:[%s6181_s7 + $0x18] sm:$0xff] }
 0x47d   : > { %4271 = vmatprep.subr.mxu1 %v4837_v12 }
 0x47e   : > { %4272 = vmatpush3.msra.mxu1 %v5400_v43 }
 0x47f   : > { %4274 = vmatmul.mubr.msk.f32.vlgmr.msra.gmra.mxu1 %vm1074_vm9, %v5003_v13  ;;  %4276 = vmatprep.subr.mxu1 %v4837_v12 }
 0x480   : > { %4277 = vmatpush3.msra.mxu1 %v5396_v36  ;;  %4280 = vmatprep.mubr.msk.f32.mxu1 %vm4838_vm15, %v4837_v12 }
 0x481   : > { %4278 = vmatprep.subr.mxu1 %v4837_v12 }
 0x482   : > { %4279 = vmatpush3.msra.mxu1 %v5400_v43 }
 0x483   : > { %4281 = vmatmul.mubr.msk.f32.vlgmr.msra.gmra.mxu1 %vm1074_vm9, %v5008_v14  ;;  %4283 = vmatprep.subr.mxu1 %v4837_v12 }
 0x484   : > { %4284 = vmatpush3.msra.mxu1 %v3578_v42  ;;  %4315 = vmatprep.mubr.msk.f32.mxu1 %vm4838_vm15, %v4837_v12  ;;  %v2177_v42 = vld [vmem:[%s6181_s7 + $0x8] sm:$0xff] }
 0x485   : > { %4285 = vmatprep.subr.mxu1 %v4837_v12 }
 0x486   : > { %4286 = vmatpush3.msra.mxu1 %v3577_v44 }
 0x487   : > { %4287 = vmatprep.subr.mxu1 %v4837_v12 }
 0x488   : > { %4288 = vmatpush3.msra.mxu1 %v3576_v45  ;;  %v3596_v45 = vld [vmem:[%s6180_s6] ss:$0 sm:$0xff] }
 0x489   : > { %4289 = vmatprep.subr.mxu1 %v4837_v12 }
 0x48a   : > { %4290 = vmatpush3.msra.mxu1 %v3575_v46 }
 0x48b   : > { %4291 = vmatprep.subr.mxu1 %v4837_v12 }
 0x48c   : > { %4292 = vmatpush3.msra.mxu1 %v3574_v48 }
 0x48d   : > { %4293 = vmatprep.subr.mxu1 %v4837_v12 }
 0x48e   : > { %4294 = vmatpush3.msra.mxu1 %v3573_v49 }
 0x48f   : > { %4295 = vmatprep.subr.mxu1 %v4837_v12 }
 0x490   : > { %4296 = vmatpush3.msra.mxu1 %v3572_v50 }
 0x491   : > { %4297 = vmatprep.subr.mxu1 %v4837_v12 }
 0x492   : > { %4298 = vmatpush3.msra.mxu1 %v3571_v51 }
 0x493   : > { %4299 = vmatprep.subr.mxu1 %v4837_v12 }
 0x494   : > { %4300 = vmatpush3.msra.mxu1 %v3570_v52 }
 0x495   : > { %4301 = vmatprep.subr.mxu1 %v4837_v12 }
 0x496   : > { %4302 = vmatpush3.msra.mxu1 %v3569_v53 }
 0x497   : > { %4303 = vmatprep.subr.mxu1 %v4837_v12 }
 0x498   : > { %4304 = vmatpush3.msra.mxu1 %v3568_v54 }
 0x499   : > { %4305 = vmatprep.subr.mxu1 %v4837_v12 }
 0x49a   : > { %4306 = vmatpush3.msra.mxu1 %v3567_v55 }
 0x49b   : > { %4307 = vmatprep.subr.mxu1 %v4837_v12 }
 0x49c   : > { %4308 = vmatpush3.msra.mxu1 %v3566_v56 }
 0x49d   : > { %4309 = vmatprep.subr.mxu1 %v4837_v12 }
 0x49e   : > { %4310 = vmatpush3.msra.mxu1 %v3565_v57 }
 0x49f   : > { %4311 = vmatprep.subr.mxu1 %v4837_v12 }
 0x4a0   : > { %4312 = vmatpush3.msra.mxu1 %v3564_v59 }
 0x4a1   : > { %4313 = vmatprep.subr.mxu1 %v4837_v12 }
 0x4a2   : > { %4314 = vmatpush3.msra.mxu1 %v3563_v60 }
 0x4a3   : > { %4353 = vmatprep.subr.mxu1 %v4837_v12 }
 0x53f   : > { %v1657_v61 = vpop.f32.mrf.mxu1 }
 0x540   : > { %4351 = vmatmul.mubr.f32.vlgmr.msra.gmra.mxu0 %v1657_v61 }
 0x541   : > { %v4275_v62 = vpop.f32.mrf.mxu1  ;;  %4397 = vmatprep.mubr.msk.f32.mxu0 %vm4838_vm15, %v4837_v12 }
 0x543   : > { %v1745_v63 = vpop.f32.mrf.mxu1 }
 0x544   : > { %4316 = vmatmul.mubr.f32.vlgmr.msra.gmra.mxu1 %v1745_v63 }
 0x545   : > { %4354 = vmatpush3.msra.mxu1 %v5396_v36  ;;  %v4282_v0 = vpop.f32.mrf.mxu1  ;;  %4357 = vmatprep.mubr.msk.f32.mxu1 %vm4838_vm15, %v4837_v12  ;;  %v2181_v36 = vld [vmem:[%s6181_s7 + $0x28] sm:$0xff] }
 0x546   : > { %4355 = vmatprep.subr.mxu1 %v4837_v12 }
 0x547   : > { %4356 = vmatpush3.msra.mxu1 %v5400_v43  ;;  %v2178_v43 = vld [vmem:[%s6181_s7 + $0x10] sm:$0xff] }
 0x548   : > { %4358 = vmatmul.mubr.msk.f32.vlgmr.msra.gmra.mxu1 %vm1074_vm9, %v5101_v47  ;;  %4360 = vmatprep.subr.mxu1 %v4837_v12 }
 0x549   : > { %4361 = vmatpush3.msra.mxu1 %v3595_v3  ;;  %4392 = vmatprep.mubr.msk.f32.mxu1 %vm4838_vm15, %v4837_v12 }
 0x54a   : > { %4362 = vmatprep.subr.mxu1 %v4837_v12 }
 0x54b   : > { %4363 = vmatpush3.msra.mxu1 %v3594_v5 }
 0x54c   : > { %4364 = vmatprep.subr.mxu1 %v4837_v12 }
 0x54d   : > { %4365 = vmatpush3.msra.mxu1 %v3593_v6 }
 0x54e   : > { %4366 = vmatprep.subr.mxu1 %v4837_v12 }
 0x54f   : > { %4367 = vmatpush3.msra.mxu1 %v3592_v7 }
 0x550   : > { %4368 = vmatprep.subr.mxu1 %v4837_v12 }
 0x551   : > { %4369 = vmatpush3.msra.mxu1 %v3591_v8 }
 0x552   : > { %4370 = vmatprep.subr.mxu1 %v4837_v12 }
 0x553   : > { %4371 = vmatpush3.msra.mxu1 %v3590_v9 }
 0x554   : > { %4372 = vmatprep.subr.mxu1 %v4837_v12 }
 0x555   : > { %4373 = vmatpush3.msra.mxu1 %v3589_v10 }
 0x556   : > { %4374 = vmatprep.subr.mxu1 %v4837_v12 }
 0x557   : > { %4375 = vmatpush3.msra.mxu1 %v3588_v11 }
 0x558   : > { %4376 = vmatprep.subr.mxu1 %v4837_v12 }
 0x559   : > { %4377 = vmatpush3.msra.mxu1 %v3587_v15 }
 0x55a   : > { %4378 = vmatprep.subr.mxu1 %v4837_v12 }
 0x55b   : > { %4379 = vmatpush3.msra.mxu1 %v3586_v16 }
 0x55c   : > { %4380 = vmatprep.subr.mxu1 %v4837_v12 }
 0x55d   : > { %4381 = vmatpush3.msra.mxu1 %v3585_v17 }
 0x55e   : > { %4382 = vmatprep.subr.mxu1 %v4837_v12 }
 0x55f   : > { %4383 = vmatpush3.msra.mxu1 %v3584_v18 }
 0x560   : > { %4384 = vmatprep.subr.mxu1 %v4837_v12 }
 0x561   : > { %4385 = vmatpush3.msra.mxu1 %v3583_v19 }
 0x562   : > { %4386 = vmatprep.subr.mxu1 %v4837_v12 }
 0x563   : > { %4387 = vmatpush3.msra.mxu1 %v3582_v20  ;;  %v3615_v20 = vld [vmem:[%s6181_s7 + $0xf8] sm:$0xff] }
 0x564   : > { %4388 = vmatprep.subr.mxu1 %v4837_v12 }
 0x565   : > { %4389 = vmatpush3.msra.mxu1 %v3581_v21  ;;  %v3614_v21 = vld [vmem:[%s6181_s7 + $0xf0] sm:$0xff] }
 0x566   : > { %4390 = vmatprep.subr.mxu1 %v4837_v12 }
 0x567   : > { %4391 = vmatpush3.msra.mxu1 %v3580_v22  ;;  %v3613_v22 = vld [vmem:[%s6181_s7 + $0xe8] sm:$0xff] }
 0x568   : > { %4435 = vmatprep.subr.mxu1 %v4837_v12 }
 0x600   : > { %v1902_v23 = vpop.f32.mrf.mxu0 }
 0x602   : > { %v4352_v25 = vpop.f32.mrf.mxu0 }
 0x603   : > { %v3610_v25 = vld [vmem:[%s6181_s7 + $0xd0] sm:$0xff] }
 0x604   : > { %v1832_v26 = vpop.f32.mrf.mxu1 }
 0x605   : > { %v1903_v27 = vadd.f32 %v1902_v23, %v1832_v26  ;;  %v3611_v23 = vld [vmem:[%s6181_s7 + $0xd8] sm:$0xff]  ;;  %v3609_v26 = vld [vmem:[%s6181_s7 + $0xc8] sm:$0xff] }
 0x606   : > { %v4317_v28 = vpop.f32.mrf.mxu1 }
 0x607   : > { %v3607_v28 = vld [vmem:[%s6181_s7 + $0xb8] sm:$0xff] }
 0x608   : > { %v1974_v29 = vpop.f32.mrf.mxu1 }
 0x609   : > { %4393 = vmatmul.mubr.f32.vlgmr.msra.gmra.mxu1 %v1974_v29  ;;  %v3606_v29 = vld [vmem:[%s6181_s7 + $0xb0] sm:$0xff] }
 0x60a   : > { %v4359_v30 = vpop.f32.mrf.mxu1  ;;  %4467 = vmatprep.mubr.msk.f32.mxu1 %vm4838_vm15, %v4837_v12  ;;  %4436 = vmatpush3.msra.mxu1 %v2191_v31  ;;  %v3604_v31 = vld [vmem:[%s6181_s7 + $0xa0] sm:$0xff] }
 0x60b   : > { %4437 = vmatprep.subr.mxu1 %v4837_v12  ;;  %v3605_v30 = vld [vmem:[%s6181_s7 + $0xa8] sm:$0xff] }
 0x60c   : > { %4438 = vmatpush3.msra.mxu1 %v2190_v32  ;;  %v3603_v32 = vld [vmem:[%s6181_s7 + $0x98] sm:$0xff] }
 0x60d   : > { %4439 = vmatprep.subr.mxu1 %v4837_v12 }
 0x60e   : > { %4440 = vmatpush3.msra.mxu1 %v2189_v34  ;;  %v3602_v34 = vld [vmem:[%s6181_s7 + $0x90] sm:$0xff] }
 0x60f   : > { %4441 = vmatprep.subr.mxu1 %v4837_v12 }
 0x610   : > { %4442 = vmatpush3.msra.mxu1 %v2188_v35  ;;  %v3601_v35 = vld [vmem:[%s6181_s7 + $0x88] sm:$0xff] }
 0x611   : > { %4443 = vmatprep.subr.mxu1 %v4837_v12 }
 0x612   : > { %4444 = vmatpush3.msra.mxu1 %v2187_v37  ;;  %v3600_v37 = vld [vmem:[%s6181_s7 + $0x80] sm:$0xff] }
 0x613   : > { %4445 = vmatprep.subr.mxu1 %v4837_v12 }
 0x614   : > { %4446 = vmatpush3.msra.mxu1 %v2186_v38  ;;  %v2176_v38 = vld [vmem:[%s6181_s7] sm:$0xff] }
 0x615   : > { %4447 = vmatprep.subr.mxu1 %v4837_v12 }
 0x616   : > { %4448 = vmatpush3.msra.mxu1 %v2185_v39  ;;  %v3632_v39 = vld [vmem:[%s6181_s7 + $0x178] sm:$0xff] }
 0x617   : > { %4449 = vmatprep.subr.mxu1 %v4837_v12 }
 0x618   : > { %4450 = vmatpush3.msra.mxu1 %v2184_v40  ;;  %v3631_v40 = vld [vmem:[%s6181_s7 + $0x170] sm:$0xff] }
 0x619   : > { %4451 = vmatprep.subr.mxu1 %v4837_v12 }
 0x61a   : > { %4452 = vmatpush3.msra.mxu1 %v2183_v33  ;;  %v3629_v33 = vld [vmem:[%s6181_s7 + $0x160] sm:$0xff] }
 0x61b   : > { %4453 = vmatprep.subr.mxu1 %v4837_v12 }
 0x61c   : > { %4454 = vmatpush3.msra.mxu1 %v2182_v4  ;;  %v3628_v4 = vld [vmem:[%s6181_s7 + $0x158] sm:$0xff] }
 0x61d   : > { %4455 = vmatprep.subr.mxu1 %v4837_v12 }
 0x61e   : > { %4456 = vmatpush3.msra.mxu1 %v2181_v36  ;;  %v3627_v36 = vld [vmem:[%s6181_s7 + $0x150] sm:$0xff] }
 0x61f   : > { %4457 = vmatprep.subr.mxu1 %v4837_v12 }
 0x620   : > { %4458 = vmatpush3.msra.mxu1 %v2180_v2  ;;  %v3626_v2 = vld [vmem:[%s6181_s7 + $0x148] sm:$0xff] }
 0x621   : > { %4459 = vmatprep.subr.mxu1 %v4837_v12 }
 0x622   : > { %4460 = vmatpush3.msra.mxu1 %v2179_v41  ;;  %v3625_v41 = vld [vmem:[%s6181_s7 + $0x140] sm:$0xff] }
 0x623   : > { %4461 = vmatprep.subr.mxu1 %v4837_v12 }
 0x624   : > { %4462 = vmatpush3.msra.mxu1 %v2178_v43  ;;  %v3624_v43 = vld [vmem:[%s6181_s7 + $0x138] sm:$0xff] }
 0x625   : > { %4463 = vmatprep.subr.mxu1 %v4837_v12 }
 0x626   : > { %4464 = vmatpush3.msra.mxu1 %v2177_v42  ;;  %v3623_v42 = vld [vmem:[%s6181_s7 + $0x130] sm:$0xff] }
 0x627   : > { %4465 = vmatprep.subr.mxu1 %v4837_v12 }
 0x628   : > { %4466 = vmatpush3.msra.mxu1 %v2176_v38 }
 0x629   : > { %4510 = vmatprep.subr.mxu1 %v4837_v12 }
 0x6c9   : > { %v2061_v44 = vpop.f32.mrf.mxu1 }
 0x6ca   : > { %v2065_v46 = vadd.f32 %v2061_v44, %v1903_v27  ;;  %v3608_v27 = vld [vmem:[%s6181_s7 + $0xc0] sm:$0xff]  ;;  %v3622_v44 = vld [vmem:[%s6181_s7 + $0x128] sm:$0xff] }
 0x6cb   : > { %v4394_v48 = vpop.f32.mrf.mxu1 }
 0x6cc   : > { %v2073_v49 = vadd.f32 %v3596_v45, %v2065_v46  ;;  %v3621_v45 = vld [vmem:[%s6181_s7 + $0x120] sm:$0xff]  ;;  %v3620_v46 = vld [vmem:[%s6181_s7 + $0x118] sm:$0xff]  ;;  %v3619_v48 = vld [vmem:[%s6181_s7 + $0x110] sm:$0xff] }
 0x6ce   : > { %v2074_v50 = vand.u32 2147483647, %v2073_v49  ;;  %vm2097_vm2 = vcmp.lt.f32.partialorder %v2073_v49, 0.0  ;;  %v2100_v17 = vmul.f32 0.5, %v2073_v49  ;;  %v3618_v49 = vld [vmem:[%s6181_s7 + $0x108] sm:$0xff] }
 0x6d0   : > { %v2075_v51 = vmul.f32 0.70710677, %v2074_v50  ;;  %v3617_v50 = vld [vmem:[%s6181_s7 + $0x100] sm:$0xff] }
 0x6d2   : > { %v2076_v52 = vmul.f32 0.3275911, %v2075_v51  ;;  %v2091_v54 = vsub.f32 0.0, %v2075_v51 }
 0x6d4   : > { %v2077_v53 = vadd.f32 1.0, %v2076_v52  ;;  %v2092_v58 = vmul.f32 %v2091_v54, %v2075_v51 }
 0x6d6   : > { %4763 = vrcp.f32 %v2077_v53  ;;  %v2093_v61 = vmul.f32 1.442695, %v2092_v58  ;;  %v2632_v58 = vld [vmem:[%s6183_s9 + $0x70] sm:$0xff] }
 0x6d8   : > { %4765 = vpow2.f32 %v2093_v61  ;;  %v2629_v61 = vld [vmem:[%s6183_s9 + $0x58] sm:$0xff] }
 0x6e3   : > { %v4764_v55 = vpop.eup %4763 }
 0x6e4   : > { %v2079_v56 = vmul.f32 %v4764_v55, %v2077_v53 }
 0x6e5   : > { %v4766_v9 = vpop.eup %4765 }
 0x6e6   : > { %v2080_v57 = vsub.f32 2.0, %v2079_v56 }
 0x6e8   : > { %v2081_v59 = vmul.f32 %v4764_v55, %v2080_v57  ;;  %v2633_v57 = vld [vmem:[%s6183_s9 + $0x78] sm:$0xff] }
 0x6ea   : > { %v2082_v60 = vmul.f32 1.0614054, %v2081_v59 }
 0x6ec   : > { %v3597_v62 = vadd.f32 -1.4531521, %v2082_v60  ;;  %v2630_v60 = vld [vmem:[%s6183_s9 + $0x60] sm:$0xff] }
 0x6ee   : > { %v2084_v63 = vmul.f32 %v3597_v62, %v2081_v59  ;;  %v2628_v62 = vld [vmem:[%s6183_s9 + $0x50] sm:$0xff] }
 0x6f0   : > { %v2085_v0 = vadd.f32 1.4214138, %v2084_v63  ;;  %v2627_v63 = vld [vmem:[%s6183_s9 + $0x48] sm:$0xff] }
 0x6f2   : > { %v2086_v3 = vmul.f32 %v2085_v0, %v2081_v59  ;;  %v2626_v0 = vld [vmem:[%s6183_s9 + $0x40] sm:$0xff] }
 0x6f4   : > { %v3598_v5 = vadd.f32 -0.28449672, %v2086_v3  ;;  %v2625_v3 = vld [vmem:[%s6183_s9 + $0x38] sm:$0xff] }
 0x6f6   : > { %v2088_v6 = vmul.f32 %v3598_v5, %v2081_v59  ;;  %v2624_v5 = vld [vmem:[%s6183_s9 + $0x30] sm:$0xff] }
 0x6f8   : > { %v2089_v7 = vadd.f32 0.2548296, %v2088_v6  ;;  %v2623_v6 = vld [vmem:[%s6183_s9 + $0x28] sm:$0xff] }
 0x6fa   : > { %v2090_v8 = vmul.f32 %v2089_v7, %v2081_v59  ;;  %v2631_v59 = vld [vmem:[%s6183_s9 + $0x68] sm:$0xff]  ;;  %v2622_v7 = vld [vmem:[%s6183_s9 + $0x20] sm:$0xff] }
 0x6fc   : > { %v2095_v10 = vmul.f32 %v4766_v9, %v2090_v8  ;;  %v2621_v8 = vld [vmem:[%s6183_s9 + $0x18] sm:$0xff] }
 0x6fe   : > { %v2096_v11 = vsub.f32 1.0, %v2095_v10  ;;  %v2620_v10 = vld [vmem:[%s6183_s9 + $0x10] sm:$0xff] }
 0x700   : > { %v2098_v15 = vsub.f32 0.0, %v2096_v11 }
 0x702   : > { %v2099_v16 = vsel %vm2097_vm2, %v2098_v15, %v2096_v11  ;;  %v2619_v15 = vld [vmem:[%s6183_s9 + $0x8] sm:$0xff] }
 0x703   : > { %v2101_v18 = vadd.f32 1.0, %v2099_v16 }
 0x705   : > { %v2102_v19 = vmul.f32 %v2101_v18, %v2100_v17  ;;  %v3633_v18 = vld [vmem:[%s6182_s8] ss:$0 sm:$0xff] }
 0x707   : > { %4396 = vmatpush3.msra.mxu0 %v2102_v19 }
 0x708   : > { %4398 = vmatmul.mubr.msk.f32.vlgmr.msra.gmra.mxu0 %vm2103_vm3, %v5208_v24  ;;  %4400 = vmatprep.subr.mxu0 %v4837_v12  ;;  %v3612_v24 = vld [vmem:[%s6181_s7 + $0xe0] sm:$0xff] }
 0x709   : > { %4401 = vmatpush3.msra.mxu0 %v3615_v20  ;;  %4432 = vmatprep.mubr.msk.f32.mxu0 %vm4838_vm15, %v4837_v12 }
 0x70a   : > { %4402 = vmatprep.subr.mxu0 %v4837_v12 }
 0x70b   : > { %4403 = vmatpush3.msra.mxu0 %v3614_v21 }
 0x70c   : > { %4404 = vmatprep.subr.mxu0 %v4837_v12 }
 0x70d   : > { %4405 = vmatpush3.msra.mxu0 %v3613_v22 }
 0x70e   : > { %4406 = vmatprep.subr.mxu0 %v4837_v12 }
 0x70f   : > { %4407 = vmatpush3.msra.mxu0 %v3612_v24 }
 0x710   : > { %4408 = vmatprep.subr.mxu0 %v4837_v12 }
 0x711   : > { %4409 = vmatpush3.msra.mxu0 %v3611_v23 }
 0x712   : > { %4410 = vmatprep.subr.mxu0 %v4837_v12 }
 0x713   : > { %4411 = vmatpush3.msra.mxu0 %v3610_v25 }
 0x714   : > { %4412 = vmatprep.subr.mxu0 %v4837_v12 }
 0x715   : > { %4413 = vmatpush3.msra.mxu0 %v3609_v26 }
 0x716   : > { %4414 = vmatprep.subr.mxu0 %v4837_v12 }
 0x717   : > { %4415 = vmatpush3.msra.mxu0 %v3608_v27 }
 0x718   : > { %4416 = vmatprep.subr.mxu0 %v4837_v12 }
 0x719   : > { %4417 = vmatpush3.msra.mxu0 %v3607_v28 }
 0x71a   : > { %4418 = vmatprep.subr.mxu0 %v4837_v12 }
 0x71b   : > { %4419 = vmatpush3.msra.mxu0 %v3606_v29 }
 0x71c   : > { %4420 = vmatprep.subr.mxu0 %v4837_v12 }
 0x71d   : > { %4421 = vmatpush3.msra.mxu0 %v3605_v30 }
 0x71e   : > { %4422 = vmatprep.subr.mxu0 %v4837_v12 }
 0x71f   : > { %4423 = vmatpush3.msra.mxu0 %v3604_v31 }
 0x720   : > { %4424 = vmatprep.subr.mxu0 %v4837_v12 }
 0x721   : > { %4425 = vmatpush3.msra.mxu0 %v3603_v32 }
 0x722   : > { %4426 = vmatprep.subr.mxu0 %v4837_v12 }
 0x723   : > { %4427 = vmatpush3.msra.mxu0 %v3602_v34 }
 0x724   : > { %4428 = vmatprep.subr.mxu0 %v4837_v12 }
 0x725   : > { %4429 = vmatpush3.msra.mxu0 %v3601_v35 }
 0x726   : > { %4430 = vmatprep.subr.mxu0 %v4837_v12 }
 0x727   : > { %4431 = vmatpush3.msra.mxu0 %v3600_v37 }
 0x728   : > { %4433 = vmatmul.mubr.f32.vlgmr.msra.gmra.mxu0 %v2102_v19  ;;  %4470 = vmatprep.subr.mxu0 %v4837_v12 }
 0x729   : > { %4471 = vmatpush3.msra.mxu0 %v2102_v19  ;;  %4472 = vmatprep.mubr.msk.f32.mxu0 %vm4838_vm15, %v4837_v12 }
 0x72a   : > { %4475 = vmatprep.subr.mxu0 %v4837_v12 }
 0x72c   : > { %4473 = vmatmul.mubr.msk.f32.vlgmr.msra.gmra.mxu0 %vm2103_vm3, %v5224_v1  ;;  %v3630_v1 = vld [vmem:[%s6181_s7 + $0x168] sm:$0xff] }
 0x72d   : > { %4507 = vmatprep.mubr.msk.f32.mxu0 %vm4838_vm15, %v4837_v12  ;;  %4476 = vmatpush3.msra.mxu0 %v3632_v39 }
 0x72e   : > { %4477 = vmatprep.subr.mxu0 %v4837_v12 }
 0x72f   : > { %4478 = vmatpush3.msra.mxu0 %v3631_v40 }
 0x730   : > { %4479 = vmatprep.subr.mxu0 %v4837_v12 }
 0x731   : > { %4480 = vmatpush3.msra.mxu0 %v3630_v1 }
 0x732   : > { %4481 = vmatprep.subr.mxu0 %v4837_v12 }
 0x733   : > { %4482 = vmatpush3.msra.mxu0 %v3629_v33 }
 0x734   : > { %4483 = vmatprep.subr.mxu0 %v4837_v12 }
 0x735   : > { %4484 = vmatpush3.msra.mxu0 %v3628_v4 }
 0x736   : > { %4485 = vmatprep.subr.mxu0 %v4837_v12 }
 0x737   : > { %4486 = vmatpush3.msra.mxu0 %v3627_v36 }
 0x738   : > { %4487 = vmatprep.subr.mxu0 %v4837_v12 }
 0x739   : > { %4488 = vmatpush3.msra.mxu0 %v3626_v2 }
 0x73a   : > { %4489 = vmatprep.subr.mxu0 %v4837_v12 }
 0x73b   : > { %4490 = vmatpush3.msra.mxu0 %v3625_v41 }
 0x73c   : > { %4491 = vmatprep.subr.mxu0 %v4837_v12 }
 0x73d   : > { %4492 = vmatpush3.msra.mxu0 %v3624_v43 }
 0x73e   : > { %4493 = vmatprep.subr.mxu0 %v4837_v12 }
 0x73f   : > { %4494 = vmatpush3.msra.mxu0 %v3623_v42 }
 0x740   : > { %4495 = vmatprep.subr.mxu0 %v4837_v12 }
 0x741   : > { %4496 = vmatpush3.msra.mxu0 %v3622_v44 }
 0x742   : > { %4497 = vmatprep.subr.mxu0 %v4837_v12 }
 0x743   : > { %4498 = vmatpush3.msra.mxu0 %v3621_v45 }
 0x744   : > { %4499 = vmatprep.subr.mxu0 %v4837_v12 }
 0x745   : > { %4500 = vmatpush3.msra.mxu0 %v3620_v46 }
 0x746   : > { %4501 = vmatprep.subr.mxu0 %v4837_v12 }
 0x747   : > { %4502 = vmatpush3.msra.mxu0 %v3619_v48  ;;  %v3653_v48 = vld [vmem:[%s6183_s9 + $0xf8] sm:$0xff] }
 0x748   : > { %4503 = vmatprep.subr.mxu0 %v4837_v12 }
 0x749   : > { %4504 = vmatpush3.msra.mxu0 %v3618_v49  ;;  %v3651_v49 = vld [vmem:[%s6183_s9 + $0xe8] sm:$0xff] }
 0x74a   : > { %4505 = vmatprep.subr.mxu0 %v4837_v12 }
 0x74b   : > { %4506 = vmatpush3.msra.mxu0 %v3617_v50  ;;  %v3649_v50 = vld [vmem:[%s6183_s9 + $0xd8] sm:$0xff] }
 0x74c   : > { %4555 = vmatprep.subr.mxu0 %v4837_v12 }
 0x7c8   : > { %v2172_v51 = vpop.f32.mrf.mxu0 }
 0x7c9   : > { %4468 = vmatmul.mubr.f32.vlgmr.msra.gmra.mxu1 %v2172_v51  ;;  %v3648_v51 = vld [vmem:[%s6183_s9 + $0xd0] sm:$0xff] }
 0x7ca   : > { %v4399_v52 = vpop.f32.mrf.mxu0  ;;  %4512 = vmatprep.mubr.msk.f32.mxu1 %vm4838_vm15, %v4837_v12 }
 0x7cb   : > { %v3647_v52 = vld [vmem:[%s6183_s9 + $0xc8] sm:$0xff] }
 0x7e8   : > { %v2275_v53 = vpop.f32.mrf.mxu0 }
 0x7ea   : > { %v4434_v54 = vpop.f32.mrf.mxu0 }
 0x7eb   : > { %v3645_v54 = vld [vmem:[%s6183_s9 + $0xb8] sm:$0xff] }
 0x7ec   : > { %v2417_v55 = vpop.f32.mrf.mxu0 }
 0x7ed   : > { %4508 = vmatmul.mubr.f32.vlgmr.msra.gmra.mxu0 %v2417_v55  ;;  %v3644_v55 = vld [vmem:[%s6183_s9 + $0xb0] sm:$0xff] }
 0x7ee   : > { %v4474_v56 = vpop.f32.mrf.mxu0  ;;  %4587 = vmatprep.mubr.msk.f32.mxu0 %vm4838_vm15, %v4837_v12  ;;  %4556 = vmatpush3.msra.mxu0 %v2633_v57  ;;  %v3642_v57 = vld [vmem:[%s6183_s9 + $0xa0] sm:$0xff] }
 0x7ef   : > { %4557 = vmatprep.subr.mxu0 %v4837_v12  ;;  %v3643_v56 = vld [vmem:[%s6183_s9 + $0xa8] sm:$0xff] }
 0x7f0   : > { %4558 = vmatpush3.msra.mxu0 %v2632_v58  ;;  %v3641_v58 = vld [vmem:[%s6183_s9 + $0x98] sm:$0xff] }
 0x7f1   : > { %4559 = vmatprep.subr.mxu0 %v4837_v12 }
 0x7f2   : > { %4560 = vmatpush3.msra.mxu0 %v2631_v59  ;;  %v3640_v59 = vld [vmem:[%s6183_s9 + $0x90] sm:$0xff] }
 0x7f3   : > { %4561 = vmatprep.subr.mxu0 %v4837_v12 }
 0x7f4   : > { %4562 = vmatpush3.msra.mxu0 %v2630_v60  ;;  %v3639_v60 = vld [vmem:[%s6183_s9 + $0x88] sm:$0xff] }
 0x7f5   : > { %4563 = vmatprep.subr.mxu0 %v4837_v12 }
 0x7f6   : > { %4564 = vmatpush3.msra.mxu0 %v2629_v61  ;;  %v2618_v61 = vld [vmem:[%s6183_s9] sm:$0xff] }
 0x7f7   : > { %4565 = vmatprep.subr.mxu0 %v4837_v12 }
 0x7f8   : > { %4566 = vmatpush3.msra.mxu0 %v2628_v62  ;;  %v3638_v62 = vld [vmem:[%s6183_s9 + $0x80] sm:$0xff] }
 0x7f9   : > { %4567 = vmatprep.subr.mxu0 %v4837_v12 }
 0x7fa   : > { %4568 = vmatpush3.msra.mxu0 %v2627_v63 }
 0x7fb   : > { %4569 = vmatprep.subr.mxu0 %v4837_v12 }
 0x7fc   : > { %4570 = vmatpush3.msra.mxu0 %v2626_v0 }
 0x7fd   : > { %4571 = vmatprep.subr.mxu0 %v4837_v12 }
 0x7fe   : > { %4572 = vmatpush3.msra.mxu0 %v2625_v3 }
 0x7ff   : > { %4573 = vmatprep.subr.mxu0 %v4837_v12 }
 0x800   : > { %4574 = vmatpush3.msra.mxu0 %v2624_v5 }
 0x801   : > { %4575 = vmatprep.subr.mxu0 %v4837_v12 }
 0x802   : > { %4576 = vmatpush3.msra.mxu0 %v2623_v6  ;;  %v3670_v6 = vld [vmem:[%s6183_s9 + $0x178] sm:$0xff] }
 0x803   : > { %4577 = vmatprep.subr.mxu0 %v4837_v12 }
 0x804   : > { %4578 = vmatpush3.msra.mxu0 %v2622_v7  ;;  %v3669_v7 = vld [vmem:[%s6183_s9 + $0x170] sm:$0xff] }
 0x805   : > { %4579 = vmatprep.subr.mxu0 %v4837_v12 }
 0x806   : > { %4580 = vmatpush3.msra.mxu0 %v2621_v8  ;;  %v3668_v8 = vld [vmem:[%s6183_s9 + $0x168] sm:$0xff] }
 0x807   : > { %4581 = vmatprep.subr.mxu0 %v4837_v12 }
 0x808   : > { %4582 = vmatpush3.msra.mxu0 %v2620_v10  ;;  %v3665_v10 = vld [vmem:[%s6183_s9 + $0x150] sm:$0xff] }
 0x809   : > { %4583 = vmatprep.subr.mxu0 %v4837_v12 }
 0x80a   : > { %4584 = vmatpush3.msra.mxu0 %v2619_v15  ;;  %v3663_v15 = vld [vmem:[%s6183_s9 + $0x140] sm:$0xff] }
 0x80b   : > { %4585 = vmatprep.subr.mxu0 %v4837_v12 }
 0x80c   : > { %4586 = vmatpush3.msra.mxu0 %v2618_v61 }
 0x80d   : > { %4630 = vmatprep.subr.mxu0 %v4837_v12 }
 0x889   : > { %v2345_v9 = vpop.f32.mrf.mxu1 }
 0x88a   : > { %v2346_v16 = vadd.f32 %v2345_v9, %v2275_v53  ;;  %v3646_v53 = vld [vmem:[%s6183_s9 + $0xc0] sm:$0xff]  ;;  %v3666_v9 = vld [vmem:[%s6183_s9 + $0x158] sm:$0xff] }
 0x88b   : > { %v4469_v11 = vpop.f32.mrf.mxu1 }
 0x88c   : > { %v3664_v11 = vld [vmem:[%s6183_s9 + $0x148] sm:$0xff] }
 0x8ad   : > { %v2504_v17 = vpop.f32.mrf.mxu0 }
 0x8ae   : > { %v2508_v19 = vadd.f32 %v2504_v17, %v2346_v16  ;;  %v3662_v16 = vld [vmem:[%s6183_s9 + $0x138] sm:$0xff]  ;;  %v3661_v17 = vld [vmem:[%s6183_s9 + $0x130] sm:$0xff] }
 0x8af   : > { %v4509_v20 = vpop.f32.mrf.mxu0 }
 0x8b0   : > { %v2516_v21 = vadd.f32 %v3633_v18, %v2508_v19  ;;  %v3660_v18 = vld [vmem:[%s6183_s9 + $0x128] sm:$0xff]  ;;  %v3659_v19 = vld [vmem:[%s6183_s9 + $0x120] sm:$0xff]  ;;  %v3658_v20 = vld [vmem:[%s6183_s9 + $0x118] sm:$0xff] }
 0x8b2   : > { %v2517_v22 = vand.u32 2147483647, %v2516_v21  ;;  %vm2540_vm4 = vcmp.lt.f32.partialorder %v2516_v21, 0.0  ;;  %v2543_v44 = vmul.f32 0.5, %v2516_v21  ;;  %v3657_v21 = vld [vmem:[%s6183_s9 + $0x110] sm:$0xff] }
 0x8b4   : > { %v2518_v24 = vmul.f32 0.70710677, %v2517_v22  ;;  %v3656_v22 = vld [vmem:[%s6183_s9 + $0x108] sm:$0xff] }
 0x8b6   : > { %v2519_v23 = vmul.f32 0.3275911, %v2518_v24  ;;  %v2534_v26 = vsub.f32 0.0, %v2518_v24 }
 0x8b8   : > { %v2520_v25 = vadd.f32 1.0, %v2519_v23  ;;  %v2535_v30 = vmul.f32 %v2534_v26, %v2518_v24  ;;  %v3655_v24 = vld [vmem:[%s6183_s9 + $0x100] sm:$0xff] }
 0x8ba   : > { %4767 = vrcp.f32 %v2520_v25  ;;  %v2536_v34 = vmul.f32 1.442695, %v2535_v30 }
 0x8bc   : > { %4769 = vpow2.f32 %v2536_v34  ;;  %v3691_v34 = vld [vmem:[%s6185_s11 + $0xb8] sm:$0xff] }
 0x8c7   : > { %v4768_v27 = vpop.eup %4767 }
 0x8c8   : > { %v2522_v28 = vmul.f32 %v4768_v27, %v2520_v25 }
 0x8c9   : > { %v4770_v36 = vpop.eup %4769 }
 0x8ca   : > { %v2523_v29 = vsub.f32 2.0, %v2522_v28 }
 0x8cc   : > { %v2524_v31 = vmul.f32 %v4768_v27, %v2523_v29 }
 0x8ce   : > { %v2525_v32 = vmul.f32 1.0614054, %v2524_v31 }
 0x8d0   : > { %v3634_v35 = vadd.f32 -1.4531521, %v2525_v32  ;;  %v3067_v32 = vld [vmem:[%s6185_s11 + $0x30] sm:$0xff] }
 0x8d2   : > { %v2527_v37 = vmul.f32 %v3634_v35, %v2524_v31  ;;  %v3066_v35 = vld [vmem:[%s6185_s11 + $0x28] sm:$0xff] }
 0x8d4   : > { %v2528_v38 = vadd.f32 1.4214138, %v2527_v37  ;;  %v3690_v37 = vld [vmem:[%s6185_s11 + $0xb0] sm:$0xff] }
 0x8d6   : > { %v2529_v39 = vmul.f32 %v2528_v38, %v2524_v31  ;;  %v3065_v38 = vld [vmem:[%s6185_s11 + $0x20] sm:$0xff] }
 0x8d8   : > { %v3635_v40 = vadd.f32 -0.28449672, %v2529_v39  ;;  %v3689_v39 = vld [vmem:[%s6185_s11 + $0xa8] sm:$0xff] }
 0x8da   : > { %v2531_v1 = vmul.f32 %v3635_v40, %v2524_v31  ;;  %v3064_v40 = vld [vmem:[%s6185_s11 + $0x18] sm:$0xff] }
 0x8dc   : > { %v2532_v33 = vadd.f32 0.2548296, %v2531_v1  ;;  %v3688_v1 = vld [vmem:[%s6185_s11 + $0xa0] sm:$0xff] }
 0x8de   : > { %v2533_v4 = vmul.f32 %v2532_v33, %v2524_v31  ;;  %v3068_v31 = vld [vmem:[%s6185_s11 + $0x38] sm:$0xff]  ;;  %v3063_v33 = vld [vmem:[%s6185_s11 + $0x10] sm:$0xff] }
 0x8e0   : > { %v2538_v2 = vmul.f32 %v4770_v36, %v2533_v4  ;;  %v3687_v4 = vld [vmem:[%s6185_s11 + $0x98] sm:$0xff]  ;;  %v3062_v36 = vld [vmem:[%s6185_s11 + $0x8] sm:$0xff] }
 0x8e2   : > { %v2539_v41 = vsub.f32 1.0, %v2538_v2  ;;  %v3686_v2 = vld [vmem:[%s6185_s11 + $0x90] sm:$0xff] }
 0x8e4   : > { %v2541_v43 = vsub.f32 0.0, %v2539_v41 }
 0x8e6   : > { %v2542_v42 = vsel %vm2540_vm4, %v2541_v43, %v2539_v41  ;;  %v3061_v41 = vld [vmem:[%s6185_s11] sm:$0xff]  ;;  %v3685_v43 = vld [vmem:[%s6185_s11 + $0x88] sm:$0xff] }
 0x8e7   : > { %v2544_v45 = vadd.f32 1.0, %v2542_v42  ;;  %v3684_v42 = vld [vmem:[%s6185_s11 + $0x80] sm:$0xff] }
 0x8e9   : > { %v5836_v46 = vmul.f32 %v2544_v45, %v2543_v44  ;;  %v3671_v45 = vld [vmem:[%s6184_s10] ss:$0 sm:$0xff] }
 0x8eb   : > { %4511 = vmatpush3.msra.mxu1 %v5836_v46 }
 0x8ec   : > { %4513 = vmatmul.mubr.msk.f32.vlgmr.msra.gmra.mxu1 %vm2103_vm3, %v5003_v13  ;;  %4515 = vmatprep.subr.mxu1 %v4837_v12  ;;  %v3652_v13 = vld [vmem:[%s6183_s9 + $0xf0] sm:$0xff] }
 0x8ed   : > { %4516 = vmatpush3.msra.mxu1 %v5836_v46  ;;  %4517 = vmatprep.mubr.msk.f32.mxu1 %vm4838_vm15, %v4837_v12 }
 0x8ee   : > { %4520 = vmatprep.subr.mxu1 %v4837_v12 }
 0x8f0   : > { %4518 = vmatmul.mubr.msk.f32.vlgmr.msra.gmra.mxu1 %vm2103_vm3, %v5008_v14  ;;  %v3650_v14 = vld [vmem:[%s6183_s9 + $0xe0] sm:$0xff] }
 0x8f1   : > { %4521 = vmatpush3.msra.mxu1 %v3653_v48  ;;  %4552 = vmatprep.mubr.msk.f32.mxu1 %vm4838_vm15, %v4837_v12 }
 0x8f2   : > { %4522 = vmatprep.subr.mxu1 %v4837_v12 }
 0x8f3   : > { %4523 = vmatpush3.msra.mxu1 %v3652_v13 }
 0x8f4   : > { %4524 = vmatprep.subr.mxu1 %v4837_v12 }
 0x8f5   : > { %4525 = vmatpush3.msra.mxu1 %v3651_v49 }
 0x8f6   : > { %4526 = vmatprep.subr.mxu1 %v4837_v12 }
 0x8f7   : > { %4527 = vmatpush3.msra.mxu1 %v3650_v14 }
 0x8f8   : > { %4528 = vmatprep.subr.mxu1 %v4837_v12 }
 0x8f9   : > { %4529 = vmatpush3.msra.mxu1 %v3649_v50 }
 0x8fa   : > { %4530 = vmatprep.subr.mxu1 %v4837_v12 }
 0x8fb   : > { %4531 = vmatpush3.msra.mxu1 %v3648_v51 }
 0x8fc   : > { %4532 = vmatprep.subr.mxu1 %v4837_v12 }
 0x8fd   : > { %4533 = vmatpush3.msra.mxu1 %v3647_v52 }
 0x8fe   : > { %4534 = vmatprep.subr.mxu1 %v4837_v12 }
 0x8ff   : > { %4535 = vmatpush3.msra.mxu1 %v3646_v53 }
 0x900   : > { %4536 = vmatprep.subr.mxu1 %v4837_v12 }
 0x901   : > { %4537 = vmatpush3.msra.mxu1 %v3645_v54 }
 0x902   : > { %4538 = vmatprep.subr.mxu1 %v4837_v12 }
 0x903   : > { %4539 = vmatpush3.msra.mxu1 %v3644_v55 }
 0x904   : > { %4540 = vmatprep.subr.mxu1 %v4837_v12 }
 0x905   : > { %4541 = vmatpush3.msra.mxu1 %v3643_v56 }
 0x906   : > { %4542 = vmatprep.subr.mxu1 %v4837_v12 }
 0x907   : > { %4543 = vmatpush3.msra.mxu1 %v3642_v57 }
 0x908   : > { %4544 = vmatprep.subr.mxu1 %v4837_v12 }
 0x909   : > { %4545 = vmatpush3.msra.mxu1 %v3641_v58 }
 0x90a   : > { %4546 = vmatprep.subr.mxu1 %v4837_v12 }
 0x90b   : > { %4547 = vmatpush3.msra.mxu1 %v3640_v59 }
 0x90c   : > { %4548 = vmatprep.subr.mxu1 %v4837_v12 }
 0x90d   : > { %4549 = vmatpush3.msra.mxu1 %v3639_v60 }
 0x90e   : > { %4550 = vmatprep.subr.mxu1 %v4837_v12 }
 0x90f   : > { %4551 = vmatpush3.msra.mxu1 %v3638_v62 }
 0x910   : > { %4590 = vmatprep.subr.mxu1 %v4837_v12 }
 0x9ac   : > { %v2614_v63 = vpop.f32.mrf.mxu1 }
 0x9ad   : > { %4588 = vmatmul.mubr.f32.vlgmr.msra.gmra.mxu0 %v2614_v63 }
 0x9ae   : > { %v4514_v0 = vpop.f32.mrf.mxu1  ;;  %4646 = vmatprep.mubr.msk.f32.mxu0 %vm4838_vm15, %v4837_v12  ;;  %4631 = vmatpush3.msra.mxu0 %v3068_v31  ;;  %v3696_v31 = vld [vmem:[%s6185_s11 + $0xd8] sm:$0xff] }
 0x9af   : > { %4632 = vmatprep.subr.mxu0 %v4837_v12 }
 0x9b0   : > { %v2702_v3 = vpop.f32.mrf.mxu1  ;;  %4633 = vmatpush3.msra.mxu0 %v3067_v32  ;;  %v3695_v32 = vld [vmem:[%s6185_s11 + $0xd0] sm:$0xff] }
 0x9b1   : > { %4553 = vmatmul.mubr.f32.vlgmr.msra.gmra.mxu1 %v2702_v3  ;;  %4634 = vmatprep.subr.mxu0 %v4837_v12 }
 0x9b2   : > { %4591 = vmatpush3.msra.mxu1 %v5836_v46  ;;  %v4519_v5 = vpop.f32.mrf.mxu1  ;;  %4592 = vmatprep.mubr.msk.f32.mxu1 %vm4838_vm15, %v4837_v12 }
 0x9b3   : > { %4595 = vmatprep.subr.mxu1 %v4837_v12  ;;  %4635 = vmatpush3.msra.mxu0 %v3066_v35  ;;  %v3693_v35 = vld [vmem:[%s6185_s11 + $0xc0] sm:$0xff] }
 0x9b4   : > { %4636 = vmatprep.subr.mxu0 %v4837_v12 }
 0x9b5   : > { %4593 = vmatmul.mubr.msk.f32.vlgmr.msra.gmra.mxu1 %vm2103_vm3, %v5101_v47  ;;  %v3667_v47 = vld [vmem:[%s6183_s9 + $0x160] sm:$0xff]  ;;  %4637 = vmatpush3.msra.mxu0 %v3065_v38 }
 0x9b6   : > { %4596 = vmatpush3.msra.mxu1 %v3670_v6  ;;  %4627 = vmatprep.mubr.msk.f32.mxu1 %vm4838_vm15, %v4837_v12 }
 0x9b7   : > { %4597 = vmatprep.subr.mxu1 %v4837_v12  ;;  %4638 = vmatprep.subr.mxu0 %v4837_v12 }
 0x9b8   : > { %4598 = vmatpush3.msra.mxu1 %v3669_v7  ;;  %4639 = vmatpush3.msra.mxu0 %v3064_v40 }
 0x9b9   : > { %4599 = vmatprep.subr.mxu1 %v4837_v12  ;;  %4640 = vmatprep.subr.mxu0 %v4837_v12 }
 0x9ba   : > { %4600 = vmatpush3.msra.mxu1 %v3668_v8  ;;  %4641 = vmatpush3.msra.mxu0 %v3063_v33 }
 0x9bb   : > { %4601 = vmatprep.subr.mxu1 %v4837_v12  ;;  %4642 = vmatprep.subr.mxu0 %v4837_v12 }
 0x9bc   : > { %4602 = vmatpush3.msra.mxu1 %v3667_v47  ;;  %4643 = vmatpush3.msra.mxu0 %v3062_v36  ;;  %v3060_v36 = vld [vmem:[%s6186_s12] sm:$0x1] }
 0x9bd   : > { %4603 = vmatprep.subr.mxu1 %v4837_v12  ;;  %4644 = vmatprep.subr.mxu0 %v4837_v12 }
 0x9be   : > { %4604 = vmatpush3.msra.mxu1 %v3666_v9  ;;  %4645 = vmatpush3.msra.mxu0 %v3061_v41 }
 0x9bf   : > { %4605 = vmatprep.subr.mxu1 %v4837_v12  ;;  %4649 = vmatprep.subr.mxu0 %v4837_v12 }
 0x9c0   : > { %4606 = vmatpush3.msra.mxu1 %v3665_v10 }
 0x9c1   : > { %4607 = vmatprep.subr.mxu1 %v4837_v12 }
 0x9c2   : > { %4608 = vmatpush3.msra.mxu1 %v3664_v11 }
 0x9c3   : > { %4609 = vmatprep.subr.mxu1 %v4837_v12 }
 0x9c4   : > { %4610 = vmatpush3.msra.mxu1 %v3663_v15 }
 0x9c5   : > { %4611 = vmatprep.subr.mxu1 %v4837_v12 }
 0x9c6   : > { %4612 = vmatpush3.msra.mxu1 %v3662_v16 }
 0x9c7   : > { %4613 = vmatprep.subr.mxu1 %v4837_v12 }
 0x9c8   : > { %4614 = vmatpush3.msra.mxu1 %v3661_v17  ;;  %v3682_v17 = vld [vmem:[%s6185_s11 + $0x78] sm:$0xff] }
 0x9c9   : > { %4615 = vmatprep.subr.mxu1 %v4837_v12 }
 0x9ca   : > { %4616 = vmatpush3.msra.mxu1 %v3660_v18  ;;  %v3681_v18 = vld [vmem:[%s6185_s11 + $0x70] sm:$0xff] }
 0x9cb   : > { %4617 = vmatprep.subr.mxu1 %v4837_v12 }
 0x9cc   : > { %4618 = vmatpush3.msra.mxu1 %v3659_v19 }
 0x9cd   : > { %4619 = vmatprep.subr.mxu1 %v4837_v12 }
 0x9ce   : > { %4620 = vmatpush3.msra.mxu1 %v3658_v20  ;;  %v3680_v20 = vld [vmem:[%s6185_s11 + $0x68] sm:$0xff] }
 0x9cf   : > { %4621 = vmatprep.subr.mxu1 %v4837_v12 }
 0x9d0   : > { %4622 = vmatpush3.msra.mxu1 %v3657_v21  ;;  %v3679_v21 = vld [vmem:[%s6185_s11 + $0x60] sm:$0xff] }
 0x9d1   : > { %4623 = vmatprep.subr.mxu1 %v4837_v12 }
 0x9d2   : > { %4624 = vmatpush3.msra.mxu1 %v3656_v22  ;;  %v3678_v22 = vld [vmem:[%s6185_s11 + $0x58] sm:$0xff] }
 0x9d3   : > { %4625 = vmatprep.subr.mxu1 %v4837_v12 }
 0x9d4   : > { %4626 = vmatpush3.msra.mxu1 %v3655_v24  ;;  %v3677_v24 = vld [vmem:[%s6185_s11 + $0x50] sm:$0xff] }
 0x9d5   : > { %4668 = vmatprep.subr.mxu1 %v4837_v12 }
 0xa6d   : > { %v2859_v23 = vpop.f32.mrf.mxu0 }
 0xa6f   : > { %v4589_v25 = vpop.f32.mrf.mxu0 }
 0xa70   : > { %v3675_v25 = vld [vmem:[%s6185_s11 + $0x40] sm:$0xff] }
 0xa71   : > { %v2789_v26 = vpop.f32.mrf.mxu1 }
 0xa72   : > { %v2860_v27 = vadd.f32 %v2859_v23, %v2789_v26  ;;  %v3676_v23 = vld [vmem:[%s6185_s11 + $0x48] sm:$0xff] }
 0xa73   : > { %v4554_v28 = vpop.f32.mrf.mxu1 }
 0xa74   : > { %v3699_v28 = vld [vmem:[%s6185_s11 + $0xf0] sm:$0xff] }
 0xa75   : > { %v2931_v29 = vpop.f32.mrf.mxu1 }
 0xa76   : > { %4628 = vmatmul.mubr.f32.vlgmr.msra.gmra.mxu1 %v2931_v29  ;;  %v3698_v29 = vld [vmem:[%s6185_s11 + $0xe8] sm:$0xff] }
 0xa77   : > { %v4594_v30 = vpop.f32.mrf.mxu1  ;;  %4684 = vmatprep.mubr.msk.f32.mxu1 %vm4838_vm15, %v4837_v12  ;;  %4669 = vmatpush3.msra.mxu1 %v3691_v34  ;;  %v3694_v34 = vld [vmem:[%s6185_s11 + $0xc8] sm:$0xff] }
 0xa78   : > { %4670 = vmatprep.subr.mxu1 %v4837_v12  ;;  %v3697_v30 = vld [vmem:[%s6185_s11 + $0xe0] sm:$0xff] }
 0xa79   : > { %4671 = vmatpush3.msra.mxu1 %v3690_v37 }
 0xa7a   : > { %4672 = vmatprep.subr.mxu1 %v4837_v12 }
 0xa7b   : > { %4673 = vmatpush3.msra.mxu1 %v3689_v39 }
 0xa7c   : > { %4674 = vmatprep.subr.mxu1 %v4837_v12 }
 0xa7d   : > { %4675 = vmatpush3.msra.mxu1 %v3688_v1 }
 0xa7e   : > { %4676 = vmatprep.subr.mxu1 %v4837_v12 }
 0xa7f   : > { %4677 = vmatpush3.msra.mxu1 %v3687_v4 }
 0xa80   : > { %4678 = vmatprep.subr.mxu1 %v4837_v12 }
 0xa81   : > { %4679 = vmatpush3.msra.mxu1 %v3686_v2 }
 0xa82   : > { %4680 = vmatprep.subr.mxu1 %v4837_v12 }
 0xa83   : > { %4681 = vmatpush3.msra.mxu1 %v3685_v43 }
 0xa84   : > { %4682 = vmatprep.subr.mxu1 %v4837_v12 }
 0xa85   : > { %4683 = vmatpush3.msra.mxu1 %v3684_v42 }
 0xb36   : > { %v3018_v44 = vpop.f32.mrf.mxu1 }
 0xb37   : > { %v3022_v46 = vadd.f32 %v3018_v44, %v2860_v27  ;;  %v3700_v27 = vld [vmem:[%s6185_s11 + $0xf8] sm:$0xff] }
 0xb38   : > { %v4629_v48 = vpop.f32.mrf.mxu1 }
 0xb39   : > { %v3030_v13 = vadd.f32 %v3671_v45, %v3022_v46 }
 0xb3b   : > { %v3031_v49 = vand.u32 2147483647, %v3030_v13  ;;  %vm3054_vm5 = vcmp.lt.f32.partialorder %v3030_v13, 0.0  ;;  %v3057_v11 = vmul.f32 0.5, %v3030_v13 }
 0xb3d   : > { %v3032_v14 = vmul.f32 0.70710677, %v3031_v49 }
 0xb3f   : > { %v3033_v50 = vmul.f32 0.3275911, %v3032_v14  ;;  %v3048_v52 = vsub.f32 0.0, %v3032_v14 }
 0xb41   : > { %v3034_v51 = vadd.f32 1.0, %v3033_v50  ;;  %v3049_v56 = vmul.f32 %v3048_v52, %v3032_v14 }
 0xb43   : > { %4771 = vrcp.f32 %v3034_v51  ;;  %v3050_v59 = vmul.f32 1.442695, %v3049_v56 }
 0xb45   : > { %4773 = vpow2.f32 %v3050_v59 }
 0xb50   : > { %v4772_v53 = vpop.eup %4771 }
 0xb51   : > { %v3036_v54 = vmul.f32 %v4772_v53, %v3034_v51 }
 0xb52   : > { %v4774_v7 = vpop.eup %4773 }
 0xb53   : > { %v3037_v55 = vsub.f32 2.0, %v3036_v54 }
 0xb55   : > { %v3038_v57 = vmul.f32 %v4772_v53, %v3037_v55 }
 0xb57   : > { %v3039_v58 = vmul.f32 1.0614054, %v3038_v57 }
 0xb59   : > { %v3672_v60 = vadd.f32 -1.4531521, %v3039_v58 }
 0xb5b   : > { %v3041_v61 = vmul.f32 %v3672_v60, %v3038_v57 }
 0xb5d   : > { %v3042_v62 = vadd.f32 1.4214138, %v3041_v61 }
 0xb5f   : > { %v3043_v63 = vmul.f32 %v3042_v62, %v3038_v57 }
 0xb61   : > { %v3673_v0 = vadd.f32 -0.28449672, %v3043_v63 }
 0xb63   : > { %v3045_v3 = vmul.f32 %v3673_v0, %v3038_v57 }
 0xb65   : > { %v3046_v5 = vadd.f32 0.2548296, %v3045_v3 }
 0xb67   : > { %v3047_v6 = vmul.f32 %v3046_v5, %v3038_v57 }
 0xb69   : > { %v3052_v8 = vmul.f32 %v4774_v7, %v3047_v6 }
 0xb6b   : > { %v3053_v47 = vsub.f32 1.0, %v3052_v8 }
 0xb6d   : > { %v3055_v9 = vsub.f32 0.0, %v3053_v47 }
 0xb6f   : > { %v3056_v10 = vsel %vm3054_vm5, %v3055_v9, %v3053_v47 }
 0xb70   : > { %v3058_v15 = vadd.f32 1.0, %v3056_v10 }
 0xb72   : > { %v3059_v16 = vmul.f32 %v3058_v15, %v3057_v11 }
 0xb74   : > { %4647 = vmatmul.mubr.msk.f32.vlgmr.msra.gmra.mxu0 %vm3069_vm6, %v3059_v16  ;;  %v3236_v19 = vrot.slane %v3059_v16, 2  ;;  %v3153_v26 = vrot.slane %v3059_v16, 1  ;;  %v3319_v37 = vrot.slane %v3059_v16, 3 }
 0xb75   : > { %4650 = vmatpush3.msra.mxu0 %v3682_v17  ;;  %4665 = vmatprep.mubr.msk.f32.mxu0 %vm4838_vm15, %v4837_v12 }
 0xb76   : > { %4651 = vmatprep.subr.mxu0 %v4837_v12  ;;  %4685 = vmatmul.mubr.msk.f32.vlgmr.msra.gmra.mxu1 %vm3069_vm6, %v3236_v19 }
 0xb77   : > { %4652 = vmatpush3.msra.mxu0 %v3681_v18 }
 0xb78   : > { %4653 = vmatprep.subr.mxu0 %v4837_v12 }
 0xb79   : > { %4654 = vmatpush3.msra.mxu0 %v3680_v20 }
 0xb7a   : > { %4655 = vmatprep.subr.mxu0 %v4837_v12 }
 0xb7b   : > { %4656 = vmatpush3.msra.mxu0 %v3679_v21 }
 0xb7c   : > { %4657 = vmatprep.subr.mxu0 %v4837_v12 }
 0xb7d   : > { %4658 = vmatpush3.msra.mxu0 %v3678_v22 }
 0xb7e   : > { %4659 = vmatprep.subr.mxu0 %v4837_v12 }
 0xb7f   : > { %4660 = vmatpush3.msra.mxu0 %v3677_v24 }
 0xb80   : > { %4661 = vmatprep.subr.mxu0 %v4837_v12 }
 0xb81   : > { %4662 = vmatpush3.msra.mxu0 %v3676_v23 }
 0xb82   : > { %4663 = vmatprep.subr.mxu0 %v4837_v12 }
 0xb83   : > { %4664 = vmatpush3.msra.mxu0 %v3675_v25 }
 0xb84   : > { %4666 = vmatmul.mubr.msk.f32.vlgmr.msra.gmra.mxu0 %vm3069_vm6, %v3153_v26  ;;  %4687 = vmatprep.subr.mxu0 %v4837_v12 }
 0xb85   : > { %4688 = vmatpush3.msra.mxu0 %v3700_v27  ;;  %4703 = vmatprep.mubr.msk.f32.mxu0 %vm4838_vm15, %v4837_v12 }
 0xb86   : > { %4689 = vmatprep.subr.mxu0 %v4837_v12 }
 0xb87   : > { %4690 = vmatpush3.msra.mxu0 %v3699_v28 }
 0xb88   : > { %4691 = vmatprep.subr.mxu0 %v4837_v12 }
 0xb89   : > { %4692 = vmatpush3.msra.mxu0 %v3698_v29 }
 0xb8a   : > { %4693 = vmatprep.subr.mxu0 %v4837_v12 }
 0xb8b   : > { %4694 = vmatpush3.msra.mxu0 %v3697_v30 }
 0xb8c   : > { %4695 = vmatprep.subr.mxu0 %v4837_v12 }
 0xb8d   : > { %4696 = vmatpush3.msra.mxu0 %v3696_v31 }
 0xb8e   : > { %4697 = vmatprep.subr.mxu0 %v4837_v12 }
 0xb8f   : > { %4698 = vmatpush3.msra.mxu0 %v3695_v32 }
 0xb90   : > { %4699 = vmatprep.subr.mxu0 %v4837_v12 }
 0xb91   : > { %4700 = vmatpush3.msra.mxu0 %v3694_v34 }
 0xb92   : > { %4701 = vmatprep.subr.mxu0 %v4837_v12 }
 0xb93   : > { %4702 = vmatpush3.msra.mxu0 %v3693_v35 }
 0xb94   : > { %4704 = vmatmul.mubr.msk.f32.vlgmr.msra.gmra.mxu0 %vm3069_vm6, %v3319_v37 }
 0xc34   : > { %v3139_v38 = vpop.f32.mrf.mxu0 }
 0xc35   : > { %v3143_v2 = vadd.f32 %v3139_v38, %v3060_v36 }
 0xc36   : > { %v4648_v39 = vpop.f32.mrf.mxu0  ;;  %v3305_v40 = vpop.f32.mrf.mxu1 }
 0xc38   : > { %v4686_v1 = vpop.f32.mrf.mxu1 }
 0xc44   : > { %v3222_v33 = vpop.f32.mrf.mxu0 }
 0xc45   : > { %v3226_v41 = vadd.f32 %v3222_v33, %v3143_v2 }
 0xc46   : > { %v4667_v4 = vpop.f32.mrf.mxu0 }
 0xc47   : > { %v3309_v12 = vadd.f32 %v3305_v40, %v3226_v41 }
 0xc54   : > { %v3388_v43 = vpop.f32.mrf.mxu0 }
 0xc55   : > { %v3392_v42 = vadd.f32 %v3388_v43, %v3309_v12 }
 0xc56   : > { %v4705_v44 = vpop.f32.mrf.mxu0 }
 0xc57   : > { %3394 = vst.msk [vmem:[%s432_s23] sm:$0x1] %vm3393_vm7, %v3392_v42 }
 0xc58   : > { %4788 = shalt.err (!%p4785_p3)
}
 0xc59   : > { %s4789_s22 = scalar_lea.hbm %s6139_s0, 16  ;;  %s4793_s30 = scalar_lea.hbm %s6187_s13, 32 }
 0xc5a   : > { %p4790_p4 = scmp.ne.s32.totalorder %s6139_s0, %s4789_s22  ;;  %p4794_p9 = scmp.lt.s32.totalorder %s6139_s0, %s6187_s13 }
 0xc5b   : > { %p4795_p10 = scmp.lt.s32.totalorder %s4793_s30, %s4789_s22 }
 0xc5c   : > { %p4791_p7 = pnand %p4790_p4, %p4948_p5 }
 0xc5d   : > { %p4796_p11 = por %p4795_p10, %p4794_p9 }
 0xc5e   : > { %p4792_p8 = pneg %p4791_p7 }
 0xc60   : > { %p4797_p12 = pnand %p4796_p11, %p4792_p8 }
 0xc62   : > { %4800 = shalt.err (!%p4797_p12)
}
 0xc63   : > { %4706 = dma.vmem_to_hbm [thread:$0]  (%p4948_p5), %s3409_s24, 16, %s6139_s0, %s3396_s16  }
 0xc64 PF: > { %p4712_p13 = scmp.ge.s32.totalorder %s4835_s28, 2  ;;  %s3420_s1 = sand.u32 1, %s4823_s25  }
 0xc65   : > { %s3421_s2 = scalar_lea.sflag [#allocation3], %s3420_s1 }
 0xc66   : > { %p4709_p0 = pnand %p4712_p13, %p4952_p6 }
 0xc68   : > { %p4710_p1 = pneg %p4709_p0 }
 0xc6a   : > { %4818 = dma.done.wait (%p4710_p1), %s3421_s2, 16  }
 0xc6b   : > { %4820 = vsyncadd (%p4710_p1), %s3421_s2, 4294967280  ;;  %p23_p2 = scmp.ge.s32.totalorder %s4935_s14, 4   ;;  %s6196_s25 = smov %s4827_s26 }
 0xc6c   : > { %s6197_s26 = smov %s4831_s27  ;;  %s6198_s27 = smov %s4946_s17 }
 0xc6d   : > { %s6199_s28 = smov %s4935_s14  ;;  %25 = sbr.rel (!%p23_p2) target bundleno = 7 (0x7), region = 120 }
 0xc72   :  { %3425 = vsyncpa [#allocation3], 1 }
 0xc73   :  { %3427 = vsyncpa [#allocation3 + $0x1], 1 }

</bundles_post_ra>
